<compile_context>
chip_gen: v7x
topology: tpu7x:2x2x1
jax: 0.10.0
libtpu: 0.0.40
codegen_flags: <defaults>
</compile_context>

<pallas_src>
import functools

import jax
import jax.numpy as jnp
from jax.experimental import pallas as pl
from jax.experimental.pallas import tpu as pltpu

LN_EPS = 1e-5  # matches torch.nn.LayerNorm default


# ----------------------------- in-kernel helpers -----------------------------

def _layer_norm(x, gamma, beta):
    # x: [rows, H] f32, gamma/beta: [1, H] f32
    mean = jnp.mean(x, axis=-1, keepdims=True)
    var = jnp.mean(jnp.square(x - mean), axis=-1, keepdims=True)
    return (x - mean) * jax.lax.rsqrt(var + LN_EPS) * gamma + beta


def _attention(q2, kv3, bias3, wq, wk, wv, wo, num_heads):
    """Multi-head attention with flat (lane-dense) projections.

    q2   : [Bblk*Tq, H] f32  (already layer-normed query-side activation)
    kv3  : [Bblk, Tk, H] f32 (key/value source)
    bias3: broadcastable to [Bblk, Tq, Tk] f32
    wq/wk/wv/wo: [H, H] bf16 (1/sqrt(depth) already folded into wq)
    returns [Bblk*Tq, H] f32
    """
    BT, H = q2.shape
    Bblk, Tk, _ = kv3.shape
    Tq = BT // Bblk
    depth = H // num_heads

    kv2 = kv3.reshape(Bblk * Tk, H)

    # Flat projections: one [rows, H] x [H, H] MXU matmul each, f32 accumulation.
    qp = jnp.dot(q2.astype(jnp.bfloat16), wq, preferred_element_type=jnp.float32)
    kp = jnp.dot(kv2.astype(jnp.bfloat16), wk, preferred_element_type=jnp.float32)
    vp = jnp.dot(kv2.astype(jnp.bfloat16), wv, preferred_element_type=jnp.float32)

    # Per-head logits / softmax / PV (bounded intermediates: one head at a time).
    ctx_heads = []
    for h in range(num_heads):  # static unroll; num_heads is a Python int
        lo, hi = h * depth, (h + 1) * depth
        qh = qp[:, lo:hi].reshape(Bblk, Tq, depth).astype(jnp.bfloat16)
        kh = kp[:, lo:hi].reshape(Bblk, Tk, depth).astype(jnp.bfloat16)
        vh = vp[:, lo:hi].reshape(Bblk, Tk, depth).astype(jnp.bfloat16)

        logits = jnp.einsum('bqd,bkd->bqk', qh, kh,
                            preferred_element_type=jnp.float32)
        logits = logits + bias3

        m = jnp.max(logits, axis=-1, keepdims=True)
        p = jnp.exp(logits - m)
        denom = jnp.sum(p, axis=-1, keepdims=True)
        w = p * pl.reciprocal(denom, approx=True)

        ctx = jnp.einsum('bqk,bkd->bqd', w.astype(jnp.bfloat16), vh,
                         preferred_element_type=jnp.float32)
        ctx_heads.append(ctx.reshape(Bblk * Tq, depth))

    # Combine heads and apply the flat output projection in one MXU matmul.
    ctx_all = jnp.concatenate(ctx_heads, axis=-1).astype(jnp.bfloat16)  # [BT, H]
    return jnp.dot(ctx_all, wo, preferred_element_type=jnp.float32)


# --------------------------------- fused kernel --------------------------------

def decoder_stack_kernel(
    # activations & biases
    x_ref, enc_ref, ed_bias_ref,
    # self-attention per-layer params
    sa_wq_ref, sa_wk_ref, sa_wv_ref, sa_wo_ref, sa_g_ref, sa_b_ref,
    # encoder-decoder attention per-layer params
    ed_wq_ref, ed_wk_ref, ed_wv_ref, ed_wo_ref, ed_g_ref, ed_b_ref,
    # feed-forward per-layer params
    w1_ref, b1_ref, w2_ref, b2_ref, ff_g_ref, ff_b_ref,
    # final output layer-norm
    og_ref, ob_ref,
    # output
    out_ref,
    # scratch: activation resident in VMEM across layers
    x_acc,
    *, num_heads):
    layer = pl.program_id(1)
    num_layers = pl.num_programs(1)
    Bblk, T, H = x_ref.shape
    S = enc_ref.shape[1]

    @pl.when(layer == 0)
    def _():
        x_acc[...] = x_ref[...].reshape(Bblk * T, H)

    x = x_acc[...]  # [Bblk*T, H] f32

    # Causal self-attention bias: pure structure, generated in-kernel (no HBM
    # traffic, no resident [T, T] f32 VMEM block).
    row = jax.lax.broadcasted_iota(jnp.int32, (T, T), 0)
    col = jax.lax.broadcasted_iota(jnp.int32, (T, T), 1)
    causal_bias = jnp.where(col <= row, 0.0, -1e9)[None, :, :]  # [1, T, T]

    # ---- 1. self-attention sub-block: x + MHA(LN(x), LN(x), causal_bias) ----
    y = _layer_norm(x, sa_g_ref[0], sa_b_ref[0])
    y = _attention(y, y.reshape(Bblk, T, H), causal_bias,
                   sa_wq_ref[0], sa_wk_ref[0], sa_wv_ref[0], sa_wo_ref[0],
                   num_heads)
    x = x + y

    # ---- 2. enc-dec attention sub-block: x + MHA(LN(x), enc, padding_bias) ----
    ed_bias = ed_bias_ref[...].reshape(Bblk, 1, S)  # broadcasts over queries
    y = _layer_norm(x, ed_g_ref[0], ed_b_ref[0])
    y = _attention(y, enc_ref[...], ed_bias,
                   ed_wq_ref[0], ed_wk_ref[0], ed_wv_ref[0], ed_wo_ref[0],
                   num_heads)
    x = x + y

    # ---- 3. feed-forward sub-block: x + W2 @ relu(W1 @ LN(x) + b1) + b2 ----
    y = _layer_norm(x, ff_g_ref[0], ff_b_ref[0])
    h = jnp.dot(y.astype(jnp.bfloat16), w1_ref[0],
                preferred_element_type=jnp.float32) + b1_ref[0]
    h = jnp.maximum(h, 0.0)
    y = jnp.dot(h.astype(jnp.bfloat16), w2_ref[0],
                preferred_element_type=jnp.float32) + b2_ref[0]
    x = x + y

    x_acc[...] = x

    # ---- final output normalization, written once per batch block ----
    @pl.when(layer == num_layers - 1)
    def _():
        out_ref[...] = _layer_norm(x_acc[...], og_ref[...],
                                   ob_ref[...]).reshape(Bblk, T, H)


# ------------------------------ kernel wrapper --------------------------------

def _pick_vmem_limit_bytes():
    # Size scoped VMEM from the actual chip (v5e/v6e: 128 MiB, v7x: 64 MiB),
    # leaving ~25% headroom; fall back to a conservative 64 MiB.
    try:
        cap = pltpu.get_tpu_info().vmem_capacity_bytes
        return int(cap * 3 // 4)
    except Exception:
        return 64 * 1024 * 1024


def decoder_stack_forward(params, decoder_inputs, encoder_outputs,
                          self_attention_bias, attention_bias, num_heads,
                          batch_block=None):
    # self_attention_bias is assumed to be the canonical causal bias; the kernel
    # regenerates it from iota (see module-level TODO), so the array is unused.
    del self_attention_bias

    B, T, H = decoder_inputs.shape
    S = encoder_outputs.shape[1]
    L = params["sa_wq"].shape[0]
    F = params["w1"].shape[-1]

    # Batch block: amortizes per-layer weight DMA over Bblk*T rows per grid step.
    # (On v7x, prefer a batch-block count that is a multiple of 2 so both
    # TensorCores get whole blocks.)
    Bblk = B if batch_block is None else batch_block
    assert B % Bblk == 0, "batch must be divisible by the batch block size"
    nb = B // Bblk

    in_specs = [
        # activations & biases (block index constant along the layer axis, so
        # these are DMA'd only once per batch block)
        pl.BlockSpec((Bblk, T, H), lambda b, l: (b, 0, 0)),        # decoder inputs
        pl.BlockSpec((Bblk, S, H), lambda b, l: (b, 0, 0)),        # encoder outputs
        pl.BlockSpec((Bblk, 1, 1, S), lambda b, l: (b, 0, 0, 0)),  # enc-dec bias
        # self-attention per-layer params (flat [H, H] weights, lane-dense)
        pl.BlockSpec((1, H, H), lambda b, l: (l, 0, 0)),
        pl.BlockSpec((1, H, H), lambda b, l: (l, 0, 0)),
        pl.BlockSpec((1, H, H), lambda b, l: (l, 0, 0)),
        pl.BlockSpec((1, H, H), lambda b, l: (l, 0, 0)),
        pl.BlockSpec((1, 1, H), lambda b, l: (l, 0, 0)),
        pl.BlockSpec((1, 1, H), lambda b, l: (l, 0, 0)),
        # enc-dec attention per-layer params
        pl.BlockSpec((1, H, H), lambda b, l: (l, 0, 0)),
        pl.BlockSpec((1, H, H), lambda b, l: (l, 0, 0)),
        pl.BlockSpec((1, H, H), lambda b, l: (l, 0, 0)),
        pl.BlockSpec((1, H, H), lambda b, l: (l, 0, 0)),
        pl.BlockSpec((1, 1, H), lambda b, l: (l, 0, 0)),
        pl.BlockSpec((1, 1, H), lambda b, l: (l, 0, 0)),
        # feed-forward per-layer params
        pl.BlockSpec((1, H, F), lambda b, l: (l, 0, 0)),
        pl.BlockSpec((1, 1, F), lambda b, l: (l, 0, 0)),
        pl.BlockSpec((1, F, H), lambda b, l: (l, 0, 0)),
        pl.BlockSpec((1, 1, H), lambda b, l: (l, 0, 0)),
        pl.BlockSpec((1, 1, H), lambda b, l: (l, 0, 0)),
        pl.BlockSpec((1, 1, H), lambda b, l: (l, 0, 0)),
        # final output layer-norm params
        pl.BlockSpec((1, H), lambda b, l: (0, 0)),
        pl.BlockSpec((1, H), lambda b, l: (0, 0)),
    ]

    kernel = functools.partial(decoder_stack_kernel, num_heads=num_heads)
    return pl.pallas_call(
        kernel,
        out_shape=jax.ShapeDtypeStruct((B, T, H), jnp.float32),
        grid=(nb, L),
        in_specs=in_specs,
        out_specs=pl.BlockSpec((Bblk, T, H), lambda b, l: (b, 0, 0)),
        scratch_shapes=[pltpu.VMEM((Bblk * T, H), jnp.float32)],
        compiler_params=pltpu.CompilerParams(
            dimension_semantics=("parallel", "arbitrary"),
            vmem_limit_bytes=_pick_vmem_limit_bytes()),
    )(decoder_inputs, encoder_outputs, attention_bias,
      params["sa_wq"], params["sa_wk"], params["sa_wv"], params["sa_wo"],
      params["sa_g"], params["sa_b"],
      params["ed_wq"], params["ed_wk"], params["ed_wv"], params["ed_wo"],
      params["ed_g"], params["ed_b"],
      params["w1"], params["b1"], params["w2"], params["b2"],
      params["ff_g"], params["ff_b"],
      params["out_g"], params["out_b"])


# ---------------------------- deterministic params ----------------------------

def init_params(key, num_layers, hidden_size, filter_size, num_heads):
    """Per-layer weights stacked on a leading L axis; attention weights flat [H, H].

    The output columns of wq/wk/wv are head-major (head h owns columns
    [h*depth, (h+1)*depth)) and the input rows of wo follow the same order,
    matching the standard split_heads / combine_heads layout.  The 1/sqrt(depth)
    query scale is folded into wq.
    """
    H, F, L = hidden_size, filter_size, num_layers
    depth = H // num_heads
    q_scale = depth ** -0.5

    def dense(k, shape, scale=0.02):
        return scale * jax.random.normal(k, shape, dtype=jnp.float32)

    keys = jax.random.split(key, 10)
    ones = jnp.ones((L, 1, H), jnp.float32)
    zeros = jnp.zeros((L, 1, H), jnp.float32)

    return {
        "sa_wq": (dense(keys[0], (L, H, H)) * q_scale).astype(jnp.bfloat16),
        "sa_wk": dense(keys[1], (L, H, H)).astype(jnp.bfloat16),
        "sa_wv": dense(keys[2], (L, H, H)).astype(jnp.bfloat16),
        "sa_wo": dense(keys[3], (L, H, H)).astype(jnp.bfloat16),
        "sa_g": ones, "sa_b": zeros,
        "ed_wq": (dense(keys[4], (L, H, H)) * q_scale).astype(jnp.bfloat16),
        "ed_wk": dense(keys[5], (L, H, H)).astype(jnp.bfloat16),
        "ed_wv": dense(keys[6], (L, H, H)).astype(jnp.bfloat16),
        "ed_wo": dense(keys[7], (L, H, H)).astype(jnp.bfloat16),
        "ed_g": ones, "ed_b": zeros,
        "w1": dense(keys[8], (L, H, F)).astype(jnp.bfloat16),
        "b1": jnp.zeros((L, 1, F), jnp.float32),
        "w2": dense(keys[9], (L, F, H)).astype(jnp.bfloat16),
        "b2": jnp.zeros((L, 1, H), jnp.float32),
        "ff_g": ones, "ff_b": zeros,
        "out_g": jnp.ones((1, H), jnp.float32),
        "out_b": jnp.zeros((1, H), jnp.float32),
    }


# ----------------------------------- main -------------------------------------

if __name__ == "__main__":
    num_layers = 2
    hidden_size = 128
    num_heads = 4
    filter_size = 256
    batch = 2
    target_len = 8
    source_len = 8

    key = jax.random.PRNGKey(0)
    key, k_dec, k_enc, k_par = jax.random.split(key, 4)

    decoder_inputs = jax.random.normal(
        k_dec, (batch, target_len, hidden_size), dtype=jnp.float32)
    encoder_outputs = jax.random.normal(
        k_enc, (batch, source_len, hidden_size), dtype=jnp.float32)

    # Causal self-attention bias [1, 1, T, T] (the kernel regenerates this
    # canonical structure in-kernel; passed here for interface parity).
    causal = jnp.tril(jnp.ones((target_len, target_len), jnp.float32))
    self_attention_bias = ((1.0 - causal) * -1e9)[None, None, :, :]

    # Encoder-decoder padding bias [B, 1, 1, S]: mask the last source position of batch 1.
    pad = jnp.zeros((batch, source_len), jnp.float32).at[1, -1].set(-1e9)
    attention_bias = pad[:, None, None, :]

    params = init_params(k_par, num_layers, hidden_size, filter_size, num_heads)

    out = decoder_stack_forward(params, decoder_inputs, encoder_outputs,
                                self_attention_bias, attention_bias, num_heads,
                                batch_block=batch)
    out = jax.block_until_ready(out)
    assert out.shape == (batch, target_len, hidden_size)
    assert out.dtype == jnp.float32
    print("KERNEL_OK")
</pallas_src>

<mosaic_0001>
module attributes {stable_mosaic.version = 11 : i64} {
  func.func @decoder_stack_kernel(%arg0: i32, %arg1: i32, %arg2: memref<2x8x128xf32, #tpu.memory_space<vmem>>, %arg3: memref<2x8x128xf32, #tpu.memory_space<vmem>>, %arg4: memref<2x1x1x8xf32, #tpu.memory_space<vmem>>, %arg5: memref<1x128x128xbf16, #tpu.memory_space<vmem>>, %arg6: memref<1x128x128xbf16, #tpu.memory_space<vmem>>, %arg7: memref<1x128x128xbf16, #tpu.memory_space<vmem>>, %arg8: memref<1x128x128xbf16, #tpu.memory_space<vmem>>, %arg9: memref<1x1x128xf32, #tpu.memory_space<vmem>>, %arg10: memref<1x1x128xf32, #tpu.memory_space<vmem>>, %arg11: memref<1x128x128xbf16, #tpu.memory_space<vmem>>, %arg12: memref<1x128x128xbf16, #tpu.memory_space<vmem>>, %arg13: memref<1x128x128xbf16, #tpu.memory_space<vmem>>, %arg14: memref<1x128x128xbf16, #tpu.memory_space<vmem>>, %arg15: memref<1x1x128xf32, #tpu.memory_space<vmem>>, %arg16: memref<1x1x128xf32, #tpu.memory_space<vmem>>, %arg17: memref<1x128x256xbf16, #tpu.memory_space<vmem>>, %arg18: memref<1x1x256xf32, #tpu.memory_space<vmem>>, %arg19: memref<1x256x128xbf16, #tpu.memory_space<vmem>>, %arg20: memref<1x1x128xf32, #tpu.memory_space<vmem>>, %arg21: memref<1x1x128xf32, #tpu.memory_space<vmem>>, %arg22: memref<1x1x128xf32, #tpu.memory_space<vmem>>, %arg23: memref<1x128xf32, #tpu.memory_space<vmem>>, %arg24: memref<1x128xf32, #tpu.memory_space<vmem>>, %arg25: memref<2x8x128xf32, #tpu.memory_space<vmem>>, %arg26: memref<16x128xf32, #tpu.memory_space<vmem>>) attributes {dimension_semantics = [#tpu.dimension_semantics<parallel>, #tpu.dimension_semantics<arbitrary>], iteration_bounds = array<i64: 1, 2>, scalar_prefetch = 0 : i64, scratch_operands = 1 : i64, tpu.core_type = #tpu.core_type<tc>, window_params = [{transform_indices = @transform_0, window_bounds = array<i64: 2, 8, 128>}, {transform_indices = @transform_1, window_bounds = array<i64: 2, 8, 128>}, {transform_indices = @transform_2, window_bounds = array<i64: 2, 1, 1, 8>}, {transform_indices = @transform_3, window_bounds = array<i64: 1, 128, 128>}, {transform_indices = @transform_4, window_bounds = array<i64: 1, 128, 128>}, {transform_indices = @transform_5, window_bounds = array<i64: 1, 128, 128>}, {transform_indices = @transform_6, window_bounds = array<i64: 1, 128, 128>}, {transform_indices = @transform_7, window_bounds = array<i64: 1, 1, 128>}, {transform_indices = @transform_8, window_bounds = array<i64: 1, 1, 128>}, {transform_indices = @transform_9, window_bounds = array<i64: 1, 128, 128>}, {transform_indices = @transform_10, window_bounds = array<i64: 1, 128, 128>}, {transform_indices = @transform_11, window_bounds = array<i64: 1, 128, 128>}, {transform_indices = @transform_12, window_bounds = array<i64: 1, 128, 128>}, {transform_indices = @transform_13, window_bounds = array<i64: 1, 1, 128>}, {transform_indices = @transform_14, window_bounds = array<i64: 1, 1, 128>}, {transform_indices = @transform_15, window_bounds = array<i64: 1, 128, 256>}, {transform_indices = @transform_16, window_bounds = array<i64: 1, 1, 256>}, {transform_indices = @transform_17, window_bounds = array<i64: 1, 256, 128>}, {transform_indices = @transform_18, window_bounds = array<i64: 1, 1, 128>}, {transform_indices = @transform_19, window_bounds = array<i64: 1, 1, 128>}, {transform_indices = @transform_20, window_bounds = array<i64: 1, 1, 128>}, {pipeline_mode = #tpu.pipeline_mode<synchronous>, transform_indices = @transform_21, window_bounds = array<i64: 1, 128>}, {pipeline_mode = #tpu.pipeline_mode<synchronous>, transform_indices = @transform_22, window_bounds = array<i64: 1, 128>}, {transform_indices = @transform_23, window_bounds = array<i64: 2, 8, 128>}]} {
    %c0_i32 = arith.constant 0 : i32
    %0 = arith.cmpi eq, %arg1, %c0_i32 : i32
    %1 = arith.extui %0 : i1 to i32
    %c0_i32_0 = arith.constant 0 : i32
    %2 = arith.cmpi ne, %1, %c0_i32_0 : i32
    scf.if %2 {
      %c0_125 = arith.constant 0 : index
      %c0_126 = arith.constant 0 : index
      %c0_127 = arith.constant 0 : index
      %354 = vector.load %arg2[%c0_125, %c0_126, %c0_127] : memref<2x8x128xf32, #tpu.memory_space<vmem>>, vector<2x8x128xf32>
      %355 = vector.shape_cast %354 : vector<2x8x128xf32> to vector<16x128xf32>
      %c0_128 = arith.constant 0 : index
      %c0_129 = arith.constant 0 : index
      %356 = vector.load %arg26[%c0_128, %c0_129] : memref<16x128xf32, #tpu.memory_space<vmem>>, vector<16x128xf32>
      tpu.vector_store %arg26[%c0_128, %c0_129], %355 {strides = array<i32>} : memref<16x128xf32, #tpu.memory_space<vmem>>, vector<16x128xf32>,
    } else {
    }
    %c0 = arith.constant 0 : index
    %c0_1 = arith.constant 0 : index
    %3 = vector.load %arg26[%c0, %c0_1] : memref<16x128xf32, #tpu.memory_space<vmem>>, vector<16x128xf32>
    %4 = tpu.iota {dimensions = array<i32: 0>} : vector<8x8xi32>
    %5 = tpu.iota {dimensions = array<i32: 1>} : vector<8x8xi32>
    %6 = arith.cmpi sle, %5, %4 : vector<8x8xi32>
    %cst = arith.constant 0.000000e+00 : f32
    %cst_2 = arith.constant -1.000000e+09 : f32
    %7 = vector.broadcast %cst : f32 to vector<8x8xf32>
    %8 = vector.broadcast %cst_2 : f32 to vector<8x8xf32>
    %9 = arith.select %6, %7, %8 : vector<8x8xi1>, vector<8x8xf32>
    %10 = vector.shape_cast %9 : vector<8x8xf32> to vector<1x8x8xf32>
    %c0_3 = arith.constant 0 : index
    %c0_4 = arith.constant 0 : index
    %c0_5 = arith.constant 0 : index
    %11 = vector.load %arg9[%c0_3, %c0_4, %c0_5] : memref<1x1x128xf32, #tpu.memory_space<vmem>>, vector<1x1x128xf32>
    %12 = vector.shape_cast %11 : vector<1x1x128xf32> to vector<1x128xf32>
    %c0_6 = arith.constant 0 : index
    %c0_7 = arith.constant 0 : index
    %c0_8 = arith.constant 0 : index
    %13 = vector.load %arg10[%c0_6, %c0_7, %c0_8] : memref<1x1x128xf32, #tpu.memory_space<vmem>>, vector<1x1x128xf32>
    %14 = vector.shape_cast %13 : vector<1x1x128xf32> to vector<1x128xf32>
    %cst_9 = arith.constant dense<0.000000e+00> : vector<16xf32>
    %15 = vector.multi_reduction <add>, %3, %cst_9 [1] : vector<16x128xf32> to vector<16xf32>
    %16 = vector.shape_cast %15 : vector<16xf32> to vector<16x1xf32>
    %cst_10 = arith.constant 1.280000e+02 : f32
    %17 = vector.broadcast %cst_10 : f32 to vector<16x1xf32>
    %18 = arith.divf %16, %17 : vector<16x1xf32>
    %19 = vector.broadcast %18 : vector<16x1xf32> to vector<16x128xf32>
    %20 = arith.subf %3, %19 : vector<16x128xf32>
    %21 = arith.mulf %20, %20 : vector<16x128xf32>
    %cst_11 = arith.constant dense<0.000000e+00> : vector<16xf32>
    %22 = vector.multi_reduction <add>, %21, %cst_11 [1] : vector<16x128xf32> to vector<16xf32>
    %23 = vector.shape_cast %22 : vector<16xf32> to vector<16x1xf32>
    %cst_12 = arith.constant 1.280000e+02 : f32
    %24 = vector.broadcast %cst_12 : f32 to vector<16x1xf32>
    %25 = arith.divf %23, %24 : vector<16x1xf32>
    %26 = vector.broadcast %18 : vector<16x1xf32> to vector<16x128xf32>
    %27 = arith.subf %3, %26 : vector<16x128xf32>
    %cst_13 = arith.constant 9.99999974E-6 : f32
    %28 = vector.broadcast %cst_13 : f32 to vector<16x1xf32>
    %29 = arith.addf %25, %28 : vector<16x1xf32>
    %30 = math.rsqrt %29 : vector<16x1xf32>
    %31 = vector.broadcast %30 : vector<16x1xf32> to vector<16x128xf32>
    %32 = arith.mulf %27, %31 : vector<16x128xf32>
    %33 = vector.broadcast %12 : vector<1x128xf32> to vector<16x128xf32>
    %34 = arith.mulf %32, %33 : vector<16x128xf32>
    %35 = vector.broadcast %14 : vector<1x128xf32> to vector<16x128xf32>
    %36 = arith.addf %34, %35 : vector<16x128xf32>
    %37 = vector.shape_cast %36 : vector<16x128xf32> to vector<2x8x128xf32>
    %c0_14 = arith.constant 0 : index
    %c0_15 = arith.constant 0 : index
    %c0_16 = arith.constant 0 : index
    %38 = vector.load %arg5[%c0_14, %c0_15, %c0_16] : memref<1x128x128xbf16, #tpu.memory_space<vmem>>, vector<1x128x128xbf16>
    %39 = vector.shape_cast %38 : vector<1x128x128xbf16> to vector<128x128xbf16>
    %c0_17 = arith.constant 0 : index
    %c0_18 = arith.constant 0 : index
    %c0_19 = arith.constant 0 : index
    %40 = vector.load %arg6[%c0_17, %c0_18, %c0_19] : memref<1x128x128xbf16, #tpu.memory_space<vmem>>, vector<1x128x128xbf16>
    %41 = vector.shape_cast %40 : vector<1x128x128xbf16> to vector<128x128xbf16>
    %c0_20 = arith.constant 0 : index
    %c0_21 = arith.constant 0 : index
    %c0_22 = arith.constant 0 : index
    %42 = vector.load %arg7[%c0_20, %c0_21, %c0_22] : memref<1x128x128xbf16, #tpu.memory_space<vmem>>, vector<1x128x128xbf16>
    %43 = vector.shape_cast %42 : vector<1x128x128xbf16> to vector<128x128xbf16>
    %c0_23 = arith.constant 0 : index
    %c0_24 = arith.constant 0 : index
    %c0_25 = arith.constant 0 : index
    %44 = vector.load %arg8[%c0_23, %c0_24, %c0_25] : memref<1x128x128xbf16, #tpu.memory_space<vmem>>, vector<1x128x128xbf16>
    %45 = vector.shape_cast %44 : vector<1x128x128xbf16> to vector<128x128xbf16>
    %46 = vector.shape_cast %37 : vector<2x8x128xf32> to vector<16x128xf32>
    %47 = arith.truncf %36 : vector<16x128xf32> to vector<16x128xbf16>
    %cst_26 = arith.constant dense<0.000000e+00> : vector<16x128xf32>
    %48 = tpu.matmul %47, %39, %cst_26 {dimension_numbers = #tpu.dot_dimension_numbers<[1], [0], [0], [1], [0, 0, 1, 1], [], []>} : vector<16x128xbf16>, vector<128x128xbf16>, vector<16x128xf32> -> vector<16x128xf32>
    %49 = arith.truncf %46 : vector<16x128xf32> to vector<16x128xbf16>
    %cst_27 = arith.constant dense<0.000000e+00> : vector<16x128xf32>
    %50 = tpu.matmul %49, %41, %cst_27 {dimension_numbers = #tpu.dot_dimension_numbers<[1], [0], [0], [1], [0, 0, 1, 1], [], []>} : vector<16x128xbf16>, vector<128x128xbf16>, vector<16x128xf32> -> vector<16x128xf32>
    %51 = arith.truncf %46 : vector<16x128xf32> to vector<16x128xbf16>
    %cst_28 = arith.constant dense<0.000000e+00> : vector<16x128xf32>
    %52 = tpu.matmul %51, %43, %cst_28 {dimension_numbers = #tpu.dot_dimension_numbers<[1], [0], [0], [1], [0, 0, 1, 1], [], []>} : vector<16x128xbf16>, vector<128x128xbf16>, vector<16x128xf32> -> vector<16x128xf32>
    %53 = vector.extract_strided_slice %48 {offsets = [0, 0], sizes = [16, 32], strides = [1, 1]} : vector<16x128xf32> to vector<16x32xf32>
    %54 = vector.shape_cast %53 : vector<16x32xf32> to vector<2x8x32xf32>
    %55 = arith.truncf %54 : vector<2x8x32xf32> to vector<2x8x32xbf16>
    %56 = vector.extract_strided_slice %50 {offsets = [0, 0], sizes = [16, 32], strides = [1, 1]} : vector<16x128xf32> to vector<16x32xf32>
    %57 = vector.shape_cast %56 : vector<16x32xf32> to vector<2x8x32xf32>
    %58 = arith.truncf %57 : vector<2x8x32xf32> to vector<2x8x32xbf16>
    %59 = vector.extract_strided_slice %52 {offsets = [0, 0], sizes = [16, 32], strides = [1, 1]} : vector<16x128xf32> to vector<16x32xf32>
    %60 = vector.shape_cast %59 : vector<16x32xf32> to vector<2x8x32xf32>
    %61 = arith.truncf %60 : vector<2x8x32xf32> to vector<2x8x32xbf16>
    "tpu.trace_start"() <{level = 10 : i32, message = "bqd,bkd->bqk"}> : () -> ()
    %cst_29 = arith.constant dense<0.000000e+00> : vector<2x8x8xf32>
    %62 = tpu.matmul %55, %58, %cst_29 {dimension_numbers = #tpu.dot_dimension_numbers<[2], [2], [1], [1], [0, 0, 0, 1, 1, 1], [0], [0]>} : vector<2x8x32xbf16>, vector<2x8x32xbf16>, vector<2x8x8xf32> -> vector<2x8x8xf32>
    "tpu.trace_stop"() : () -> ()
    %63 = vector.broadcast %10 : vector<1x8x8xf32> to vector<2x8x8xf32>
    %64 = arith.addf %62, %63 : vector<2x8x8xf32>
    %cst_30 = arith.constant dense<0xFF800000> : vector<2x8xf32>
    %65 = vector.multi_reduction <maximumf>, %64, %cst_30 [2] : vector<2x8x8xf32> to vector<2x8xf32>
    %66 = vector.shape_cast %65 : vector<2x8xf32> to vector<2x8x1xf32>
    %67 = vector.broadcast %66 : vector<2x8x1xf32> to vector<2x8x8xf32>
    %68 = arith.subf %64, %67 : vector<2x8x8xf32>
    %69 = math.exp %68 : vector<2x8x8xf32>
    %cst_31 = arith.constant dense<0.000000e+00> : vector<2x8xf32>
    %70 = vector.multi_reduction <add>, %69, %cst_31 [2] : vector<2x8x8xf32> to vector<2x8xf32>
    %71 = vector.shape_cast %70 : vector<2x8xf32> to vector<2x8x1xf32>
    %72 = tpu.reciprocal %71 {approx = true} : vector<2x8x1xf32> -> vector<2x8x1xf32>
    %73 = vector.broadcast %72 : vector<2x8x1xf32> to vector<2x8x8xf32>
    %74 = arith.mulf %69, %73 : vector<2x8x8xf32>
    %75 = arith.truncf %74 : vector<2x8x8xf32> to vector<2x8x8xbf16>
    "tpu.trace_start"() <{level = 10 : i32, message = "bqk,bkd->bqd"}> : () -> ()
    %cst_32 = arith.constant dense<0.000000e+00> : vector<2x8x32xf32>
    %76 = tpu.matmul %75, %61, %cst_32 {dimension_numbers = #tpu.dot_dimension_numbers<[2], [1], [1], [2], [0, 0, 0, 1, 1, 2], [0], [0]>} : vector<2x8x8xbf16>, vector<2x8x32xbf16>, vector<2x8x32xf32> -> vector<2x8x32xf32>
    "tpu.trace_stop"() : () -> ()
    %77 = vector.shape_cast %76 : vector<2x8x32xf32> to vector<16x32xf32>
    %78 = vector.extract_strided_slice %48 {offsets = [0, 32], sizes = [16, 32], strides = [1, 1]} : vector<16x128xf32> to vector<16x32xf32>
    %79 = vector.shape_cast %78 : vector<16x32xf32> to vector<2x8x32xf32>
    %80 = arith.truncf %79 : vector<2x8x32xf32> to vector<2x8x32xbf16>
    %81 = vector.extract_strided_slice %50 {offsets = [0, 32], sizes = [16, 32], strides = [1, 1]} : vector<16x128xf32> to vector<16x32xf32>
    %82 = vector.shape_cast %81 : vector<16x32xf32> to vector<2x8x32xf32>
    %83 = arith.truncf %82 : vector<2x8x32xf32> to vector<2x8x32xbf16>
    %84 = vector.extract_strided_slice %52 {offsets = [0, 32], sizes = [16, 32], strides = [1, 1]} : vector<16x128xf32> to vector<16x32xf32>
    %85 = vector.shape_cast %84 : vector<16x32xf32> to vector<2x8x32xf32>
    %86 = arith.truncf %85 : vector<2x8x32xf32> to vector<2x8x32xbf16>
    "tpu.trace_start"() <{level = 10 : i32, message = "bqd,bkd->bqk"}> : () -> ()
    %cst_33 = arith.constant dense<0.000000e+00> : vector<2x8x8xf32>
    %87 = tpu.matmul %80, %83, %cst_33 {dimension_numbers = #tpu.dot_dimension_numbers<[2], [2], [1], [1], [0, 0, 0, 1, 1, 1], [0], [0]>} : vector<2x8x32xbf16>, vector<2x8x32xbf16>, vector<2x8x8xf32> -> vector<2x8x8xf32>
    "tpu.trace_stop"() : () -> ()
    %88 = vector.broadcast %10 : vector<1x8x8xf32> to vector<2x8x8xf32>
    %89 = arith.addf %87, %88 : vector<2x8x8xf32>
    %cst_34 = arith.constant dense<0xFF800000> : vector<2x8xf32>
    %90 = vector.multi_reduction <maximumf>, %89, %cst_34 [2] : vector<2x8x8xf32> to vector<2x8xf32>
    %91 = vector.shape_cast %90 : vector<2x8xf32> to vector<2x8x1xf32>
    %92 = vector.broadcast %91 : vector<2x8x1xf32> to vector<2x8x8xf32>
    %93 = arith.subf %89, %92 : vector<2x8x8xf32>
    %94 = math.exp %93 : vector<2x8x8xf32>
    %cst_35 = arith.constant dense<0.000000e+00> : vector<2x8xf32>
    %95 = vector.multi_reduction <add>, %94, %cst_35 [2] : vector<2x8x8xf32> to vector<2x8xf32>
    %96 = vector.shape_cast %95 : vector<2x8xf32> to vector<2x8x1xf32>
    %97 = tpu.reciprocal %96 {approx = true} : vector<2x8x1xf32> -> vector<2x8x1xf32>
    %98 = vector.broadcast %97 : vector<2x8x1xf32> to vector<2x8x8xf32>
    %99 = arith.mulf %94, %98 : vector<2x8x8xf32>
    %100 = arith.truncf %99 : vector<2x8x8xf32> to vector<2x8x8xbf16>
    "tpu.trace_start"() <{level = 10 : i32, message = "bqk,bkd->bqd"}> : () -> ()
    %cst_36 = arith.constant dense<0.000000e+00> : vector<2x8x32xf32>
    %101 = tpu.matmul %100, %86, %cst_36 {dimension_numbers = #tpu.dot_dimension_numbers<[2], [1], [1], [2], [0, 0, 0, 1, 1, 2], [0], [0]>} : vector<2x8x8xbf16>, vector<2x8x32xbf16>, vector<2x8x32xf32> -> vector<2x8x32xf32>
    "tpu.trace_stop"() : () -> ()
    %102 = vector.shape_cast %101 : vector<2x8x32xf32> to vector<16x32xf32>
    %103 = vector.extract_strided_slice %48 {offsets = [0, 64], sizes = [16, 32], strides = [1, 1]} : vector<16x128xf32> to vector<16x32xf32>
    %104 = vector.shape_cast %103 : vector<16x32xf32> to vector<2x8x32xf32>
    %105 = arith.truncf %104 : vector<2x8x32xf32> to vector<2x8x32xbf16>
    %106 = vector.extract_strided_slice %50 {offsets = [0, 64], sizes = [16, 32], strides = [1, 1]} : vector<16x128xf32> to vector<16x32xf32>
    %107 = vector.shape_cast %106 : vector<16x32xf32> to vector<2x8x32xf32>
    %108 = arith.truncf %107 : vector<2x8x32xf32> to vector<2x8x32xbf16>
    %109 = vector.extract_strided_slice %52 {offsets = [0, 64], sizes = [16, 32], strides = [1, 1]} : vector<16x128xf32> to vector<16x32xf32>
    %110 = vector.shape_cast %109 : vector<16x32xf32> to vector<2x8x32xf32>
    %111 = arith.truncf %110 : vector<2x8x32xf32> to vector<2x8x32xbf16>
    "tpu.trace_start"() <{level = 10 : i32, message = "bqd,bkd->bqk"}> : () -> ()
    %cst_37 = arith.constant dense<0.000000e+00> : vector<2x8x8xf32>
    %112 = tpu.matmul %105, %108, %cst_37 {dimension_numbers = #tpu.dot_dimension_numbers<[2], [2], [1], [1], [0, 0, 0, 1, 1, 1], [0], [0]>} : vector<2x8x32xbf16>, vector<2x8x32xbf16>, vector<2x8x8xf32> -> vector<2x8x8xf32>
    "tpu.trace_stop"() : () -> ()
    %113 = vector.broadcast %10 : vector<1x8x8xf32> to vector<2x8x8xf32>
    %114 = arith.addf %112, %113 : vector<2x8x8xf32>
    %cst_38 = arith.constant dense<0xFF800000> : vector<2x8xf32>
    %115 = vector.multi_reduction <maximumf>, %114, %cst_38 [2] : vector<2x8x8xf32> to vector<2x8xf32>
    %116 = vector.shape_cast %115 : vector<2x8xf32> to vector<2x8x1xf32>
    %117 = vector.broadcast %116 : vector<2x8x1xf32> to vector<2x8x8xf32>
    %118 = arith.subf %114, %117 : vector<2x8x8xf32>
    %119 = math.exp %118 : vector<2x8x8xf32>
    %cst_39 = arith.constant dense<0.000000e+00> : vector<2x8xf32>
    %120 = vector.multi_reduction <add>, %119, %cst_39 [2] : vector<2x8x8xf32> to vector<2x8xf32>
    %121 = vector.shape_cast %120 : vector<2x8xf32> to vector<2x8x1xf32>
    %122 = tpu.reciprocal %121 {approx = true} : vector<2x8x1xf32> -> vector<2x8x1xf32>
    %123 = vector.broadcast %122 : vector<2x8x1xf32> to vector<2x8x8xf32>
    %124 = arith.mulf %119, %123 : vector<2x8x8xf32>
    %125 = arith.truncf %124 : vector<2x8x8xf32> to vector<2x8x8xbf16>
    "tpu.trace_start"() <{level = 10 : i32, message = "bqk,bkd->bqd"}> : () -> ()
    %cst_40 = arith.constant dense<0.000000e+00> : vector<2x8x32xf32>
    %126 = tpu.matmul %125, %111, %cst_40 {dimension_numbers = #tpu.dot_dimension_numbers<[2], [1], [1], [2], [0, 0, 0, 1, 1, 2], [0], [0]>} : vector<2x8x8xbf16>, vector<2x8x32xbf16>, vector<2x8x32xf32> -> vector<2x8x32xf32>
    "tpu.trace_stop"() : () -> ()
    %127 = vector.shape_cast %126 : vector<2x8x32xf32> to vector<16x32xf32>
    %128 = vector.extract_strided_slice %48 {offsets = [0, 96], sizes = [16, 32], strides = [1, 1]} : vector<16x128xf32> to vector<16x32xf32>
    %129 = vector.shape_cast %128 : vector<16x32xf32> to vector<2x8x32xf32>
    %130 = arith.truncf %129 : vector<2x8x32xf32> to vector<2x8x32xbf16>
    %131 = vector.extract_strided_slice %50 {offsets = [0, 96], sizes = [16, 32], strides = [1, 1]} : vector<16x128xf32> to vector<16x32xf32>
    %132 = vector.shape_cast %131 : vector<16x32xf32> to vector<2x8x32xf32>
    %133 = arith.truncf %132 : vector<2x8x32xf32> to vector<2x8x32xbf16>
    %134 = vector.extract_strided_slice %52 {offsets = [0, 96], sizes = [16, 32], strides = [1, 1]} : vector<16x128xf32> to vector<16x32xf32>
    %135 = vector.shape_cast %134 : vector<16x32xf32> to vector<2x8x32xf32>
    %136 = arith.truncf %135 : vector<2x8x32xf32> to vector<2x8x32xbf16>
    "tpu.trace_start"() <{level = 10 : i32, message = "bqd,bkd->bqk"}> : () -> ()
    %cst_41 = arith.constant dense<0.000000e+00> : vector<2x8x8xf32>
    %137 = tpu.matmul %130, %133, %cst_41 {dimension_numbers = #tpu.dot_dimension_numbers<[2], [2], [1], [1], [0, 0, 0, 1, 1, 1], [0], [0]>} : vector<2x8x32xbf16>, vector<2x8x32xbf16>, vector<2x8x8xf32> -> vector<2x8x8xf32>
    "tpu.trace_stop"() : () -> ()
    %138 = vector.broadcast %10 : vector<1x8x8xf32> to vector<2x8x8xf32>
    %139 = arith.addf %137, %138 : vector<2x8x8xf32>
    %cst_42 = arith.constant dense<0xFF800000> : vector<2x8xf32>
    %140 = vector.multi_reduction <maximumf>, %139, %cst_42 [2] : vector<2x8x8xf32> to vector<2x8xf32>
    %141 = vector.shape_cast %140 : vector<2x8xf32> to vector<2x8x1xf32>
    %142 = vector.broadcast %141 : vector<2x8x1xf32> to vector<2x8x8xf32>
    %143 = arith.subf %139, %142 : vector<2x8x8xf32>
    %144 = math.exp %143 : vector<2x8x8xf32>
    %cst_43 = arith.constant dense<0.000000e+00> : vector<2x8xf32>
    %145 = vector.multi_reduction <add>, %144, %cst_43 [2] : vector<2x8x8xf32> to vector<2x8xf32>
    %146 = vector.shape_cast %145 : vector<2x8xf32> to vector<2x8x1xf32>
    %147 = tpu.reciprocal %146 {approx = true} : vector<2x8x1xf32> -> vector<2x8x1xf32>
    %148 = vector.broadcast %147 : vector<2x8x1xf32> to vector<2x8x8xf32>
    %149 = arith.mulf %144, %148 : vector<2x8x8xf32>
    %150 = arith.truncf %149 : vector<2x8x8xf32> to vector<2x8x8xbf16>
    "tpu.trace_start"() <{level = 10 : i32, message = "bqk,bkd->bqd"}> : () -> ()
    %cst_44 = arith.constant dense<0.000000e+00> : vector<2x8x32xf32>
    %151 = tpu.matmul %150, %136, %cst_44 {dimension_numbers = #tpu.dot_dimension_numbers<[2], [1], [1], [2], [0, 0, 0, 1, 1, 2], [0], [0]>} : vector<2x8x8xbf16>, vector<2x8x32xbf16>, vector<2x8x32xf32> -> vector<2x8x32xf32>
    "tpu.trace_stop"() : () -> ()
    %152 = vector.shape_cast %151 : vector<2x8x32xf32> to vector<16x32xf32>
    %153 = tpu.concatenate %77, %102, %127, %152 in 1 : vector<16x32xf32>, vector<16x32xf32>, vector<16x32xf32>, vector<16x32xf32> -> vector<16x128xf32>
    %154 = arith.truncf %153 : vector<16x128xf32> to vector<16x128xbf16>
    %cst_45 = arith.constant dense<0.000000e+00> : vector<16x128xf32>
    %155 = tpu.matmul %154, %45, %cst_45 {dimension_numbers = #tpu.dot_dimension_numbers<[1], [0], [0], [1], [0, 0, 1, 1], [], []>} : vector<16x128xbf16>, vector<128x128xbf16>, vector<16x128xf32> -> vector<16x128xf32>
    %156 = arith.addf %3, %155 : vector<16x128xf32>
    %c0_46 = arith.constant 0 : index
    %c0_47 = arith.constant 0 : index
    %c0_48 = arith.constant 0 : index
    %c0_49 = arith.constant 0 : index
    %157 = vector.load %arg4[%c0_46, %c0_47, %c0_48, %c0_49] : memref<2x1x1x8xf32, #tpu.memory_space<vmem>>, vector<2x1x1x8xf32>
    %158 = vector.shape_cast %157 : vector<2x1x1x8xf32> to vector<2x1x8xf32>
    %c0_50 = arith.constant 0 : index
    %c0_51 = arith.constant 0 : index
    %c0_52 = arith.constant 0 : index
    %159 = vector.load %arg15[%c0_50, %c0_51, %c0_52] : memref<1x1x128xf32, #tpu.memory_space<vmem>>, vector<1x1x128xf32>
    %160 = vector.shape_cast %159 : vector<1x1x128xf32> to vector<1x128xf32>
    %c0_53 = arith.constant 0 : index
    %c0_54 = arith.constant 0 : index
    %c0_55 = arith.constant 0 : index
    %161 = vector.load %arg16[%c0_53, %c0_54, %c0_55] : memref<1x1x128xf32, #tpu.memory_space<vmem>>, vector<1x1x128xf32>
    %162 = vector.shape_cast %161 : vector<1x1x128xf32> to vector<1x128xf32>
    %cst_56 = arith.constant dense<0.000000e+00> : vector<16xf32>
    %163 = vector.multi_reduction <add>, %156, %cst_56 [1] : vector<16x128xf32> to vector<16xf32>
    %164 = vector.shape_cast %163 : vector<16xf32> to vector<16x1xf32>
    %cst_57 = arith.constant 1.280000e+02 : f32
    %165 = vector.broadcast %cst_57 : f32 to vector<16x1xf32>
    %166 = arith.divf %164, %165 : vector<16x1xf32>
    %167 = vector.broadcast %166 : vector<16x1xf32> to vector<16x128xf32>
    %168 = arith.subf %156, %167 : vector<16x128xf32>
    %169 = arith.mulf %168, %168 : vector<16x128xf32>
    %cst_58 = arith.constant dense<0.000000e+00> : vector<16xf32>
    %170 = vector.multi_reduction <add>, %169, %cst_58 [1] : vector<16x128xf32> to vector<16xf32>
    %171 = vector.shape_cast %170 : vector<16xf32> to vector<16x1xf32>
    %cst_59 = arith.constant 1.280000e+02 : f32
    %172 = vector.broadcast %cst_59 : f32 to vector<16x1xf32>
    %173 = arith.divf %171, %172 : vector<16x1xf32>
    %174 = vector.broadcast %166 : vector<16x1xf32> to vector<16x128xf32>
    %175 = arith.subf %156, %174 : vector<16x128xf32>
    %cst_60 = arith.constant 9.99999974E-6 : f32
    %176 = vector.broadcast %cst_60 : f32 to vector<16x1xf32>
    %177 = arith.addf %173, %176 : vector<16x1xf32>
    %178 = math.rsqrt %177 : vector<16x1xf32>
    %179 = vector.broadcast %178 : vector<16x1xf32> to vector<16x128xf32>
    %180 = arith.mulf %175, %179 : vector<16x128xf32>
    %181 = vector.broadcast %160 : vector<1x128xf32> to vector<16x128xf32>
    %182 = arith.mulf %180, %181 : vector<16x128xf32>
    %183 = vector.broadcast %162 : vector<1x128xf32> to vector<16x128xf32>
    %184 = arith.addf %182, %183 : vector<16x128xf32>
    %c0_61 = arith.constant 0 : index
    %c0_62 = arith.constant 0 : index
    %c0_63 = arith.constant 0 : index
    %185 = vector.load %arg3[%c0_61, %c0_62, %c0_63] : memref<2x8x128xf32, #tpu.memory_space<vmem>>, vector<2x8x128xf32>
    %c0_64 = arith.constant 0 : index
    %c0_65 = arith.constant 0 : index
    %c0_66 = arith.constant 0 : index
    %186 = vector.load %arg11[%c0_64, %c0_65, %c0_66] : memref<1x128x128xbf16, #tpu.memory_space<vmem>>, vector<1x128x128xbf16>
    %187 = vector.shape_cast %186 : vector<1x128x128xbf16> to vector<128x128xbf16>
    %c0_67 = arith.constant 0 : index
    %c0_68 = arith.constant 0 : index
    %c0_69 = arith.constant 0 : index
    %188 = vector.load %arg12[%c0_67, %c0_68, %c0_69] : memref<1x128x128xbf16, #tpu.memory_space<vmem>>, vector<1x128x128xbf16>
    %189 = vector.shape_cast %188 : vector<1x128x128xbf16> to vector<128x128xbf16>
    %c0_70 = arith.constant 0 : index
    %c0_71 = arith.constant 0 : index
    %c0_72 = arith.constant 0 : index
    %190 = vector.load %arg13[%c0_70, %c0_71, %c0_72] : memref<1x128x128xbf16, #tpu.memory_space<vmem>>, vector<1x128x128xbf16>
    %191 = vector.shape_cast %190 : vector<1x128x128xbf16> to vector<128x128xbf16>
    %c0_73 = arith.constant 0 : index
    %c0_74 = arith.constant 0 : index
    %c0_75 = arith.constant 0 : index
    %192 = vector.load %arg14[%c0_73, %c0_74, %c0_75] : memref<1x128x128xbf16, #tpu.memory_space<vmem>>, vector<1x128x128xbf16>
    %193 = vector.shape_cast %192 : vector<1x128x128xbf16> to vector<128x128xbf16>
    %194 = vector.shape_cast %185 : vector<2x8x128xf32> to vector<16x128xf32>
    %195 = arith.truncf %184 : vector<16x128xf32> to vector<16x128xbf16>
    %cst_76 = arith.constant dense<0.000000e+00> : vector<16x128xf32>
    %196 = tpu.matmul %195, %187, %cst_76 {dimension_numbers = #tpu.dot_dimension_numbers<[1], [0], [0], [1], [0, 0, 1, 1], [], []>} : vector<16x128xbf16>, vector<128x128xbf16>, vector<16x128xf32> -> vector<16x128xf32>
    %197 = arith.truncf %194 : vector<16x128xf32> to vector<16x128xbf16>
    %cst_77 = arith.constant dense<0.000000e+00> : vector<16x128xf32>
    %198 = tpu.matmul %197, %189, %cst_77 {dimension_numbers = #tpu.dot_dimension_numbers<[1], [0], [0], [1], [0, 0, 1, 1], [], []>} : vector<16x128xbf16>, vector<128x128xbf16>, vector<16x128xf32> -> vector<16x128xf32>
    %199 = arith.truncf %194 : vector<16x128xf32> to vector<16x128xbf16>
    %cst_78 = arith.constant dense<0.000000e+00> : vector<16x128xf32>
    %200 = tpu.matmul %199, %191, %cst_78 {dimension_numbers = #tpu.dot_dimension_numbers<[1], [0], [0], [1], [0, 0, 1, 1], [], []>} : vector<16x128xbf16>, vector<128x128xbf16>, vector<16x128xf32> -> vector<16x128xf32>
    %201 = vector.extract_strided_slice %196 {offsets = [0, 0], sizes = [16, 32], strides = [1, 1]} : vector<16x128xf32> to vector<16x32xf32>
    %202 = vector.shape_cast %201 : vector<16x32xf32> to vector<2x8x32xf32>
    %203 = arith.truncf %202 : vector<2x8x32xf32> to vector<2x8x32xbf16>
    %204 = vector.extract_strided_slice %198 {offsets = [0, 0], sizes = [16, 32], strides = [1, 1]} : vector<16x128xf32> to vector<16x32xf32>
    %205 = vector.shape_cast %204 : vector<16x32xf32> to vector<2x8x32xf32>
    %206 = arith.truncf %205 : vector<2x8x32xf32> to vector<2x8x32xbf16>
    %207 = vector.extract_strided_slice %200 {offsets = [0, 0], sizes = [16, 32], strides = [1, 1]} : vector<16x128xf32> to vector<16x32xf32>
    %208 = vector.shape_cast %207 : vector<16x32xf32> to vector<2x8x32xf32>
    %209 = arith.truncf %208 : vector<2x8x32xf32> to vector<2x8x32xbf16>
    "tpu.trace_start"() <{level = 10 : i32, message = "bqd,bkd->bqk"}> : () -> ()
    %cst_79 = arith.constant dense<0.000000e+00> : vector<2x8x8xf32>
    %210 = tpu.matmul %203, %206, %cst_79 {dimension_numbers = #tpu.dot_dimension_numbers<[2], [2], [1], [1], [0, 0, 0, 1, 1, 1], [0], [0]>} : vector<2x8x32xbf16>, vector<2x8x32xbf16>, vector<2x8x8xf32> -> vector<2x8x8xf32>
    "tpu.trace_stop"() : () -> ()
    %211 = vector.broadcast %158 : vector<2x1x8xf32> to vector<2x8x8xf32>
    %212 = arith.addf %210, %211 : vector<2x8x8xf32>
    %cst_80 = arith.constant dense<0xFF800000> : vector<2x8xf32>
    %213 = vector.multi_reduction <maximumf>, %212, %cst_80 [2] : vector<2x8x8xf32> to vector<2x8xf32>
    %214 = vector.shape_cast %213 : vector<2x8xf32> to vector<2x8x1xf32>
    %215 = vector.broadcast %214 : vector<2x8x1xf32> to vector<2x8x8xf32>
    %216 = arith.subf %212, %215 : vector<2x8x8xf32>
    %217 = math.exp %216 : vector<2x8x8xf32>
    %cst_81 = arith.constant dense<0.000000e+00> : vector<2x8xf32>
    %218 = vector.multi_reduction <add>, %217, %cst_81 [2] : vector<2x8x8xf32> to vector<2x8xf32>
    %219 = vector.shape_cast %218 : vector<2x8xf32> to vector<2x8x1xf32>
    %220 = tpu.reciprocal %219 {approx = true} : vector<2x8x1xf32> -> vector<2x8x1xf32>
    %221 = vector.broadcast %220 : vector<2x8x1xf32> to vector<2x8x8xf32>
    %222 = arith.mulf %217, %221 : vector<2x8x8xf32>
    %223 = arith.truncf %222 : vector<2x8x8xf32> to vector<2x8x8xbf16>
    "tpu.trace_start"() <{level = 10 : i32, message = "bqk,bkd->bqd"}> : () -> ()
    %cst_82 = arith.constant dense<0.000000e+00> : vector<2x8x32xf32>
    %224 = tpu.matmul %223, %209, %cst_82 {dimension_numbers = #tpu.dot_dimension_numbers<[2], [1], [1], [2], [0, 0, 0, 1, 1, 2], [0], [0]>} : vector<2x8x8xbf16>, vector<2x8x32xbf16>, vector<2x8x32xf32> -> vector<2x8x32xf32>
    "tpu.trace_stop"() : () -> ()
    %225 = vector.shape_cast %224 : vector<2x8x32xf32> to vector<16x32xf32>
    %226 = vector.extract_strided_slice %196 {offsets = [0, 32], sizes = [16, 32], strides = [1, 1]} : vector<16x128xf32> to vector<16x32xf32>
    %227 = vector.shape_cast %226 : vector<16x32xf32> to vector<2x8x32xf32>
    %228 = arith.truncf %227 : vector<2x8x32xf32> to vector<2x8x32xbf16>
    %229 = vector.extract_strided_slice %198 {offsets = [0, 32], sizes = [16, 32], strides = [1, 1]} : vector<16x128xf32> to vector<16x32xf32>
    %230 = vector.shape_cast %229 : vector<16x32xf32> to vector<2x8x32xf32>
    %231 = arith.truncf %230 : vector<2x8x32xf32> to vector<2x8x32xbf16>
    %232 = vector.extract_strided_slice %200 {offsets = [0, 32], sizes = [16, 32], strides = [1, 1]} : vector<16x128xf32> to vector<16x32xf32>
    %233 = vector.shape_cast %232 : vector<16x32xf32> to vector<2x8x32xf32>
    %234 = arith.truncf %233 : vector<2x8x32xf32> to vector<2x8x32xbf16>
    "tpu.trace_start"() <{level = 10 : i32, message = "bqd,bkd->bqk"}> : () -> ()
    %cst_83 = arith.constant dense<0.000000e+00> : vector<2x8x8xf32>
    %235 = tpu.matmul %228, %231, %cst_83 {dimension_numbers = #tpu.dot_dimension_numbers<[2], [2], [1], [1], [0, 0, 0, 1, 1, 1], [0], [0]>} : vector<2x8x32xbf16>, vector<2x8x32xbf16>, vector<2x8x8xf32> -> vector<2x8x8xf32>
    "tpu.trace_stop"() : () -> ()
    %236 = vector.broadcast %158 : vector<2x1x8xf32> to vector<2x8x8xf32>
    %237 = arith.addf %235, %236 : vector<2x8x8xf32>
    %cst_84 = arith.constant dense<0xFF800000> : vector<2x8xf32>
    %238 = vector.multi_reduction <maximumf>, %237, %cst_84 [2] : vector<2x8x8xf32> to vector<2x8xf32>
    %239 = vector.shape_cast %238 : vector<2x8xf32> to vector<2x8x1xf32>
    %240 = vector.broadcast %239 : vector<2x8x1xf32> to vector<2x8x8xf32>
    %241 = arith.subf %237, %240 : vector<2x8x8xf32>
    %242 = math.exp %241 : vector<2x8x8xf32>
    %cst_85 = arith.constant dense<0.000000e+00> : vector<2x8xf32>
    %243 = vector.multi_reduction <add>, %242, %cst_85 [2] : vector<2x8x8xf32> to vector<2x8xf32>
    %244 = vector.shape_cast %243 : vector<2x8xf32> to vector<2x8x1xf32>
    %245 = tpu.reciprocal %244 {approx = true} : vector<2x8x1xf32> -> vector<2x8x1xf32>
    %246 = vector.broadcast %245 : vector<2x8x1xf32> to vector<2x8x8xf32>
    %247 = arith.mulf %242, %246 : vector<2x8x8xf32>
    %248 = arith.truncf %247 : vector<2x8x8xf32> to vector<2x8x8xbf16>
    "tpu.trace_start"() <{level = 10 : i32, message = "bqk,bkd->bqd"}> : () -> ()
    %cst_86 = arith.constant dense<0.000000e+00> : vector<2x8x32xf32>
    %249 = tpu.matmul %248, %234, %cst_86 {dimension_numbers = #tpu.dot_dimension_numbers<[2], [1], [1], [2], [0, 0, 0, 1, 1, 2], [0], [0]>} : vector<2x8x8xbf16>, vector<2x8x32xbf16>, vector<2x8x32xf32> -> vector<2x8x32xf32>
    "tpu.trace_stop"() : () -> ()
    %250 = vector.shape_cast %249 : vector<2x8x32xf32> to vector<16x32xf32>
    %251 = vector.extract_strided_slice %196 {offsets = [0, 64], sizes = [16, 32], strides = [1, 1]} : vector<16x128xf32> to vector<16x32xf32>
    %252 = vector.shape_cast %251 : vector<16x32xf32> to vector<2x8x32xf32>
    %253 = arith.truncf %252 : vector<2x8x32xf32> to vector<2x8x32xbf16>
    %254 = vector.extract_strided_slice %198 {offsets = [0, 64], sizes = [16, 32], strides = [1, 1]} : vector<16x128xf32> to vector<16x32xf32>
    %255 = vector.shape_cast %254 : vector<16x32xf32> to vector<2x8x32xf32>
    %256 = arith.truncf %255 : vector<2x8x32xf32> to vector<2x8x32xbf16>
    %257 = vector.extract_strided_slice %200 {offsets = [0, 64], sizes = [16, 32], strides = [1, 1]} : vector<16x128xf32> to vector<16x32xf32>
    %258 = vector.shape_cast %257 : vector<16x32xf32> to vector<2x8x32xf32>
    %259 = arith.truncf %258 : vector<2x8x32xf32> to vector<2x8x32xbf16>
    "tpu.trace_start"() <{level = 10 : i32, message = "bqd,bkd->bqk"}> : () -> ()
    %cst_87 = arith.constant dense<0.000000e+00> : vector<2x8x8xf32>
    %260 = tpu.matmul %253, %256, %cst_87 {dimension_numbers = #tpu.dot_dimension_numbers<[2], [2], [1], [1], [0, 0, 0, 1, 1, 1], [0], [0]>} : vector<2x8x32xbf16>, vector<2x8x32xbf16>, vector<2x8x8xf32> -> vector<2x8x8xf32>
    "tpu.trace_stop"() : () -> ()
    %261 = vector.broadcast %158 : vector<2x1x8xf32> to vector<2x8x8xf32>
    %262 = arith.addf %260, %261 : vector<2x8x8xf32>
    %cst_88 = arith.constant dense<0xFF800000> : vector<2x8xf32>
    %263 = vector.multi_reduction <maximumf>, %262, %cst_88 [2] : vector<2x8x8xf32> to vector<2x8xf32>
    %264 = vector.shape_cast %263 : vector<2x8xf32> to vector<2x8x1xf32>
    %265 = vector.broadcast %264 : vector<2x8x1xf32> to vector<2x8x8xf32>
    %266 = arith.subf %262, %265 : vector<2x8x8xf32>
    %267 = math.exp %266 : vector<2x8x8xf32>
    %cst_89 = arith.constant dense<0.000000e+00> : vector<2x8xf32>
    %268 = vector.multi_reduction <add>, %267, %cst_89 [2] : vector<2x8x8xf32> to vector<2x8xf32>
    %269 = vector.shape_cast %268 : vector<2x8xf32> to vector<2x8x1xf32>
    %270 = tpu.reciprocal %269 {approx = true} : vector<2x8x1xf32> -> vector<2x8x1xf32>
    %271 = vector.broadcast %270 : vector<2x8x1xf32> to vector<2x8x8xf32>
    %272 = arith.mulf %267, %271 : vector<2x8x8xf32>
    %273 = arith.truncf %272 : vector<2x8x8xf32> to vector<2x8x8xbf16>
    "tpu.trace_start"() <{level = 10 : i32, message = "bqk,bkd->bqd"}> : () -> ()
    %cst_90 = arith.constant dense<0.000000e+00> : vector<2x8x32xf32>
    %274 = tpu.matmul %273, %259, %cst_90 {dimension_numbers = #tpu.dot_dimension_numbers<[2], [1], [1], [2], [0, 0, 0, 1, 1, 2], [0], [0]>} : vector<2x8x8xbf16>, vector<2x8x32xbf16>, vector<2x8x32xf32> -> vector<2x8x32xf32>
    "tpu.trace_stop"() : () -> ()
    %275 = vector.shape_cast %274 : vector<2x8x32xf32> to vector<16x32xf32>
    %276 = vector.extract_strided_slice %196 {offsets = [0, 96], sizes = [16, 32], strides = [1, 1]} : vector<16x128xf32> to vector<16x32xf32>
    %277 = vector.shape_cast %276 : vector<16x32xf32> to vector<2x8x32xf32>
    %278 = arith.truncf %277 : vector<2x8x32xf32> to vector<2x8x32xbf16>
    %279 = vector.extract_strided_slice %198 {offsets = [0, 96], sizes = [16, 32], strides = [1, 1]} : vector<16x128xf32> to vector<16x32xf32>
    %280 = vector.shape_cast %279 : vector<16x32xf32> to vector<2x8x32xf32>
    %281 = arith.truncf %280 : vector<2x8x32xf32> to vector<2x8x32xbf16>
    %282 = vector.extract_strided_slice %200 {offsets = [0, 96], sizes = [16, 32], strides = [1, 1]} : vector<16x128xf32> to vector<16x32xf32>
    %283 = vector.shape_cast %282 : vector<16x32xf32> to vector<2x8x32xf32>
    %284 = arith.truncf %283 : vector<2x8x32xf32> to vector<2x8x32xbf16>
    "tpu.trace_start"() <{level = 10 : i32, message = "bqd,bkd->bqk"}> : () -> ()
    %cst_91 = arith.constant dense<0.000000e+00> : vector<2x8x8xf32>
    %285 = tpu.matmul %278, %281, %cst_91 {dimension_numbers = #tpu.dot_dimension_numbers<[2], [2], [1], [1], [0, 0, 0, 1, 1, 1], [0], [0]>} : vector<2x8x32xbf16>, vector<2x8x32xbf16>, vector<2x8x8xf32> -> vector<2x8x8xf32>
    "tpu.trace_stop"() : () -> ()
    %286 = vector.broadcast %158 : vector<2x1x8xf32> to vector<2x8x8xf32>
    %287 = arith.addf %285, %286 : vector<2x8x8xf32>
    %cst_92 = arith.constant dense<0xFF800000> : vector<2x8xf32>
    %288 = vector.multi_reduction <maximumf>, %287, %cst_92 [2] : vector<2x8x8xf32> to vector<2x8xf32>
    %289 = vector.shape_cast %288 : vector<2x8xf32> to vector<2x8x1xf32>
    %290 = vector.broadcast %289 : vector<2x8x1xf32> to vector<2x8x8xf32>
    %291 = arith.subf %287, %290 : vector<2x8x8xf32>
    %292 = math.exp %291 : vector<2x8x8xf32>
    %cst_93 = arith.constant dense<0.000000e+00> : vector<2x8xf32>
    %293 = vector.multi_reduction <add>, %292, %cst_93 [2] : vector<2x8x8xf32> to vector<2x8xf32>
    %294 = vector.shape_cast %293 : vector<2x8xf32> to vector<2x8x1xf32>
    %295 = tpu.reciprocal %294 {approx = true} : vector<2x8x1xf32> -> vector<2x8x1xf32>
    %296 = vector.broadcast %295 : vector<2x8x1xf32> to vector<2x8x8xf32>
    %297 = arith.mulf %292, %296 : vector<2x8x8xf32>
    %298 = arith.truncf %297 : vector<2x8x8xf32> to vector<2x8x8xbf16>
    "tpu.trace_start"() <{level = 10 : i32, message = "bqk,bkd->bqd"}> : () -> ()
    %cst_94 = arith.constant dense<0.000000e+00> : vector<2x8x32xf32>
    %299 = tpu.matmul %298, %284, %cst_94 {dimension_numbers = #tpu.dot_dimension_numbers<[2], [1], [1], [2], [0, 0, 0, 1, 1, 2], [0], [0]>} : vector<2x8x8xbf16>, vector<2x8x32xbf16>, vector<2x8x32xf32> -> vector<2x8x32xf32>
    "tpu.trace_stop"() : () -> ()
    %300 = vector.shape_cast %299 : vector<2x8x32xf32> to vector<16x32xf32>
    %301 = tpu.concatenate %225, %250, %275, %300 in 1 : vector<16x32xf32>, vector<16x32xf32>, vector<16x32xf32>, vector<16x32xf32> -> vector<16x128xf32>
    %302 = arith.truncf %301 : vector<16x128xf32> to vector<16x128xbf16>
    %cst_95 = arith.constant dense<0.000000e+00> : vector<16x128xf32>
    %303 = tpu.matmul %302, %193, %cst_95 {dimension_numbers = #tpu.dot_dimension_numbers<[1], [0], [0], [1], [0, 0, 1, 1], [], []>} : vector<16x128xbf16>, vector<128x128xbf16>, vector<16x128xf32> -> vector<16x128xf32>
    %304 = arith.addf %156, %303 : vector<16x128xf32>
    %c0_96 = arith.constant 0 : index
    %c0_97 = arith.constant 0 : index
    %c0_98 = arith.constant 0 : index
    %305 = vector.load %arg21[%c0_96, %c0_97, %c0_98] : memref<1x1x128xf32, #tpu.memory_space<vmem>>, vector<1x1x128xf32>
    %306 = vector.shape_cast %305 : vector<1x1x128xf32> to vector<1x128xf32>
    %c0_99 = arith.constant 0 : index
    %c0_100 = arith.constant 0 : index
    %c0_101 = arith.constant 0 : index
    %307 = vector.load %arg22[%c0_99, %c0_100, %c0_101] : memref<1x1x128xf32, #tpu.memory_space<vmem>>, vector<1x1x128xf32>
    %308 = vector.shape_cast %307 : vector<1x1x128xf32> to vector<1x128xf32>
    %cst_102 = arith.constant dense<0.000000e+00> : vector<16xf32>
    %309 = vector.multi_reduction <add>, %304, %cst_102 [1] : vector<16x128xf32> to vector<16xf32>
    %310 = vector.shape_cast %309 : vector<16xf32> to vector<16x1xf32>
    %cst_103 = arith.constant 1.280000e+02 : f32
    %311 = vector.broadcast %cst_103 : f32 to vector<16x1xf32>
    %312 = arith.divf %310, %311 : vector<16x1xf32>
    %313 = vector.broadcast %312 : vector<16x1xf32> to vector<16x128xf32>
    %314 = arith.subf %304, %313 : vector<16x128xf32>
    %315 = arith.mulf %314, %314 : vector<16x128xf32>
    %cst_104 = arith.constant dense<0.000000e+00> : vector<16xf32>
    %316 = vector.multi_reduction <add>, %315, %cst_104 [1] : vector<16x128xf32> to vector<16xf32>
    %317 = vector.shape_cast %316 : vector<16xf32> to vector<16x1xf32>
    %cst_105 = arith.constant 1.280000e+02 : f32
    %318 = vector.broadcast %cst_105 : f32 to vector<16x1xf32>
    %319 = arith.divf %317, %318 : vector<16x1xf32>
    %320 = vector.broadcast %312 : vector<16x1xf32> to vector<16x128xf32>
    %321 = arith.subf %304, %320 : vector<16x128xf32>
    %cst_106 = arith.constant 9.99999974E-6 : f32
    %322 = vector.broadcast %cst_106 : f32 to vector<16x1xf32>
    %323 = arith.addf %319, %322 : vector<16x1xf32>
    %324 = math.rsqrt %323 : vector<16x1xf32>
    %325 = vector.broadcast %324 : vector<16x1xf32> to vector<16x128xf32>
    %326 = arith.mulf %321, %325 : vector<16x128xf32>
    %327 = vector.broadcast %306 : vector<1x128xf32> to vector<16x128xf32>
    %328 = arith.mulf %326, %327 : vector<16x128xf32>
    %329 = vector.broadcast %308 : vector<1x128xf32> to vector<16x128xf32>
    %330 = arith.addf %328, %329 : vector<16x128xf32>
    %331 = arith.truncf %330 : vector<16x128xf32> to vector<16x128xbf16>
    %c0_107 = arith.constant 0 : index
    %c0_108 = arith.constant 0 : index
    %c0_109 = arith.constant 0 : index
    %332 = vector.load %arg17[%c0_107, %c0_108, %c0_109] : memref<1x128x256xbf16, #tpu.memory_space<vmem>>, vector<1x128x256xbf16>
    %333 = vector.shape_cast %332 : vector<1x128x256xbf16> to vector<128x256xbf16>
    %cst_110 = arith.constant dense<0.000000e+00> : vector<16x256xf32>
    %334 = tpu.matmul %331, %333, %cst_110 {dimension_numbers = #tpu.dot_dimension_numbers<[1], [0], [0], [1], [0, 0, 1, 1], [], []>} : vector<16x128xbf16>, vector<128x256xbf16>, vector<16x256xf32> -> vector<16x256xf32>
    %c0_111 = arith.constant 0 : index
    %c0_112 = arith.constant 0 : index
    %c0_113 = arith.constant 0 : index
    %335 = vector.load %arg18[%c0_111, %c0_112, %c0_113] : memref<1x1x256xf32, #tpu.memory_space<vmem>>, vector<1x1x256xf32>
    %336 = vector.shape_cast %335 : vector<1x1x256xf32> to vector<1x256xf32>
    %337 = vector.broadcast %336 : vector<1x256xf32> to vector<16x256xf32>
    %338 = arith.addf %334, %337 : vector<16x256xf32>
    %cst_114 = arith.constant 0.000000e+00 : f32
    %339 = vector.broadcast %cst_114 : f32 to vector<16x256xf32>
    %340 = arith.maximumf %338, %339 : vector<16x256xf32>
    %341 = arith.truncf %340 : vector<16x256xf32> to vector<16x256xbf16>
    %c0_115 = arith.constant 0 : index
    %c0_116 = arith.constant 0 : index
    %c0_117 = arith.constant 0 : index
    %342 = vector.load %arg19[%c0_115, %c0_116, %c0_117] : memref<1x256x128xbf16, #tpu.memory_space<vmem>>, vector<1x256x128xbf16>
    %343 = vector.shape_cast %342 : vector<1x256x128xbf16> to vector<256x128xbf16>
    %cst_118 = arith.constant dense<0.000000e+00> : vector<16x128xf32>
    %344 = tpu.matmul %341, %343, %cst_118 {dimension_numbers = #tpu.dot_dimension_numbers<[1], [0], [0], [1], [0, 0, 1, 1], [], []>} : vector<16x256xbf16>, vector<256x128xbf16>, vector<16x128xf32> -> vector<16x128xf32>
    %c0_119 = arith.constant 0 : index
    %c0_120 = arith.constant 0 : index
    %c0_121 = arith.constant 0 : index
    %345 = vector.load %arg20[%c0_119, %c0_120, %c0_121] : memref<1x1x128xf32, #tpu.memory_space<vmem>>, vector<1x1x128xf32>
    %346 = vector.shape_cast %345 : vector<1x1x128xf32> to vector<1x128xf32>
    %347 = vector.broadcast %346 : vector<1x128xf32> to vector<16x128xf32>
    %348 = arith.addf %344, %347 : vector<16x128xf32>
    %349 = arith.addf %304, %348 : vector<16x128xf32>
    %c0_122 = arith.constant 0 : index
    %c0_123 = arith.constant 0 : index
    %350 = vector.load %arg26[%c0_122, %c0_123] : memref<16x128xf32, #tpu.memory_space<vmem>>, vector<16x128xf32>
    tpu.vector_store %arg26[%c0_122, %c0_123], %349 {strides = array<i32>} : memref<16x128xf32, #tpu.memory_space<vmem>>, vector<16x128xf32>,
    %c1_i32 = arith.constant 1 : i32
    %351 = arith.cmpi eq, %arg1, %c1_i32 : i32
    %352 = arith.extui %351 : i1 to i32
    %c0_i32_124 = arith.constant 0 : i32
    %353 = arith.cmpi ne, %352, %c0_i32_124 : i32
    scf.if %353 {
      %c0_125 = arith.constant 0 : index
      %c0_126 = arith.constant 0 : index
      %354 = vector.load %arg26[%c0_125, %c0_126] : memref<16x128xf32, #tpu.memory_space<vmem>>, vector<16x128xf32>
      %c0_127 = arith.constant 0 : index
      %c0_128 = arith.constant 0 : index
      %355 = vector.load %arg23[%c0_127, %c0_128] : memref<1x128xf32, #tpu.memory_space<vmem>>, vector<1x128xf32>
      %c0_129 = arith.constant 0 : index
      %c0_130 = arith.constant 0 : index
      %356 = vector.load %arg24[%c0_129, %c0_130] : memref<1x128xf32, #tpu.memory_space<vmem>>, vector<1x128xf32>
      %cst_131 = arith.constant dense<0.000000e+00> : vector<16xf32>
      %357 = vector.multi_reduction <add>, %354, %cst_131 [1] : vector<16x128xf32> to vector<16xf32>
      %358 = vector.shape_cast %357 : vector<16xf32> to vector<16x1xf32>
      %cst_132 = arith.constant 1.280000e+02 : f32
      %359 = vector.broadcast %cst_132 : f32 to vector<16x1xf32>
      %360 = arith.divf %358, %359 : vector<16x1xf32>
      %361 = vector.broadcast %360 : vector<16x1xf32> to vector<16x128xf32>
      %362 = arith.subf %354, %361 : vector<16x128xf32>
      %363 = arith.mulf %362, %362 : vector<16x128xf32>
      %cst_133 = arith.constant dense<0.000000e+00> : vector<16xf32>
      %364 = vector.multi_reduction <add>, %363, %cst_133 [1] : vector<16x128xf32> to vector<16xf32>
      %365 = vector.shape_cast %364 : vector<16xf32> to vector<16x1xf32>
      %cst_134 = arith.constant 1.280000e+02 : f32
      %366 = vector.broadcast %cst_134 : f32 to vector<16x1xf32>
      %367 = arith.divf %365, %366 : vector<16x1xf32>
      %368 = vector.broadcast %360 : vector<16x1xf32> to vector<16x128xf32>
      %369 = arith.subf %354, %368 : vector<16x128xf32>
      %cst_135 = arith.constant 9.99999974E-6 : f32
      %370 = vector.broadcast %cst_135 : f32 to vector<16x1xf32>
      %371 = arith.addf %367, %370 : vector<16x1xf32>
      %372 = math.rsqrt %371 : vector<16x1xf32>
      %373 = vector.broadcast %372 : vector<16x1xf32> to vector<16x128xf32>
      %374 = arith.mulf %369, %373 : vector<16x128xf32>
      %375 = vector.broadcast %355 : vector<1x128xf32> to vector<16x128xf32>
      %376 = arith.mulf %374, %375 : vector<16x128xf32>
      %377 = vector.broadcast %356 : vector<1x128xf32> to vector<16x128xf32>
      %378 = arith.addf %376, %377 : vector<16x128xf32>
      %379 = vector.shape_cast %378 : vector<16x128xf32> to vector<2x8x128xf32>
      %c0_136 = arith.constant 0 : index
      %c0_137 = arith.constant 0 : index
      %c0_138 = arith.constant 0 : index
      %380 = vector.load %arg25[%c0_136, %c0_137, %c0_138] : memref<2x8x128xf32, #tpu.memory_space<vmem>>, vector<2x8x128xf32>
      tpu.vector_store %arg25[%c0_136, %c0_137, %c0_138], %379 {strides = array<i32>} : memref<2x8x128xf32, #tpu.memory_space<vmem>>, vector<2x8x128xf32>,
    } else {
    }
    return
  }
  func.func @transform_0(%arg0: i32, %arg1: i32) -> (i32, i32, i32) {
    %c0_i32 = arith.constant 0 : i32
    %c0_i32_0 = arith.constant 0 : i32
    %c0_i32_1 = arith.constant 0 : i32
    return %arg0, %c0_i32, %c0_i32_0 : i32, i32, i32
  }
  func.func @transform_1(%arg0: i32, %arg1: i32) -> (i32, i32, i32) {
    %c0_i32 = arith.constant 0 : i32
    %c0_i32_0 = arith.constant 0 : i32
    %c0_i32_1 = arith.constant 0 : i32
    return %arg0, %c0_i32, %c0_i32_0 : i32, i32, i32
  }
  func.func @transform_2(%arg0: i32, %arg1: i32) -> (i32, i32, i32, i32) {
    %c0_i32 = arith.constant 0 : i32
    %c0_i32_0 = arith.constant 0 : i32
    %c0_i32_1 = arith.constant 0 : i32
    %c0_i32_2 = arith.constant 0 : i32
    return %arg0, %c0_i32, %c0_i32_0, %c0_i32_1 : i32, i32, i32, i32
  }
  func.func @transform_3(%arg0: i32, %arg1: i32) -> (i32, i32, i32) {
    %c0_i32 = arith.constant 0 : i32
    %c0_i32_0 = arith.constant 0 : i32
    %c0_i32_1 = arith.constant 0 : i32
    return %arg1, %c0_i32, %c0_i32_0 : i32, i32, i32
  }
  func.func @transform_4(%arg0: i32, %arg1: i32) -> (i32, i32, i32) {
    %c0_i32 = arith.constant 0 : i32
    %c0_i32_0 = arith.constant 0 : i32
    %c0_i32_1 = arith.constant 0 : i32
    return %arg1, %c0_i32, %c0_i32_0 : i32, i32, i32
  }
  func.func @transform_5(%arg0: i32, %arg1: i32) -> (i32, i32, i32) {
    %c0_i32 = arith.constant 0 : i32
    %c0_i32_0 = arith.constant 0 : i32
    %c0_i32_1 = arith.constant 0 : i32
    return %arg1, %c0_i32, %c0_i32_0 : i32, i32, i32
  }
  func.func @transform_6(%arg0: i32, %arg1: i32) -> (i32, i32, i32) {
    %c0_i32 = arith.constant 0 : i32
    %c0_i32_0 = arith.constant 0 : i32
    %c0_i32_1 = arith.constant 0 : i32
    return %arg1, %c0_i32, %c0_i32_0 : i32, i32, i32
  }
  func.func @transform_7(%arg0: i32, %arg1: i32) -> (i32, i32, i32) {
    %c0_i32 = arith.constant 0 : i32
    %c0_i32_0 = arith.constant 0 : i32
    %c0_i32_1 = arith.constant 0 : i32
    return %arg1, %c0_i32, %c0_i32_0 : i32, i32, i32
  }
  func.func @transform_8(%arg0: i32, %arg1: i32) -> (i32, i32, i32) {
    %c0_i32 = arith.constant 0 : i32
    %c0_i32_0 = arith.constant 0 : i32
    %c0_i32_1 = arith.constant 0 : i32
    return %arg1, %c0_i32, %c0_i32_0 : i32, i32, i32
  }
  func.func @transform_9(%arg0: i32, %arg1: i32) -> (i32, i32, i32) {
    %c0_i32 = arith.constant 0 : i32
    %c0_i32_0 = arith.constant 0 : i32
    %c0_i32_1 = arith.constant 0 : i32
    return %arg1, %c0_i32, %c0_i32_0 : i32, i32, i32
  }
  func.func @transform_10(%arg0: i32, %arg1: i32) -> (i32, i32, i32) {
    %c0_i32 = arith.constant 0 : i32
    %c0_i32_0 = arith.constant 0 : i32
    %c0_i32_1 = arith.constant 0 : i32
    return %arg1, %c0_i32, %c0_i32_0 : i32, i32, i32
  }
  func.func @transform_11(%arg0: i32, %arg1: i32) -> (i32, i32, i32) {
    %c0_i32 = arith.constant 0 : i32
    %c0_i32_0 = arith.constant 0 : i32
    %c0_i32_1 = arith.constant 0 : i32
    return %arg1, %c0_i32, %c0_i32_0 : i32, i32, i32
  }
  func.func @transform_12(%arg0: i32, %arg1: i32) -> (i32, i32, i32) {
    %c0_i32 = arith.constant 0 : i32
    %c0_i32_0 = arith.constant 0 : i32
    %c0_i32_1 = arith.constant 0 : i32
    return %arg1, %c0_i32, %c0_i32_0 : i32, i32, i32
  }
  func.func @transform_13(%arg0: i32, %arg1: i32) -> (i32, i32, i32) {
    %c0_i32 = arith.constant 0 : i32
    %c0_i32_0 = arith.constant 0 : i32
    %c0_i32_1 = arith.constant 0 : i32
    return %arg1, %c0_i32, %c0_i32_0 : i32, i32, i32
  }
  func.func @transform_14(%arg0: i32, %arg1: i32) -> (i32, i32, i32) {
    %c0_i32 = arith.constant 0 : i32
    %c0_i32_0 = arith.constant 0 : i32
    %c0_i32_1 = arith.constant 0 : i32
    return %arg1, %c0_i32, %c0_i32_0 : i32, i32, i32
  }
  func.func @transform_15(%arg0: i32, %arg1: i32) -> (i32, i32, i32) {
    %c0_i32 = arith.constant 0 : i32
    %c0_i32_0 = arith.constant 0 : i32
    %c0_i32_1 = arith.constant 0 : i32
    return %arg1, %c0_i32, %c0_i32_0 : i32, i32, i32
  }
  func.func @transform_16(%arg0: i32, %arg1: i32) -> (i32, i32, i32) {
    %c0_i32 = arith.constant 0 : i32
    %c0_i32_0 = arith.constant 0 : i32
    %c0_i32_1 = arith.constant 0 : i32
    return %arg1, %c0_i32, %c0_i32_0 : i32, i32, i32
  }
  func.func @transform_17(%arg0: i32, %arg1: i32) -> (i32, i32, i32) {
    %c0_i32 = arith.constant 0 : i32
    %c0_i32_0 = arith.constant 0 : i32
    %c0_i32_1 = arith.constant 0 : i32
    return %arg1, %c0_i32, %c0_i32_0 : i32, i32, i32
  }
  func.func @transform_18(%arg0: i32, %arg1: i32) -> (i32, i32, i32) {
    %c0_i32 = arith.constant 0 : i32
    %c0_i32_0 = arith.constant 0 : i32
    %c0_i32_1 = arith.constant 0 : i32
    return %arg1, %c0_i32, %c0_i32_0 : i32, i32, i32
  }
  func.func @transform_19(%arg0: i32, %arg1: i32) -> (i32, i32, i32) {
    %c0_i32 = arith.constant 0 : i32
    %c0_i32_0 = arith.constant 0 : i32
    %c0_i32_1 = arith.constant 0 : i32
    return %arg1, %c0_i32, %c0_i32_0 : i32, i32, i32
  }
  func.func @transform_20(%arg0: i32, %arg1: i32) -> (i32, i32, i32) {
    %c0_i32 = arith.constant 0 : i32
    %c0_i32_0 = arith.constant 0 : i32
    %c0_i32_1 = arith.constant 0 : i32
    return %arg1, %c0_i32, %c0_i32_0 : i32, i32, i32
  }
  func.func @transform_21(%arg0: i32, %arg1: i32) -> (i32, i32) {
    %c0_i32 = arith.constant 0 : i32
    %c0_i32_0 = arith.constant 0 : i32
    %c0_i32_1 = arith.constant 0 : i32
    return %c0_i32, %c0_i32_0 : i32, i32
  }
  func.func @transform_22(%arg0: i32, %arg1: i32) -> (i32, i32) {
    %c0_i32 = arith.constant 0 : i32
    %c0_i32_0 = arith.constant 0 : i32
    %c0_i32_1 = arith.constant 0 : i32
    return %c0_i32, %c0_i32_0 : i32, i32
  }
  func.func @transform_23(%arg0: i32, %arg1: i32) -> (i32, i32, i32) {
    %c0_i32 = arith.constant 0 : i32
    %c0_i32_0 = arith.constant 0 : i32
    %c0_i32_1 = arith.constant 0 : i32
    return %arg0, %c0_i32, %c0_i32_0 : i32, i32, i32
  }
}

</mosaic_0001>

<bundles_post_ra>
// kernel: tpu_custom_call.1
= control target key start
LH: loop header
LB: loop body
LE: loop exit
PB: predicated region body
PF: predicated region fallthrough
CT: control target
= control target key end

     0   :  { %s8665_s0 = inlined_call_operand.hbm [shape: f32[2,8,128], index: 0, kind: input, shape index: {}]   ;;  %s8666_s1 = inlined_call_operand.hbm [shape: f32[2,8,128], index: 1, kind: input, shape index: {}]   ;;  %s8667_s2 = inlined_call_operand.hbm [shape: f32[2,1,1,8], index: 2, kind: input, shape index: {}]   ;;  %s8668_s3 = inlined_call_operand.hbm [shape: bf16[2,128,128], index: 3, kind: input, shape index: {}]   ;;  %s8669_s4 = inlined_call_operand.hbm [shape: bf16[2,128,128], index: 4, kind: input, shape index: {}]   ;;  %s8670_s5 = inlined_call_operand.hbm [shape: bf16[2,128,128], index: 5, kind: input, shape index: {}]   ;;  %s8671_s6 = inlined_call_operand.hbm [shape: bf16[2,128,128], index: 6, kind: input, shape index: {}]   ;;  %s8672_s7 = inlined_call_operand.hbm [shape: f32[2,1,128], index: 7, kind: input, shape index: {}]   ;;  %s8673_s8 = inlined_call_operand.hbm [shape: f32[2,1,128], index: 8, kind: input, shape index: {}]   ;;  %s8674_s9 = inlined_call_operand.hbm [shape: bf16[2,128,128], index: 9, kind: input, shape index: {}]   ;;  %s8675_s10 = inlined_call_operand.hbm [shape: bf16[2,128,128], index: 10, kind: input, shape index: {}]   ;;  %s8676_s11 = inlined_call_operand.hbm [shape: bf16[2,128,128], index: 11, kind: input, shape index: {}]   ;;  %s8677_s12 = inlined_call_operand.hbm [shape: bf16[2,128,128], index: 12, kind: input, shape index: {}]   ;;  %s8678_s13 = inlined_call_operand.hbm [shape: f32[2,1,128], index: 13, kind: input, shape index: {}]   ;;  %s8679_s14 = inlined_call_operand.hbm [shape: f32[2,1,128], index: 14, kind: input, shape index: {}]   ;;  %s8680_s15 = inlined_call_operand.hbm [shape: bf16[2,128,256], index: 15, kind: input, shape index: {}]   ;;  %s8681_s16 = inlined_call_operand.hbm [shape: f32[2,1,256], index: 16, kind: input, shape index: {}]   ;;  %s8682_s17 = inlined_call_operand.hbm [shape: bf16[2,256,128], index: 17, kind: input, shape index: {}]   ;;  %s8683_s18 = inlined_call_operand.hbm [shape: f32[2,1,128], index: 18, kind: input, shape index: {}]   ;;  %s8684_s19 = inlined_call_operand.hbm [shape: f32[2,1,128], index: 19, kind: input, shape index: {}]   ;;  %s8685_s20 = inlined_call_operand.hbm [shape: f32[2,1,128], index: 20, kind: input, shape index: {}]   ;;  %s8686_s21 = inlined_call_operand.hbm [shape: f32[1,128], index: 21, kind: input, shape index: {}]   ;;  %s8687_s22 = inlined_call_operand.hbm [shape: f32[1,128], index: 22, kind: input, shape index: {}]   ;;  %s8688_s23 = inlined_call_operand.hbm [shape: f32[2,8,128], index: 23, kind: output, shape index: {}]  }
   0x1   :  { %8737 = sst [smem:[#allocation60_spill]] %s8665_s0 }
   0x2   :  { %8738 = sst [smem:[#allocation61_spill]] %s8666_s1 }
   0x3   :  { %8739 = sst [smem:[#allocation62_spill]] %s8667_s2 }
   0x4   :  { %8740 = sst [smem:[#allocation63_spill]] %s8668_s3 }
   0x5   :  { %8741 = sst [smem:[#allocation64_spill]] %s8669_s4 }
   0x6   :  { %8742 = sst [smem:[#allocation65_spill]] %s8670_s5 }
   0x7   :  { %8743 = sst [smem:[#allocation66_spill]] %s8671_s6 }
   0x8   :  { %8744 = sst [smem:[#allocation67_spill]] %s8672_s7 }
   0x9   :  { %8745 = sst [smem:[#allocation68_spill]] %s8673_s8 }
   0xa   :  { %8746 = sst [smem:[#allocation69_spill]] %s8674_s9 }
   0xb   :  { %8747 = sst [smem:[#allocation70_spill]] %s8675_s10 }
   0xc   :  { %8748 = sst [smem:[#allocation71_spill]] %s8676_s11 }
   0xd   :  { %8749 = sst [smem:[#allocation72_spill]] %s8677_s12 }
   0xe   :  { %8750 = sst [smem:[#allocation73_spill]] %s8678_s13 }
   0xf   :  { %8751 = sst [smem:[#allocation74_spill]] %s8679_s14 }
  0x10   :  { %8752 = sst [smem:[#allocation75_spill]] %s8680_s15 }
  0x11   :  { %8753 = sst [smem:[#allocation76_spill]] %s8681_s16 }
  0x12   :  { %8754 = sst [smem:[#allocation77_spill]] %s8682_s17 }
  0x13   :  { %8755 = sst [smem:[#allocation78_spill]] %s8683_s18 }
  0x14   :  { %8756 = sst [smem:[#allocation79_spill]] %s8685_s20 }
  0x15   :  { %8757 = sst [smem:[#allocation80_spill]] %s8686_s21 }
  0x16   :  { %8758 = sst [smem:[#allocation81_spill]] %s8688_s23 }
  0x17   :  { %28 = vsyncpa [#allocation4], 0 }
  0x18   :  { %29 = vsyncpa [#allocation7], 0 }
  0x19   :  { %30 = vsyncpa [#allocation10], 0 }
  0x1a   :  { %32 = vsyncpa [#allocation10 + $0x1], 0 }
  0x1b   :  { %33 = vsyncpa [#allocation13], 0 }
  0x1c   :  { %35 = vsyncpa [#allocation13 + $0x1], 0 }
  0x1d   :  { %36 = vsyncpa [#allocation16], 0 }
  0x1e   :  { %38 = vsyncpa [#allocation16 + $0x1], 0 }
  0x1f   :  { %39 = vsyncpa [#allocation19], 0 }
  0x20   :  { %41 = vsyncpa [#allocation19 + $0x1], 0 }
  0x21   :  { %42 = vsyncpa [#allocation22], 0 }
  0x22   :  { %44 = vsyncpa [#allocation22 + $0x1], 0 }
  0x23   :  { %45 = vsyncpa [#allocation25], 0 }
  0x24   :  { %47 = vsyncpa [#allocation25 + $0x1], 0 }
  0x25   :  { %48 = vsyncpa [#allocation28], 0 }
  0x26   :  { %50 = vsyncpa [#allocation28 + $0x1], 0 }
  0x27   :  { %51 = vsyncpa [#allocation31], 0 }
  0x28   :  { %53 = vsyncpa [#allocation31 + $0x1], 0 }
  0x29   :  { %54 = vsyncpa [#allocation34], 0 }
  0x2a   :  { %56 = vsyncpa [#allocation34 + $0x1], 0 }
  0x2b   :  { %57 = vsyncpa [#allocation37], 0 }
  0x2c   :  { %58 = vsyncpa [#allocation5], 0  ;;  %s7163_s4 = smov 0   ;;  %s7165_s30 = smov 0  }
  0x2d   :  { %s7167_s24 = smov 0   ;;  %s7169_s25 = smov 0  }
  0x2e   :  { %s7171_s5 = smov 0   ;;  %s7173_s1 = smov 0  }
  0x2f LB: > { %8759 = sst [smem:[#allocation53_spill]] %s6984_s30  ;;  %s7192_s26 = sadd.s32 4294967295, %s7000_s1   ;;  %s7000_s1 = sphi %s7173_s1, %s64_s1   ;;  %s6996_s5 = sphi %s7171_s5, %s8836_s5   ;;  %s6992_s25 = sphi %s7169_s25, %s8835_s25   ;;  %s6988_s24 = sphi %s7167_s24, %s8834_s24   ;;  %s6984_s30 = sphi %s7165_s30, %s8833_s30   ;;  %s6980_s4 = sphi %s7163_s4, %s8830_s4  }
  0x30   : > { %8760 = sst [smem:[#allocation54_spill]] %s6992_s25  ;;  %s73_s2 = sadd.s32 1, %s6996_s5 }
  0x31   : > { %8761 = sst [smem:[#allocation55_spill]] %s7192_s26  ;;  %p74_p0 = scmp.ge.s32.totalorder %s73_s2, 2 }
  0x32   : > { %s161_s6 = sadd.s32 1, %s6988_s24  ;;  %p168_p1 = scmp.ne.s32.totalorder %s6988_s24, %s6984_s30 }
  0x33   : > { %p169_p2 = scmp.eq.s32.totalorder %s7000_s1, 0  ;;  %s8838_s2 = smov (%p74_p0, %s73_s2), 0 }
  0x34   : > { %8762 = sst [smem:[#allocation56_spill]] %s8838_s2  ;;  %p174_p4 = scmp.ne.s32.totalorder %s6984_s30, %s6980_s4 }
  0x35   : > { %p7201_p3 = por %p169_p2, %p168_p1  ;;  %s158_s7 = ssub.s32 %s6996_s5, %s8838_s2 }
  0x36   : > { %p8707_p5 = scmp.eq.s32.totalorder %s7192_s26, 0  ;;  %p159_p6 = scmp.eq.s32.totalorder %s158_s7, 0 }
  0x37   : > { %s8763_s27 = scalar_select %p7201_p3, 1, 0 }
  0x38   : > { %p5127_p7 = scmp.ge.s32.totalorder %s7000_s1, 1  ;;  %p7212_p8 = por %p8707_p5, %p174_p4 }
  0x39   : > { %p695_p9 = scmp.lt.s32.totalorder %s7000_s1, 3  ;;  %s7002_s0 = smov [#allocation6]  }
  0x3a   : > { %s8764_s28 = scalar_select %p7212_p8, 1, 0 }
  0x3b   : > { %s7218_s29 = scalar_select %p159_p6, %s6988_s24, %s161_s6  }
  0x3c   : > { %8765 = sst [smem:[#allocation57_spill]] %s8764_s28  ;;  %p7220_p10 = pnand %p5127_p7, %p695_p9 }
  0x3d   : > { %8766 = sst [smem:[#allocation58_spill]] %s7218_s29  ;;  %s726_s4 = sshll.u32 %s7002_s0, 4  ;;  %s727_s4 = int_to_ptr.vmem [resolvable:$true] %s726_s4 }
  0x3e   : > { %s8767_s3 = scalar_select %p7220_p10, 1, 0 }
  0x3f   : > { %p5917_p11 = pneg %p7220_p10  ;;  %s7003_s2 = smov [#allocation36]  }
  0x40   : > { %8768 = sst [smem:[#allocation59_spill]] %s8767_s3  ;;  %s756_s23 = sshll.u32 %s7003_s2, 4  ;;  %s7232_s23 = int_to_ptr.vmem [resolvable:$true] %s756_s23 }
  0x41   : > { %p7228_p12 = pnand %p5917_p11, %p8707_p5  ;;  %s8770_s25 = sld [smem:[#allocation61_spill]] }
  0x43   : > { %p7242_p0 = pneg %p7228_p12 }
  0x47   : > { %s8771_s28 = smov %s8770_s25  ;;  %s6232_s30 = scalar_lea.hbm %s8770_s25, 256 }
  0x48   : > { %p6233_p13 = scmp.ne.s32.totalorder %s8771_s28, %s6232_s30  ;;  %p6239_p4 = scmp.lt.u32.totalorder %s6232_s30, %s8771_s28 }
  0x4a   : > { %p6235_p1 = pnand %p7242_p0, %p6233_p13 }
  0x4c   : > { %p6236_p2 = pneg %p6235_p1 }
  0x4e   : > { %p6241_p6 = pnand %p6239_p4, %p6236_p2 }
  0x50   : > { %6244 = shalt.err (!%p6241_p6)
}
  0x51   : > { %s6245_s25 = scalar_lea.vmem %s727_s4, 256  ;;  %p6253_p5 = scmp.lt.s32.totalorder %s727_s4, %s727_s4 }
  0x52   : > { %p6246_p7 = scmp.ne.s32.totalorder %s727_s4, %s6245_s25  ;;  %p6254_p8 = scmp.lt.s32.totalorder %s6245_s25, %s6245_s25 }
  0x54   : > { %p6248_p9 = pnand %p6246_p7, %p7242_p0  ;;  %p6255_p10 = por %p6254_p8, %p6253_p5 }
  0x56   : > { %p6249_p11 = pneg %p6248_p9 }
  0x58   : > { %p6256_p3 = pnand %p6255_p10, %p6249_p11 }
  0x5a   : > { %6259 = shalt.err (!%p6256_p3)
}
  0x5b   : > { %s8714_s20 = smov 128   ;;  %s8715_s29 = smov 8  }
  0x5c   : > { %5923 = dma.hbm_to_vmem [thread:$0]  (!%p7228_p12), %s8771_s28, 256, %s727_s4, [#allocation7], %s8714_s20, %s8714_s20, %s8715_s29  }
  0x5d   : > { %s8773_s21 = sld [smem:[#allocation80_spill]] }
  0x63   : > { %s6260_s2 = scalar_lea.hbm %s8773_s21, 16 }
  0x64   : > { %p6261_p3 = scmp.ne.s32.totalorder %s8773_s21, %s6260_s2  ;;  %p6267_p10 = scmp.lt.u32.totalorder %s6260_s2, %s8773_s21 }
  0x66   : > { %p6263_p5 = pnand %p6261_p3, %p7242_p0 }
  0x68   : > { %p6264_p8 = pneg %p6263_p5 }
  0x6a   : > { %p6269_p13 = pnand %p6267_p10, %p6264_p8 }
  0x6c   : > { %6272 = shalt.err (!%p6269_p13)
}
  0x6d   : > { %s6273_s4 = scalar_lea.vmem %s7232_s23, 16  ;;  %s6280_s18 = scalar_lea.vmem %s7232_s23, 32 }
  0x6e   : > { %p6274_p1 = scmp.ne.s32.totalorder %s7232_s23, %s6273_s4  ;;  %p6281_p6 = scmp.lt.s32.totalorder %s7232_s23, %s7232_s23 }
  0x6f   : > { %p6282_p7 = scmp.lt.s32.totalorder %s6280_s18, %s6273_s4 }
  0x70   : > { %p6276_p2 = pnand %p6274_p1, %p7242_p0 }
  0x71   : > { %p6283_p9 = por %p6282_p7, %p6281_p6 }
  0x72   : > { %p6277_p4 = pneg %p6276_p2 }
  0x74   : > { %p6284_p11 = pnand %p6283_p9, %p6277_p4 }
  0x76   : > { %6287 = shalt.err (!%p6284_p11)
}
  0x77   : > { %5929 = dma.hbm_to_vmem [thread:$0]  (!%p7228_p12), %s8773_s21, 16, %s7232_s23, [#allocation37]  }
  0x78   : > { %s7006_s30 = smov [#allocation3]   ;;  %s7007_s3 = smov [#allocation8]  }
  0x79   : > { %s710_s26 = sshll.u32 %s7006_s30, 4  ;;  %s742_s6 = sshll.u32 %s7007_s3, 4  ;;  %s711_s26 = int_to_ptr.vmem [resolvable:$true] %s710_s26  ;;  %s743_s6 = int_to_ptr.vmem [resolvable:$true] %s742_s6 }
  0x7a   : > { %s8774_s20 = sld [smem:[#allocation60_spill]] }
  0x80   : > { %s6288_s4 = scalar_lea.hbm %s8774_s20, 256 }
  0x81   : > { %p6289_p3 = scmp.ne.s32.totalorder %s8774_s20, %s6288_s4  ;;  %p6295_p10 = scmp.lt.u32.totalorder %s6288_s4, %s8774_s20 }
  0x83   : > { %p6291_p5 = pnand %p6289_p3, %p7242_p0 }
  0x85   : > { %p6292_p8 = pneg %p6291_p5 }
  0x87   : > { %p6297_p13 = pnand %p6295_p10, %p6292_p8 }
  0x89   : > { %6300 = shalt.err (!%p6297_p13)
}
  0x8a   : > { %s6301_s23 = scalar_lea.vmem %s711_s26, 256  ;;  %p6309_p6 = scmp.lt.s32.totalorder %s711_s26, %s711_s26 }
  0x8b   : > { %p6302_p1 = scmp.ne.s32.totalorder %s711_s26, %s6301_s23  ;;  %p6310_p7 = scmp.lt.s32.totalorder %s6301_s23, %s6301_s23 }
  0x8d   : > { %p6304_p2 = pnand %p6302_p1, %p7242_p0  ;;  %p6311_p9 = por %p6310_p7, %p6309_p6 }
  0x8f   : > { %p6305_p4 = pneg %p6304_p2 }
  0x91   : > { %p6312_p11 = pnand %p6311_p9, %p6305_p4 }
  0x93   : > { %6315 = shalt.err (!%p6312_p11)
}
  0x94   : > { %s8775_s29 = smov 8   ;;  %s8776_s16 = smov 128  }
  0x95   : > { %5920 = dma.hbm_to_vmem [thread:$0]  (!%p7228_p12), %s8774_s20, 256, %s711_s26, [#allocation4], %s8776_s16, %s8776_s16, %s8775_s29  }
  0x96   : > { %s8777_s25 = sld [smem:[#allocation62_spill]] }
  0x9c   : > { %s8778_s18 = smov %s8777_s25  ;;  %s6316_s4 = scalar_lea.hbm %s8777_s25, 32 }
  0x9d   : > { %p6317_p3 = scmp.ne.s32.totalorder %s8778_s18, %s6316_s4  ;;  %p6323_p10 = scmp.lt.u32.totalorder %s6316_s4, %s8778_s18 }
  0x9f   : > { %p6319_p5 = pnand %p6317_p3, %p7242_p0 }
  0xa1   : > { %p6320_p8 = pneg %p6319_p5 }
  0xa3   : > { %p6325_p13 = pnand %p6323_p10, %p6320_p8 }
  0xa5   : > { %6328 = shalt.err (!%p6325_p13)
}
  0xa6   : > { %s6329_s28 = scalar_lea.vmem %s743_s6, 32  ;;  %p6337_p6 = scmp.lt.s32.totalorder %s743_s6, %s743_s6 }
  0xa7   : > { %p6330_p1 = scmp.ne.s32.totalorder %s743_s6, %s6329_s28  ;;  %p6338_p7 = scmp.lt.s32.totalorder %s6329_s28, %s6329_s28 }
  0xa9   : > { %p6332_p2 = pnand %p6330_p1, %p7242_p0  ;;  %p6339_p9 = por %p6338_p7, %p6337_p6 }
  0xab   : > { %p6333_p4 = pneg %p6332_p2 }
  0xad   : > { %p6340_p11 = pnand %p6339_p9, %p6333_p4 }
  0xaf   : > { %6343 = shalt.err (!%p6340_p11)
}
  0xb0   : > { %s7008_s26 = smov 16   ;;  %s7009_s29 = smov 1  }
  0xb1   : > { %5926 = dma.hbm_to_vmem [thread:$0]  (!%p7228_p12), %s8778_s18, 32, %s743_s6, [#allocation7], %s7008_s26, %s7008_s26, %s7009_s29  }
  0xb2   : > { %s7010_s16 = smov [#allocation38]   ;;  %s6344_s25 = scalar_lea.hbm %s8687_s22, 16 }
  0xb3   : > { %s767_s30 = sshll.u32 %s7010_s16, 4  ;;  %p6345_p3 = scmp.ne.s32.totalorder %s8687_s22, %s6344_s25  ;;  %s768_s30 = int_to_ptr.vmem [resolvable:$true] %s767_s30 }
  0xb4   : > { %p6351_p10 = scmp.lt.u32.totalorder %s6344_s25, %s8687_s22 }
  0xb5   : > { %p6347_p5 = pnand %p6345_p3, %p7242_p0 }
  0xb7   : > { %p6348_p8 = pneg %p6347_p5 }
  0xb9   : > { %p6353_p13 = pnand %p6351_p10, %p6348_p8 }
  0xbb   : > { %6356 = shalt.err (!%p6353_p13)
}
  0xbc   : > { %s6357_s6 = scalar_lea.vmem %s768_s30, 16  ;;  %s6364_s26 = scalar_lea.vmem %s768_s30, 32 }
  0xbd   : > { %p6358_p1 = scmp.ne.s32.totalorder %s768_s30, %s6357_s6  ;;  %p6365_p6 = scmp.lt.s32.totalorder %s768_s30, %s768_s30 }
  0xbe   : > { %p6366_p7 = scmp.lt.s32.totalorder %s6364_s26, %s6357_s6 }
  0xbf   : > { %p6360_p2 = pnand %p6358_p1, %p7242_p0 }
  0xc0   : > { %p6367_p9 = por %p6366_p7, %p6365_p6 }
  0xc1   : > { %p6361_p4 = pneg %p6360_p2 }
  0xc3   : > { %p6368_p11 = pnand %p6367_p9, %p6361_p4 }
  0xc5   : > { %6371 = shalt.err (!%p6368_p11)
}
  0xc6   : > { %5932 = dma.hbm_to_vmem [thread:$0]  (!%p7228_p12), %s8687_s22, 16, %s768_s30, [#allocation37]  }
  0xc7   : > { %p5133_p3 = scmp.ge.s32.totalorder %s7000_s1, 2 }
  0xc8   : > { %s7344_s0 = sand.u32 (!%p5133_p3), 1, %s7000_s1   ;;  %s7347_s21 = sand.u32 (!%p5133_p3), 1, %s6988_s24  }
  0xc9   : > { %774 = sbr.rel (%p5133_p3) target bundleno = 679 (0x2a7), region = 36  ;;  %s7350_s16 = sshll.u32 (!%p5133_p3), %s7347_s21, 6 }
  0xca   : > { %s7353_s7 = sshll.u32 (!%p5133_p3), %s6996_s5, 10  ;;  %s8779_s2 = sld [smem:[#allocation63_spill]] (!%p5133_p3) }
  0xcb   : > { %s782_s4 = scalar_lea.vmem (!%p5133_p3), [#allocation9], %s7350_s16  ;;  %s8720_s23 = scalar_lea.sflag (!%p5133_p3), [#allocation10], %s7344_s0 }
  0xcc   : > { %s789_s14 = sshll.u32 (!%p5133_p3), %s782_s4, 4  ;;  %p8780_p0 = scmp.ne.s32.totalorder (!%p5133_p3), %s8763_s27, 0  ;;  %s7362_s14 = int_to_ptr.vmem [resolvable:$true] %s789_s14 }
  0xd0   : > { %s7359_s25 = scalar_lea.hbm %s8779_s2, %s7353_s7  ;;  %s6376_s29 = scalar_lea.hbm %s8779_s2, 2048 }
  0xd1   : > { %s6372_s28 = scalar_lea.hbm %s7359_s25, 1024  ;;  %p6377_p10 = scmp.lt.u32.totalorder %s7359_s25, %s8779_s2 }
  0xd2   : > { %p6373_p12 = scmp.ne.s32.totalorder %s7359_s25, %s6372_s28  ;;  %p6378_p13 = scmp.lt.u32.totalorder %s6376_s29, %s6372_s28 }
  0xd3   : > { %p6380_p2 = scmp.lt.u32.totalorder %s6372_s28, %s7359_s25 }
  0xd4   : > { %p6374_p5 = pnand %p6373_p12, %p8780_p0  ;;  %p6379_p1 = por %p6378_p13, %p6377_p10 }
  0xd6   : > { %p6375_p8 = pneg %p6374_p5  ;;  %p6381_p4 = por %p6380_p2, %p6379_p1 }
  0xd8   : > { %p6382_p6 = pnand %p6381_p4, %p6375_p8 }
  0xda   : > { %6385 = shalt.err (!%p6382_p6)
}
  0xdb   : > { %s6386_s3 = scalar_lea.vmem %s7362_s14, 1024  ;;  %s7011_s4 = smov [#allocation9]  }
  0xdc   : > { %p6387_p7 = scmp.ne.s32.totalorder %s7362_s14, %s6386_s3  ;;  %s6390_s6 = sshll.u32 %s7011_s4, 4  ;;  %s6391_s6 = int_to_ptr.vmem [resolvable:$false] %s6390_s6 }
  0xdd   : > { %s6392_s26 = scalar_lea.vmem %s6391_s6, 2048  ;;  %p6393_p3 = scmp.lt.s32.totalorder %s7362_s14, %s6391_s6 }
  0xde   : > { %p6388_p9 = pnand %p6387_p7, %p8780_p0  ;;  %p6394_p12 = scmp.lt.s32.totalorder %s6392_s26, %s6386_s3 }
  0xe0   : > { %p6389_p11 = pneg %p6388_p9  ;;  %p6395_p5 = por %p6394_p12, %p6393_p3 }
  0xe2   : > { %p6396_p10 = pnand %p6395_p5, %p6389_p11 }
  0xe4   : > { %6399 = shalt.err (!%p6396_p10)
}
  0xe5   : > { %s8724_s28 = smov 64   ;;  %s8726_s29 = smov 4  }
  0xe6   : > { %5867 = dma.hbm_to_vmem [thread:$0]  (%p8780_p0), %s7359_s25, 1024, %s7362_s14, %s8720_s23, %s8724_s28, %s8724_s28, %s8726_s29  }
  0xe7   : > { %s8781_s3 = sld [smem:[#allocation65_spill]]  ;;  %s824_s6 = scalar_lea.vmem [#allocation12], %s7350_s16 }
  0xe8   : > { %s831_s26 = sshll.u32 %s824_s6, 4  ;;  %s8723_s2 = scalar_lea.sflag [#allocation13], %s7344_s0  ;;  %s7398_s26 = int_to_ptr.vmem [resolvable:$true] %s831_s26 }
  0xed   : > { %s7395_s4 = scalar_lea.hbm %s8781_s3, %s7353_s7  ;;  %s6404_s12 = scalar_lea.hbm %s8781_s3, 2048 }
  0xee   : > { %s6400_s18 = scalar_lea.hbm %s7395_s4, 1024  ;;  %p6405_p2 = scmp.lt.u32.totalorder %s7395_s4, %s8781_s3 }
  0xef   : > { %p6401_p8 = scmp.ne.s32.totalorder %s7395_s4, %s6400_s18  ;;  %p6406_p4 = scmp.lt.u32.totalorder %s6404_s12, %s6400_s18 }
  0xf0   : > { %p6408_p7 = scmp.lt.u32.totalorder %s6400_s18, %s7395_s4 }
  0xf1   : > { %p6402_p13 = pnand %p6401_p8, %p8780_p0  ;;  %p6407_p6 = por %p6406_p4, %p6405_p2 }
  0xf3   : > { %p6403_p1 = pneg %p6402_p13  ;;  %p6409_p9 = por %p6408_p7, %p6407_p6 }
  0xf5   : > { %p6410_p11 = pnand %p6409_p9, %p6403_p1 }
  0xf7   : > { %6413 = shalt.err (!%p6410_p11)
}
  0xf8   : > { %s6414_s6 = scalar_lea.vmem %s7398_s26, 1024  ;;  %s7014_s25 = smov [#allocation12]  }
  0xf9   : > { %p6415_p3 = scmp.ne.s32.totalorder %s7398_s26, %s6414_s6  ;;  %s6418_s14 = sshll.u32 %s7014_s25, 4  ;;  %s6419_s14 = int_to_ptr.vmem [resolvable:$false] %s6418_s14 }
  0xfa   : > { %s6420_s23 = scalar_lea.vmem %s6419_s14, 2048  ;;  %p6421_p10 = scmp.lt.s32.totalorder %s7398_s26, %s6419_s14 }
  0xfb   : > { %p6416_p12 = pnand %p6415_p3, %p8780_p0  ;;  %p6422_p8 = scmp.lt.s32.totalorder %s6420_s23, %s6414_s6 }
  0xfd   : > { %p6417_p5 = pneg %p6416_p12  ;;  %p6423_p13 = por %p6422_p8, %p6421_p10 }
  0xff   : > { %p6424_p2 = pnand %p6423_p13, %p6417_p5 }
 0x101   : > { %6427 = shalt.err (!%p6424_p2)
}
 0x102   : > { %5869 = dma.hbm_to_vmem [thread:$0]  (%p8780_p0), %s7395_s4, 1024, %s7398_s26, %s8723_s2, %s8724_s28, %s8724_s28, %s8726_s29  }
 0x103   : > { %s7428_s18 = sshll.u32 %s6996_s5, 4  ;;  %s865_s12 = scalar_lea.vmem [#allocation15], %s7347_s21 }
 0x104   : > { %s872_s30 = sshll.u32 %s865_s12, 4  ;;  %s8782_s14 = sld [smem:[#allocation67_spill]]  ;;  %s873_s30 = int_to_ptr.vmem [resolvable:$true] %s872_s30 }
 0x105   : > { %s8728_s3 = scalar_lea.sflag [#allocation16], %s7344_s0 }
 0x10a   : > { %s7435_s23 = scalar_lea.hbm %s8782_s14, %s7428_s18  ;;  %s6432_s12 = scalar_lea.hbm %s8782_s14, 32 }
 0x10b   : > { %s6428_s20 = scalar_lea.hbm %s7435_s23, 16  ;;  %p6433_p7 = scmp.lt.u32.totalorder %s7435_s23, %s8782_s14 }
 0x10c   : > { %p6429_p1 = scmp.ne.s32.totalorder %s7435_s23, %s6428_s20  ;;  %p6434_p9 = scmp.lt.u32.totalorder %s6432_s12, %s6428_s20 }
 0x10d   : > { %p6436_p3 = scmp.lt.u32.totalorder %s6428_s20, %s7435_s23 }
 0x10e   : > { %p6430_p4 = pnand %p6429_p1, %p8780_p0  ;;  %p6435_p11 = por %p6434_p9, %p6433_p7 }
 0x110   : > { %p6431_p6 = pneg %p6430_p4  ;;  %p6437_p12 = por %p6436_p3, %p6435_p11 }
 0x112   : > { %p6438_p5 = pnand %p6437_p12, %p6431_p6 }
 0x114   : > { %6441 = shalt.err (!%p6438_p5)
}
 0x115   : > { %s6442_s6 = scalar_lea.vmem %s873_s30, 16  ;;  %s7015_s25 = smov [#allocation15]  }
 0x116   : > { %p6443_p10 = scmp.ne.s32.totalorder %s873_s30, %s6442_s6  ;;  %s6446_s29 = sshll.u32 %s7015_s25, 4  ;;  %s6447_s29 = int_to_ptr.vmem [resolvable:$false] %s6446_s29 }
 0x117   : > { %s6448_s4 = scalar_lea.vmem %s6447_s29, 32  ;;  %p6449_p2 = scmp.lt.s32.totalorder %s873_s30, %s6447_s29 }
 0x118   : > { %p6444_p8 = pnand %p6443_p10, %p8780_p0  ;;  %p6450_p1 = scmp.lt.s32.totalorder %s6448_s4, %s6442_s6 }
 0x11a   : > { %p6445_p13 = pneg %p6444_p8  ;;  %p6451_p4 = por %p6450_p1, %p6449_p2 }
 0x11c   : > { %p6452_p7 = pnand %p6451_p4, %p6445_p13 }
 0x11e   : > { %6455 = shalt.err (!%p6452_p7)
}
 0x11f   : > { %5871 = dma.hbm_to_vmem [thread:$0]  (%p8780_p0), %s7435_s23, 16, %s873_s30, %s8728_s3  }
 0x120   : > { %s8783_s9 = sld [smem:[#allocation69_spill]]  ;;  %s900_s29 = scalar_lea.vmem [#allocation18], %s7350_s16 }
 0x121   : > { %s907_s26 = sshll.u32 %s900_s29, 4  ;;  %s8729_s12 = scalar_lea.sflag [#allocation19], %s7344_s0  ;;  %s7464_s26 = int_to_ptr.vmem [resolvable:$true] %s907_s26 }
 0x126   : > { %s7461_s28 = scalar_lea.hbm %s8783_s9, %s7353_s7  ;;  %s6460_s25 = scalar_lea.hbm %s8783_s9, 2048 }
 0x127   : > { %s6456_s6 = scalar_lea.hbm %s7461_s28, 1024  ;;  %p6461_p3 = scmp.lt.u32.totalorder %s7461_s28, %s8783_s9 }
 0x128   : > { %p6457_p6 = scmp.ne.s32.totalorder %s7461_s28, %s6456_s6  ;;  %p6462_p12 = scmp.lt.u32.totalorder %s6460_s25, %s6456_s6 }
 0x129   : > { %p6464_p10 = scmp.lt.u32.totalorder %s6456_s6, %s7461_s28 }
 0x12a   : > { %p6458_p9 = pnand %p6457_p6, %p8780_p0  ;;  %p6463_p5 = por %p6462_p12, %p6461_p3 }
 0x12c   : > { %p6459_p11 = pneg %p6458_p9  ;;  %p6465_p8 = por %p6464_p10, %p6463_p5 }
 0x12e   : > { %p6466_p13 = pnand %p6465_p8, %p6459_p11 }
 0x130   : > { %6469 = shalt.err (!%p6466_p13)
}
 0x131   : > { %s6470_s2 = scalar_lea.vmem %s7464_s26, 1024  ;;  %s7016_s29 = smov [#allocation18]  }
 0x132   : > { %p6471_p2 = scmp.ne.s32.totalorder %s7464_s26, %s6470_s2  ;;  %s6474_s30 = sshll.u32 %s7016_s29, 4  ;;  %s6475_s30 = int_to_ptr.vmem [resolvable:$false] %s6474_s30 }
 0x133   : > { %s6476_s23 = scalar_lea.vmem %s6475_s30, 2048  ;;  %p6477_p7 = scmp.lt.s32.totalorder %s7464_s26, %s6475_s30 }
 0x134   : > { %p6472_p1 = pnand %p6471_p2, %p8780_p0  ;;  %p6478_p6 = scmp.lt.s32.totalorder %s6476_s23, %s6470_s2 }
 0x136   : > { %p6473_p4 = pneg %p6472_p1  ;;  %p6479_p9 = por %p6478_p6, %p6477_p7 }
 0x138   : > { %p6480_p3 = pnand %p6479_p9, %p6473_p4 }
 0x13a   : > { %6483 = shalt.err (!%p6480_p3)
}
 0x13b   : > { %s8784_s6 = smov 4   ;;  %s8785_s25 = smov 64  }
 0x13c   : > { %5873 = dma.hbm_to_vmem [thread:$0]  (%p8780_p0), %s7461_s28, 1024, %s7464_s26, %s8729_s12, %s8785_s25, %s8785_s25, %s8784_s6  }
 0x13d   : > { %s8786_s11 = sld [smem:[#allocation71_spill]]  ;;  %s942_s29 = scalar_lea.vmem [#allocation21], %s7350_s16 }
 0x13e   : > { %s949_s30 = sshll.u32 %s942_s29, 4  ;;  %s8730_s23 = scalar_lea.sflag [#allocation22], %s7344_s0  ;;  %s7500_s30 = int_to_ptr.vmem [resolvable:$true] %s949_s30 }
 0x143   : > { %s7497_s2 = scalar_lea.hbm %s8786_s11, %s7353_s7  ;;  %s6488_s4 = scalar_lea.hbm %s8786_s11, 2048 }
 0x144   : > { %s6484_s3 = scalar_lea.hbm %s7497_s2, 1024  ;;  %p6489_p10 = scmp.lt.u32.totalorder %s7497_s2, %s8786_s11 }
 0x145   : > { %p6485_p11 = scmp.ne.s32.totalorder %s7497_s2, %s6484_s3  ;;  %p6490_p8 = scmp.lt.u32.totalorder %s6488_s4, %s6484_s3 }
 0x146   : > { %p6492_p2 = scmp.lt.u32.totalorder %s6484_s3, %s7497_s2 }
 0x147   : > { %p6486_p12 = pnand %p6485_p11, %p8780_p0  ;;  %p6491_p13 = por %p6490_p8, %p6489_p10 }
 0x149   : > { %p6487_p5 = pneg %p6486_p12  ;;  %p6493_p1 = por %p6492_p2, %p6491_p13 }
 0x14b   : > { %p6494_p4 = pnand %p6493_p1, %p6487_p5 }
 0x14d   : > { %6497 = shalt.err (!%p6494_p4)
}
 0x14e   : > { %s6498_s29 = scalar_lea.vmem %s7500_s30, 1024  ;;  %s7017_s28 = smov [#allocation21]  }
 0x14f   : > { %p6499_p7 = scmp.ne.s32.totalorder %s7500_s30, %s6498_s29  ;;  %s6502_s26 = sshll.u32 %s7017_s28, 4  ;;  %s6503_s26 = int_to_ptr.vmem [resolvable:$false] %s6502_s26 }
 0x150   : > { %s6504_s12 = scalar_lea.vmem %s6503_s26, 2048  ;;  %p6505_p3 = scmp.lt.s32.totalorder %s7500_s30, %s6503_s26 }
 0x151   : > { %p6500_p6 = pnand %p6499_p7, %p8780_p0  ;;  %p6506_p11 = scmp.lt.s32.totalorder %s6504_s12, %s6498_s29 }
 0x153   : > { %p6501_p9 = pneg %p6500_p6  ;;  %p6507_p12 = por %p6506_p11, %p6505_p3 }
 0x155   : > { %p6508_p10 = pnand %p6507_p12, %p6501_p9 }
 0x157   : > { %6511 = shalt.err (!%p6508_p10)
}
 0x158   : > { %5875 = dma.hbm_to_vmem [thread:$0]  (%p8780_p0), %s7497_s2, 1024, %s7500_s30, %s8730_s23, %s8785_s25, %s8785_s25, %s8784_s6  }
 0x159   : > { %s8787_s13 = sld [smem:[#allocation73_spill]]  ;;  %s983_s29 = scalar_lea.vmem [#allocation24], %s7347_s21 }
 0x15a   : > { %s990_s28 = sshll.u32 %s983_s29, 4  ;;  %s991_s28 = int_to_ptr.vmem [resolvable:$true] %s990_s28 }
 0x15f   : > { %s7533_s20 = scalar_lea.hbm %s8787_s13, %s7428_s18  ;;  %s6516_s30 = scalar_lea.hbm %s8787_s13, 32 }
 0x160   : > { %s6512_s12 = scalar_lea.hbm %s7533_s20, 16  ;;  %p6517_p2 = scmp.lt.u32.totalorder %s7533_s20, %s8787_s13 }
 0x161   : > { %p6513_p5 = scmp.ne.s32.totalorder %s7533_s20, %s6512_s12  ;;  %p6518_p1 = scmp.lt.u32.totalorder %s6516_s30, %s6512_s12 }
 0x162   : > { %p6520_p7 = scmp.lt.u32.totalorder %s6512_s12, %s7533_s20 }
 0x163   : > { %p6514_p8 = pnand %p6513_p5, %p8780_p0  ;;  %p6519_p4 = por %p6518_p1, %p6517_p2 }
 0x165   : > { %p6515_p13 = pneg %p6514_p8  ;;  %p6521_p6 = por %p6520_p7, %p6519_p4 }
 0x167   : > { %p6522_p9 = pnand %p6521_p6, %p6515_p13 }
 0x169   : > { %6525 = shalt.err (!%p6522_p9)
}
 0x16a   : > { %s6526_s29 = scalar_lea.vmem %s991_s28, 16  ;;  %s7018_s23 = smov [#allocation24]  }
 0x16b   : > { %p6527_p3 = scmp.ne.s32.totalorder %s991_s28, %s6526_s29  ;;  %s6530_s26 = sshll.u32 %s7018_s23, 4  ;;  %s6531_s26 = int_to_ptr.vmem [resolvable:$false] %s6530_s26 }
 0x16c   : > { %s6532_s9 = scalar_lea.vmem %s6531_s26, 32  ;;  %p6533_p10 = scmp.lt.s32.totalorder %s991_s28, %s6531_s26 }
 0x16d   : > { %p6528_p11 = pnand %p6527_p3, %p8780_p0  ;;  %p6534_p5 = scmp.lt.s32.totalorder %s6532_s9, %s6526_s29 }
 0x16f   : > { %p6529_p12 = pneg %p6528_p11  ;;  %p6535_p8 = por %p6534_p5, %p6533_p10 }
 0x171   : > { %p6536_p1 = pnand %p6535_p8, %p6529_p12 }
 0x173   : > { %6539 = shalt.err (!%p6536_p1)
}
 0x174   : > { %s8788_s12 = scalar_lea.sflag [#allocation25], %s7344_s0  ;;  %s5162_s23 = sshll.u32 %s7347_s21, 7 }
 0x175   : > { %5877 = dma.hbm_to_vmem [thread:$0]  (%p8780_p0), %s7533_s20, 16, %s991_s28, %s8788_s12  }
 0x176   : > { %s5344_s2 = sshll.u32 %s6996_s5, 11  ;;  %s8789_s15 = sld [smem:[#allocation75_spill]] }
 0x177   : > { %s1018_s4 = scalar_lea.vmem [#allocation27], %s5162_s23  ;;  %s8732_s9 = scalar_lea.sflag [#allocation28], %s7344_s0 }
 0x178   : > { %s1025_s29 = sshll.u32 %s1018_s4, 4  ;;  %s7567_s29 = int_to_ptr.vmem [resolvable:$true] %s1025_s29 }
 0x17c   : > { %s7563_s3 = scalar_lea.hbm %s8789_s15, %s5344_s2  ;;  %s6544_s12 = scalar_lea.hbm %s8789_s15, 4096 }
 0x17d   : > { %s6540_s11 = scalar_lea.hbm %s7563_s3, 2048  ;;  %p6545_p7 = scmp.lt.u32.totalorder %s7563_s3, %s8789_s15 }
 0x17e   : > { %p6541_p13 = scmp.ne.s32.totalorder %s7563_s3, %s6540_s11  ;;  %p6546_p6 = scmp.lt.u32.totalorder %s6544_s12, %s6540_s11 }
 0x17f   : > { %p6548_p3 = scmp.lt.u32.totalorder %s6540_s11, %s7563_s3 }
 0x180   : > { %p6542_p2 = pnand %p6541_p13, %p8780_p0  ;;  %p6547_p9 = por %p6546_p6, %p6545_p7 }
 0x182   : > { %p6543_p4 = pneg %p6542_p2  ;;  %p6549_p11 = por %p6548_p3, %p6547_p9 }
 0x184   : > { %p6550_p12 = pnand %p6549_p11, %p6543_p4 }
 0x186   : > { %6553 = shalt.err (!%p6550_p12)
}
 0x187   : > { %s6554_s4 = scalar_lea.vmem %s7567_s29, 2048  ;;  %s7019_s20 = smov [#allocation27]  }
 0x188   : > { %p6555_p10 = scmp.ne.s32.totalorder %s7567_s29, %s6554_s4  ;;  %s6558_s28 = sshll.u32 %s7019_s20, 4  ;;  %s6559_s28 = int_to_ptr.vmem [resolvable:$false] %s6558_s28 }
 0x189   : > { %s6560_s26 = scalar_lea.vmem %s6559_s28, 4096  ;;  %p6561_p1 = scmp.lt.s32.totalorder %s7567_s29, %s6559_s28 }
 0x18a   : > { %p6556_p5 = pnand %p6555_p10, %p8780_p0  ;;  %p6562_p13 = scmp.lt.s32.totalorder %s6560_s26, %s6554_s4 }
 0x18c   : > { %p6557_p8 = pneg %p6556_p5  ;;  %p6563_p2 = por %p6562_p13, %p6561_p1 }
 0x18e   : > { %p6564_p7 = pnand %p6563_p2, %p6557_p8 }
 0x190   : > { %6567 = shalt.err (!%p6564_p7)
}
 0x191   : > { %s7020_s11 = smov 128   ;;  %s7021_s12 = smov 8  }
 0x192   : > { %5879 = dma.hbm_to_vmem [thread:$0]  (%p8780_p0), %s7563_s3, 2048, %s7567_s29, %s8732_s9, %s7020_s11, %s7020_s11, %s7021_s12  }
 0x193   : > { %s8790_s17 = sld [smem:[#allocation77_spill]]  ;;  %s1058_s28 = scalar_lea.vmem [#allocation30], %s5162_s23 }
 0x194   : > { %s1065_s26 = sshll.u32 %s1058_s28, 4  ;;  %s8733_s13 = scalar_lea.sflag [#allocation31], %s7344_s0  ;;  %s7602_s26 = int_to_ptr.vmem [resolvable:$true] %s1065_s26 }
 0x199   : > { %s7598_s4 = scalar_lea.hbm %s8790_s17, %s5344_s2  ;;  %s6572_s2 = scalar_lea.hbm %s8790_s17, 4096 }
 0x19a   : > { %s6568_s14 = scalar_lea.hbm %s7598_s4, 2048  ;;  %p6573_p3 = scmp.lt.u32.totalorder %s7598_s4, %s8790_s17 }
 0x19b   : > { %p6569_p4 = scmp.ne.s32.totalorder %s7598_s4, %s6568_s14  ;;  %p6574_p11 = scmp.lt.u32.totalorder %s6572_s2, %s6568_s14 }
 0x19c   : > { %p6576_p10 = scmp.lt.u32.totalorder %s6568_s14, %s7598_s4 }
 0x19d   : > { %p6570_p6 = pnand %p6569_p4, %p8780_p0  ;;  %p6575_p12 = por %p6574_p11, %p6573_p3 }
 0x19f   : > { %p6571_p9 = pneg %p6570_p6  ;;  %p6577_p5 = por %p6576_p10, %p6575_p12 }
 0x1a1   : > { %p6578_p8 = pnand %p6577_p5, %p6571_p9 }
 0x1a3   : > { %6581 = shalt.err (!%p6578_p8)
}
 0x1a4   : > { %s6582_s23 = scalar_lea.vmem %s7602_s26, 2048  ;;  %s7022_s30 = smov [#allocation30]  }
 0x1a5   : > { %p6583_p1 = scmp.ne.s32.totalorder %s7602_s26, %s6582_s23  ;;  %s6586_s20 = sshll.u32 %s7022_s30, 4  ;;  %s6587_s20 = int_to_ptr.vmem [resolvable:$false] %s6586_s20 }
 0x1a6   : > { %s6588_s28 = scalar_lea.vmem %s6587_s20, 4096  ;;  %p6589_p7 = scmp.lt.s32.totalorder %s7602_s26, %s6587_s20 }
 0x1a7   : > { %p6584_p13 = pnand %p6583_p1, %p8780_p0  ;;  %p6590_p4 = scmp.lt.s32.totalorder %s6588_s28, %s6582_s23 }
 0x1a9   : > { %p6585_p2 = pneg %p6584_p13  ;;  %p6591_p6 = por %p6590_p4, %p6589_p7 }
 0x1ab   : > { %p6592_p3 = pnand %p6591_p6, %p6585_p2 }
 0x1ad   : > { %6595 = shalt.err (!%p6592_p3)
}
 0x1ae   : > { %5881 = dma.hbm_to_vmem [thread:$0]  (%p8780_p0), %s7598_s4, 2048, %s7602_s26, %s8733_s13, %s8785_s25, %s8785_s25, %s8784_s6  }
 0x1af   : > { %s7635_s29 = scalar_lea.hbm %s8684_s19, %s7428_s18  ;;  %s1095_s2 = scalar_lea.vmem [#allocation33], %s7347_s21 }
 0x1b0   : > { %s1102_s11 = sshll.u32 %s1095_s2, 4  ;;  %s8791_s30 = sld [smem:[#allocation64_spill]]  ;;  %s7638_s11 = int_to_ptr.vmem [resolvable:$true] %s1102_s11 }
 0x1b1   : > { %s8734_s9 = scalar_lea.sflag [#allocation34], %s7344_s0  ;;  %s6596_s4 = scalar_lea.hbm %s7635_s29, 16 }
 0x1b2   : > { %p6597_p9 = scmp.ne.s32.totalorder %s7635_s29, %s6596_s4  ;;  %s6600_s3 = scalar_lea.hbm %s8684_s19, 32 }
 0x1b3   : > { %p6601_p10 = scmp.lt.u32.totalorder %s7635_s29, %s8684_s19  ;;  %p6602_p5 = scmp.lt.u32.totalorder %s6600_s3, %s6596_s4 }
 0x1b4   : > { %p6598_p11 = pnand %p6597_p9, %p8780_p0  ;;  %p6604_p1 = scmp.lt.u32.totalorder %s6596_s4, %s7635_s29 }
 0x1b5   : > { %p6603_p8 = por %p6602_p5, %p6601_p10 }
 0x1b6   : > { %s8792_s20 = smov %s8791_s30  ;;  %s7644_s28 = scalar_lea.hbm %s8791_s30, %s7353_s7 }
 0x1b7   : > { %p6599_p12 = pneg %p6598_p11  ;;  %p6605_p13 = por %p6604_p1, %p6603_p8 }
 0x1b9   : > { %p6606_p2 = pnand %p6605_p13, %p6599_p12 }
 0x1bb   : > { %6609 = shalt.err (!%p6606_p2)
}
 0x1bc   : > { %s6610_s2 = scalar_lea.vmem %s7638_s11, 16  ;;  %s7023_s12 = smov [#allocation33]  }
 0x1bd   : > { %p6611_p7 = scmp.ne.s32.totalorder %s7638_s11, %s6610_s2  ;;  %s6614_s23 = sshll.u32 %s7023_s12, 4  ;;  %s6615_s23 = int_to_ptr.vmem [resolvable:$false] %s6614_s23 }
 0x1be   : > { %s6616_s13 = scalar_lea.vmem %s6615_s23, 32  ;;  %p6617_p3 = scmp.lt.s32.totalorder %s7638_s11, %s6615_s23 }
 0x1bf   : > { %p6612_p4 = pnand %p6611_p7, %p8780_p0  ;;  %p6618_p9 = scmp.lt.s32.totalorder %s6616_s13, %s6610_s2 }
 0x1c1   : > { %p6613_p6 = pneg %p6612_p4  ;;  %p6619_p11 = por %p6618_p9, %p6617_p3 }
 0x1c3   : > { %p6620_p10 = pnand %p6619_p11, %p6613_p6 }
 0x1c5   : > { %6623 = shalt.err (!%p6620_p10)
}
 0x1c6   : > { %5883 = dma.hbm_to_vmem [thread:$0]  (%p8780_p0), %s7635_s29, 16, %s7638_s11, %s8734_s9  }
 0x1c7   : > { %s803_s15 = scalar_lea.vmem [#allocation11], %s7350_s16  ;;  %s8793_s14 = sld [smem:[#allocation66_spill]] }
 0x1c8   : > { %s810_s30 = sshll.u32 %s803_s15, 4  ;;  %s6624_s2 = scalar_lea.hbm %s7644_s28, 1024  ;;  %s7671_s30 = int_to_ptr.vmem [resolvable:$true] %s810_s30 }
 0x1c9   : > { %p6625_p12 = scmp.ne.s32.totalorder %s7644_s28, %s6624_s2  ;;  %s6628_s13 = scalar_lea.hbm %s8792_s20, 2048 }
 0x1ca   : > { %p6629_p1 = scmp.lt.u32.totalorder %s7644_s28, %s8792_s20  ;;  %p6630_p13 = scmp.lt.u32.totalorder %s6628_s13, %s6624_s2 }
 0x1cb   : > { %p6626_p5 = pnand %p6625_p12, %p8780_p0  ;;  %p6632_p7 = scmp.lt.u32.totalorder %s6624_s2, %s7644_s28 }
 0x1cc   : > { %p6631_p2 = por %p6630_p13, %p6629_p1 }
 0x1cd   : > { %s7677_s3 = scalar_lea.hbm %s8793_s14, %s7353_s7  ;;  %p6627_p8 = pneg %p6626_p5 }
 0x1ce   : > { %p6633_p4 = por %p6632_p7, %p6631_p2 }
 0x1d0   : > { %p6634_p6 = pnand %p6633_p4, %p6627_p8 }
 0x1d2   : > { %6637 = shalt.err (!%p6634_p6)
}
 0x1d3   : > { %s6638_s11 = scalar_lea.vmem %s7671_s30, 1024  ;;  %s7024_s15 = smov [#allocation11]  }
 0x1d4   : > { %p6639_p3 = scmp.ne.s32.totalorder %s7671_s30, %s6638_s11  ;;  %s6642_s4 = sshll.u32 %s7024_s15, 4  ;;  %s6643_s4 = int_to_ptr.vmem [resolvable:$false] %s6642_s4 }
 0x1d5   : > { %s6644_s17 = scalar_lea.vmem %s6643_s4, 2048  ;;  %p6645_p10 = scmp.lt.s32.totalorder %s7671_s30, %s6643_s4 }
 0x1d6   : > { %p6640_p9 = pnand %p6639_p3, %p8780_p0  ;;  %p6646_p12 = scmp.lt.s32.totalorder %s6644_s17, %s6638_s11 }
 0x1d8   : > { %p6641_p11 = pneg %p6640_p9  ;;  %p6647_p5 = por %p6646_p12, %p6645_p10 }
 0x1da   : > { %p6648_p1 = pnand %p6647_p5, %p6641_p11 }
 0x1dc   : > { %6651 = shalt.err (!%p6648_p1)
}
 0x1dd   : > { %s8794_s26 = scalar_lea.sflag [#allocation10], %s7344_s0  ;;  %s845_s2 = scalar_lea.vmem [#allocation14], %s7350_s16 }
 0x1de   : > { %5868 = dma.hbm_to_vmem [thread:$0]  (%p8780_p0), %s7644_s28, 1024, %s7671_s30, %s8794_s26, %s8785_s25, %s8785_s25, %s8784_s6  }
 0x1df   : > { %s852_s12 = sshll.u32 %s845_s2, 4  ;;  %s8795_s8 = sld [smem:[#allocation68_spill]]  ;;  %s7706_s12 = int_to_ptr.vmem [resolvable:$true] %s852_s12 }
 0x1e0   : > { %s6652_s11 = scalar_lea.hbm %s7677_s3, 1024  ;;  %s6656_s17 = scalar_lea.hbm %s8793_s14, 2048 }
 0x1e1   : > { %p6653_p8 = scmp.ne.s32.totalorder %s7677_s3, %s6652_s11  ;;  %p6657_p7 = scmp.lt.u32.totalorder %s7677_s3, %s8793_s14 }
 0x1e2   : > { %p6658_p4 = scmp.lt.u32.totalorder %s6656_s17, %s6652_s11  ;;  %p6660_p3 = scmp.lt.u32.totalorder %s6652_s11, %s7677_s3 }
 0x1e3   : > { %p6654_p13 = pnand %p6653_p8, %p8780_p0 }
 0x1e4   : > { %p6659_p6 = por %p6658_p4, %p6657_p7 }
 0x1e5   : > { %s7712_s29 = scalar_lea.hbm %s8795_s8, %s7428_s18  ;;  %p6655_p2 = pneg %p6654_p13 }
 0x1e6   : > { %p6661_p9 = por %p6660_p3, %p6659_p6 }
 0x1e8   : > { %p6662_p11 = pnand %p6661_p9, %p6655_p2 }
 0x1ea   : > { %6665 = shalt.err (!%p6662_p11)
}
 0x1eb   : > { %s6666_s30 = scalar_lea.vmem %s7706_s12, 1024  ;;  %s7025_s26 = smov [#allocation14]  }
 0x1ec   : > { %p6667_p10 = scmp.ne.s32.totalorder %s7706_s12, %s6666_s30  ;;  %s6670_s2 = sshll.u32 %s7025_s26, 4  ;;  %s6671_s2 = int_to_ptr.vmem [resolvable:$false] %s6670_s2 }
 0x1ed   : > { %s6672_s9 = scalar_lea.vmem %s6671_s2, 2048  ;;  %p6673_p1 = scmp.lt.s32.totalorder %s7706_s12, %s6671_s2 }
 0x1ee   : > { %p6668_p12 = pnand %p6667_p10, %p8780_p0  ;;  %p6674_p8 = scmp.lt.s32.totalorder %s6672_s9, %s6666_s30 }
 0x1f0   : > { %p6669_p5 = pneg %p6668_p12  ;;  %p6675_p13 = por %p6674_p8, %p6673_p1 }
 0x1f2   : > { %p6676_p7 = pnand %p6675_p13, %p6669_p5 }
 0x1f4   : > { %6679 = shalt.err (!%p6676_p7)
}
 0x1f5   : > { %s8796_s23 = scalar_lea.sflag [#allocation13], %s7344_s0  ;;  %s882_s13 = scalar_lea.vmem [#allocation17], %s7347_s21 }
 0x1f6   : > { %5870 = dma.hbm_to_vmem [thread:$0]  (%p8780_p0), %s7677_s3, 1024, %s7706_s12, %s8796_s23, %s8785_s25, %s8785_s25, %s8784_s6  }
 0x1f7   : > { %s889_s11 = sshll.u32 %s882_s13, 4  ;;  %s8797_s10 = sld [smem:[#allocation70_spill]]  ;;  %s890_s11 = int_to_ptr.vmem [resolvable:$true] %s889_s11 }
 0x1f8   : > { %s6680_s28 = scalar_lea.hbm %s7712_s29, 16  ;;  %s6684_s2 = scalar_lea.hbm %s8795_s8, 32 }
 0x1f9   : > { %p6681_p2 = scmp.ne.s32.totalorder %s7712_s29, %s6680_s28  ;;  %p6685_p3 = scmp.lt.u32.totalorder %s7712_s29, %s8795_s8 }
 0x1fa   : > { %p6686_p9 = scmp.lt.u32.totalorder %s6684_s2, %s6680_s28  ;;  %p6688_p10 = scmp.lt.u32.totalorder %s6680_s28, %s7712_s29 }
 0x1fb   : > { %p6682_p4 = pnand %p6681_p2, %p8780_p0 }
 0x1fc   : > { %p6687_p11 = por %p6686_p9, %p6685_p3 }
 0x1fd   : > { %s7745_s17 = scalar_lea.hbm %s8797_s10, %s7353_s7  ;;  %p6683_p6 = pneg %p6682_p4 }
 0x1fe   : > { %p6689_p12 = por %p6688_p10, %p6687_p11 }
 0x200   : > { %p6690_p5 = pnand %p6689_p12, %p6683_p6 }
 0x202   : > { %6693 = shalt.err (!%p6690_p5)
}
 0x203   : > { %s6694_s3 = scalar_lea.vmem %s890_s11, 16  ;;  %s7026_s12 = smov [#allocation17]  }
 0x204   : > { %p6695_p1 = scmp.ne.s32.totalorder %s890_s11, %s6694_s3  ;;  %s6698_s23 = sshll.u32 %s7026_s12, 4  ;;  %s6699_s23 = int_to_ptr.vmem [resolvable:$false] %s6698_s23 }
 0x205   : > { %s6700_s13 = scalar_lea.vmem %s6699_s23, 32  ;;  %p6701_p7 = scmp.lt.s32.totalorder %s890_s11, %s6699_s23 }
 0x206   : > { %p6696_p8 = pnand %p6695_p1, %p8780_p0  ;;  %p6702_p2 = scmp.lt.s32.totalorder %s6700_s13, %s6694_s3 }
 0x208   : > { %p6697_p13 = pneg %p6696_p8  ;;  %p6703_p4 = por %p6702_p2, %p6701_p7 }
 0x20a   : > { %p6704_p3 = pnand %p6703_p4, %p6697_p13 }
 0x20c   : > { %6707 = shalt.err (!%p6704_p3)
}
 0x20d   : > { %s8798_s14 = scalar_lea.sflag [#allocation16], %s7344_s0  ;;  %s921_s15 = scalar_lea.vmem [#allocation20], %s7350_s16 }
 0x20e   : > { %5872 = dma.hbm_to_vmem [thread:$0]  (%p8780_p0), %s7712_s29, 16, %s890_s11, %s8798_s14  }
 0x20f   : > { %s928_s4 = sshll.u32 %s921_s15, 4  ;;  %s8799_s26 = sld [smem:[#allocation72_spill]]  ;;  %s7767_s4 = int_to_ptr.vmem [resolvable:$true] %s928_s4 }
 0x210   : > { %s6708_s9 = scalar_lea.hbm %s7745_s17, 1024  ;;  %s6712_s23 = scalar_lea.hbm %s8797_s10, 2048 }
 0x211   : > { %p6709_p6 = scmp.ne.s32.totalorder %s7745_s17, %s6708_s9  ;;  %p6713_p10 = scmp.lt.u32.totalorder %s7745_s17, %s8797_s10 }
 0x212   : > { %p6714_p12 = scmp.lt.u32.totalorder %s6712_s23, %s6708_s9  ;;  %p6716_p1 = scmp.lt.u32.totalorder %s6708_s9, %s7745_s17 }
 0x213   : > { %p6710_p9 = pnand %p6709_p6, %p8780_p0 }
 0x214   : > { %p6715_p5 = por %p6714_p12, %p6713_p10 }
 0x215   : > { %s7773_s2 = scalar_lea.hbm %s8799_s26, %s7353_s7  ;;  %p6711_p11 = pneg %p6710_p9 }
 0x216   : > { %p6717_p8 = por %p6716_p1, %p6715_p5 }
 0x218   : > { %p6718_p13 = pnand %p6717_p8, %p6711_p11 }
 0x21a   : > { %6721 = shalt.err (!%p6718_p13)
}
 0x21b   : > { %s6722_s7 = scalar_lea.vmem %s7767_s4, 1024  ;;  %s7027_s11 = smov [#allocation20]  }
 0x21c   : > { %p6723_p7 = scmp.ne.s32.totalorder %s7767_s4, %s6722_s7  ;;  %s6726_s14 = sshll.u32 %s7027_s11, 4  ;;  %s6727_s14 = int_to_ptr.vmem [resolvable:$false] %s6726_s14 }
 0x21d   : > { %s6728_s15 = scalar_lea.vmem %s6727_s14, 2048  ;;  %p6729_p3 = scmp.lt.s32.totalorder %s7767_s4, %s6727_s14 }
 0x21e   : > { %p6724_p2 = pnand %p6723_p7, %p8780_p0  ;;  %p6730_p6 = scmp.lt.s32.totalorder %s6728_s15, %s6722_s7 }
 0x220   : > { %p6725_p4 = pneg %p6724_p2  ;;  %p6731_p9 = por %p6730_p6, %p6729_p3 }
 0x222   : > { %p6732_p10 = pnand %p6731_p9, %p6725_p4 }
 0x224   : > { %6735 = shalt.err (!%p6732_p10)
}
 0x225   : > { %s8800_s28 = scalar_lea.sflag [#allocation19], %s7344_s0  ;;  %s963_s30 = scalar_lea.vmem [#allocation23], %s7350_s16 }
 0x226   : > { %5874 = dma.hbm_to_vmem [thread:$0]  (%p8780_p0), %s7745_s17, 1024, %s7767_s4, %s8800_s28, %s8785_s25, %s8785_s25, %s8784_s6  }
 0x227   : > { %s970_s9 = sshll.u32 %s963_s30, 4  ;;  %s8801_s23 = sld [smem:[#allocation74_spill]]  ;;  %s7802_s9 = int_to_ptr.vmem [resolvable:$true] %s970_s9 }
 0x228   : > { %s6736_s29 = scalar_lea.hbm %s7773_s2, 1024  ;;  %s6740_s14 = scalar_lea.hbm %s8799_s26, 2048 }
 0x229   : > { %p6737_p11 = scmp.ne.s32.totalorder %s7773_s2, %s6736_s29  ;;  %p6741_p1 = scmp.lt.u32.totalorder %s7773_s2, %s8799_s26 }
 0x22a   : > { %p6742_p8 = scmp.lt.u32.totalorder %s6740_s14, %s6736_s29  ;;  %p6744_p7 = scmp.lt.u32.totalorder %s6736_s29, %s7773_s2 }
 0x22b   : > { %p6738_p12 = pnand %p6737_p11, %p8780_p0 }
 0x22c   : > { %p6743_p13 = por %p6742_p8, %p6741_p1 }
 0x22d   : > { %s7808_s13 = scalar_lea.hbm %s8801_s23, %s7428_s18  ;;  %p6739_p5 = pneg %p6738_p12 }
 0x22e   : > { %p6745_p2 = por %p6744_p7, %p6743_p13 }
 0x230   : > { %p6746_p4 = pnand %p6745_p2, %p6739_p5 }
 0x232   : > { %6749 = shalt.err (!%p6746_p4)
}
 0x233   : > { %s6750_s16 = scalar_lea.vmem %s7802_s9, 1024  ;;  %s7028_s4 = smov [#allocation23]  }
 0x234   : > { %p6751_p3 = scmp.ne.s32.totalorder %s7802_s9, %s6750_s16  ;;  %s6754_s28 = sshll.u32 %s7028_s4, 4  ;;  %s6755_s28 = int_to_ptr.vmem [resolvable:$false] %s6754_s28 }
 0x235   : > { %s6756_s30 = scalar_lea.vmem %s6755_s28, 2048  ;;  %p6757_p10 = scmp.lt.s32.totalorder %s7802_s9, %s6755_s28 }
 0x236   : > { %p6752_p6 = pnand %p6751_p3, %p8780_p0  ;;  %p6758_p11 = scmp.lt.s32.totalorder %s6756_s30, %s6750_s16 }
 0x238   : > { %p6753_p9 = pneg %p6752_p6  ;;  %p6759_p12 = por %p6758_p11, %p6757_p10 }
 0x23a   : > { %p6760_p1 = pnand %p6759_p12, %p6753_p9 }
 0x23c   : > { %6763 = shalt.err (!%p6760_p1)
}
 0x23d   : > { %s8802_s3 = scalar_lea.sflag [#allocation22], %s7344_s0  ;;  %s1000_s12 = scalar_lea.vmem [#allocation26], %s7347_s21 }
 0x23e   : > { %5876 = dma.hbm_to_vmem [thread:$0]  (%p8780_p0), %s7773_s2, 1024, %s7802_s9, %s8802_s3, %s8785_s25, %s8785_s25, %s8784_s6  }
 0x23f   : > { %s1007_s29 = sshll.u32 %s1000_s12, 4  ;;  %s5165_s7 = sshll.u32 %s7347_s21, 1  ;;  %s1008_s29 = int_to_ptr.vmem [resolvable:$true] %s1007_s29 }
 0x240   : > { %s6764_s11 = scalar_lea.hbm %s7808_s13, 16  ;;  %s6768_s17 = scalar_lea.hbm %s8801_s23, 32 }
 0x241   : > { %p6765_p5 = scmp.ne.s32.totalorder %s7808_s13, %s6764_s11  ;;  %p6769_p7 = scmp.lt.u32.totalorder %s7808_s13, %s8801_s23 }
 0x242   : > { %p6770_p2 = scmp.lt.u32.totalorder %s6768_s17, %s6764_s11  ;;  %p6772_p3 = scmp.lt.u32.totalorder %s6764_s11, %s7808_s13 }
 0x243   : > { %p6766_p8 = pnand %p6765_p5, %p8780_p0 }
 0x244   : > { %p6771_p4 = por %p6770_p2, %p6769_p7 }
 0x245   : > { %p6767_p13 = pneg %p6766_p8 }
 0x246   : > { %p6773_p6 = por %p6772_p3, %p6771_p4 }
 0x248   : > { %p6774_p9 = pnand %p6773_p6, %p6767_p13 }
 0x24a   : > { %6777 = shalt.err (!%p6774_p9)
}
 0x24b   : > { %s6778_s6 = scalar_lea.vmem %s1008_s29, 16  ;;  %s7029_s25 = smov [#allocation26]  }
 0x24c   : > { %p6779_p10 = scmp.ne.s32.totalorder %s1008_s29, %s6778_s6  ;;  %s6782_s2 = sshll.u32 %s7029_s25, 4  ;;  %s6783_s2 = int_to_ptr.vmem [resolvable:$false] %s6782_s2 }
 0x24d   : > { %s6784_s9 = scalar_lea.vmem %s6783_s2, 32  ;;  %p6785_p1 = scmp.lt.s32.totalorder %s1008_s29, %s6783_s2 }
 0x24e   : > { %p6780_p11 = pnand %p6779_p10, %p8780_p0  ;;  %p6786_p5 = scmp.lt.s32.totalorder %s6784_s9, %s6778_s6 }
 0x250   : > { %p6781_p12 = pneg %p6780_p11  ;;  %p6787_p8 = por %p6786_p5, %p6785_p1 }
 0x252   : > { %p6788_p2 = pnand %p6787_p8, %p6781_p12 }
 0x254   : > { %6791 = shalt.err (!%p6788_p2)
}
 0x255   : > { %s8803_s28 = scalar_lea.sflag [#allocation25], %s7344_s0  ;;  %s5345_s30 = sshll.u32 %s6996_s5, 5 }
 0x256   : > { %5878 = dma.hbm_to_vmem [thread:$0]  (%p8780_p0), %s7808_s13, 16, %s1008_s29, %s8803_s28  }
 0x257   : > { %s1039_s3 = scalar_lea.vmem [#allocation29], %s5165_s7  ;;  %s8804_s15 = sld [smem:[#allocation76_spill]] }
 0x258   : > { %s1047_s12 = sshll.u32 %s1039_s3, 4  ;;  %s1048_s12 = int_to_ptr.vmem [resolvable:$true] %s1047_s12 }
 0x25d   : > { %s1045_s17 = scalar_lea.hbm %s8804_s15, %s5345_s30  ;;  %s6796_s25 = scalar_lea.hbm %s8804_s15, 64 }
 0x25e   : > { %s6792_s16 = scalar_lea.hbm %s1045_s17, 32  ;;  %p6797_p3 = scmp.lt.u32.totalorder %s1045_s17, %s8804_s15 }
 0x25f   : > { %p6793_p13 = scmp.ne.s32.totalorder %s1045_s17, %s6792_s16  ;;  %p6798_p6 = scmp.lt.u32.totalorder %s6796_s25, %s6792_s16 }
 0x260   : > { %p6800_p10 = scmp.lt.u32.totalorder %s6792_s16, %s1045_s17 }
 0x261   : > { %p6794_p7 = pnand %p6793_p13, %p8780_p0  ;;  %p6799_p9 = por %p6798_p6, %p6797_p3 }
 0x263   : > { %p6795_p4 = pneg %p6794_p7  ;;  %p6801_p11 = por %p6800_p10, %p6799_p9 }
 0x265   : > { %p6802_p12 = pnand %p6801_p11, %p6795_p4 }
 0x267   : > { %6805 = shalt.err (!%p6802_p12)
}
 0x268   : > { %s6806_s29 = scalar_lea.vmem %s1048_s12, 32  ;;  %s7030_s7 = smov [#allocation29]  }
 0x269   : > { %p6807_p1 = scmp.ne.s32.totalorder %s1048_s12, %s6806_s29  ;;  %s6810_s9 = sshll.u32 %s7030_s7, 4  ;;  %s6811_s9 = int_to_ptr.vmem [resolvable:$false] %s6810_s9 }
 0x26a   : > { %s6812_s28 = scalar_lea.vmem %s6811_s9, 64  ;;  %p6813_p2 = scmp.lt.s32.totalorder %s1048_s12, %s6811_s9 }
 0x26b   : > { %p6808_p5 = pnand %p6807_p1, %p8780_p0  ;;  %p6814_p13 = scmp.lt.s32.totalorder %s6812_s28, %s6806_s29 }
 0x26d   : > { %p6809_p8 = pneg %p6808_p5  ;;  %p6815_p7 = por %p6814_p13, %p6813_p2 }
 0x26f   : > { %p6816_p3 = pnand %p6815_p7, %p6809_p8 }
 0x271   : > { %6819 = shalt.err (!%p6816_p3)
}
 0x272   : > { %s8805_s30 = scalar_lea.sflag [#allocation28], %s7344_s0  ;;  %s8806_s14 = sld [smem:[#allocation78_spill]] }
 0x273   : > { %5880 = dma.hbm_to_vmem [thread:$0]  (%p8780_p0), %s1045_s17, 32, %s1048_s12, %s8805_s30  }
 0x274   : > { %s1078_s4 = scalar_lea.vmem [#allocation32], %s7347_s21  ;;  %s8807_s13 = sld [smem:[#allocation79_spill]] }
 0x275   : > { %s1085_s6 = sshll.u32 %s1078_s4, 4  ;;  %s1086_s6 = int_to_ptr.vmem [resolvable:$true] %s1085_s6 }
 0x278   : > { %s7881_s16 = scalar_lea.hbm %s8806_s14, %s7428_s18  ;;  %s6824_s9 = scalar_lea.hbm %s8806_s14, 32 }
 0x279   : > { %s6820_s7 = scalar_lea.hbm %s7881_s16, 16  ;;  %p6825_p10 = scmp.lt.u32.totalorder %s7881_s16, %s8806_s14 }
 0x27a   : > { %s7888_s29 = scalar_lea.hbm %s8807_s13, %s7428_s18  ;;  %p6821_p4 = scmp.ne.s32.totalorder %s7881_s16, %s6820_s7 }
 0x27b   : > { %p6826_p11 = scmp.lt.u32.totalorder %s6824_s9, %s6820_s7  ;;  %p6828_p1 = scmp.lt.u32.totalorder %s6820_s7, %s7881_s16 }
 0x27c   : > { %p6822_p6 = pnand %p6821_p4, %p8780_p0 }
 0x27d   : > { %p6827_p12 = por %p6826_p11, %p6825_p10 }
 0x27e   : > { %p6823_p9 = pneg %p6822_p6 }
 0x27f   : > { %p6829_p5 = por %p6828_p1, %p6827_p12 }
 0x281   : > { %p6830_p8 = pnand %p6829_p5, %p6823_p9 }
 0x283   : > { %6833 = shalt.err (!%p6830_p8)
}
 0x284   : > { %s6834_s18 = scalar_lea.vmem %s1086_s6, 16  ;;  %s7031_s3 = smov [#allocation32]  }
 0x285   : > { %p6835_p2 = scmp.ne.s32.totalorder %s1086_s6, %s6834_s18  ;;  %s6838_s11 = sshll.u32 %s7031_s3, 4  ;;  %s6839_s11 = int_to_ptr.vmem [resolvable:$false] %s6838_s11 }
 0x286   : > { %s6840_s4 = scalar_lea.vmem %s6839_s11, 32  ;;  %p6841_p3 = scmp.lt.s32.totalorder %s1086_s6, %s6839_s11 }
 0x287   : > { %p6836_p13 = pnand %p6835_p2, %p8780_p0  ;;  %p6842_p4 = scmp.lt.s32.totalorder %s6840_s4, %s6834_s18 }
 0x289   : > { %p6837_p7 = pneg %p6836_p13  ;;  %p6843_p6 = por %p6842_p4, %p6841_p3 }
 0x28b   : > { %p6844_p10 = pnand %p6843_p6, %p6837_p7 }
 0x28d   : > { %6847 = shalt.err (!%p6844_p10)
}
 0x28e   : > { %s8808_s25 = scalar_lea.sflag [#allocation31], %s7344_s0  ;;  %s1112_s2 = scalar_lea.vmem [#allocation35], %s7347_s21 }
 0x28f   : > { %5882 = dma.hbm_to_vmem [thread:$0]  (%p8780_p0), %s7881_s16, 16, %s1086_s6, %s8808_s25  }
 0x290   : > { %s1119_s7 = sshll.u32 %s1112_s2, 4  ;;  %s6848_s12 = scalar_lea.hbm %s7888_s29, 16  ;;  %s1120_s7 = int_to_ptr.vmem [resolvable:$true] %s1119_s7 }
 0x291   : > { %p6849_p9 = scmp.ne.s32.totalorder %s7888_s29, %s6848_s12  ;;  %s6852_s28 = scalar_lea.hbm %s8807_s13, 32 }
 0x292   : > { %p6853_p1 = scmp.lt.u32.totalorder %s7888_s29, %s8807_s13  ;;  %p6854_p5 = scmp.lt.u32.totalorder %s6852_s28, %s6848_s12 }
 0x293   : > { %p6850_p11 = pnand %p6849_p9, %p8780_p0  ;;  %p6856_p2 = scmp.lt.u32.totalorder %s6848_s12, %s7888_s29 }
 0x294   : > { %p6855_p8 = por %p6854_p5, %p6853_p1 }
 0x295   : > { %p6851_p12 = pneg %p6850_p11 }
 0x296   : > { %p6857_p13 = por %p6856_p2, %p6855_p8 }
 0x298   : > { %p6858_p7 = pnand %p6857_p13, %p6851_p12 }
 0x29a   : > { %6861 = shalt.err (!%p6858_p7)
}
 0x29b   : > { %s6862_s21 = scalar_lea.vmem %s1120_s7, 16  ;;  %s7032_s16 = smov [#allocation35]  }
 0x29c   : > { %p6863_p3 = scmp.ne.s32.totalorder %s1120_s7, %s6862_s21  ;;  %s6866_s6 = sshll.u32 %s7032_s16, 4  ;;  %s6867_s6 = int_to_ptr.vmem [resolvable:$false] %s6866_s6 }
 0x29d   : > { %s6868_s3 = scalar_lea.vmem %s6867_s6, 32  ;;  %p6869_p10 = scmp.lt.s32.totalorder %s1120_s7, %s6867_s6 }
 0x29e   : > { %p6864_p4 = pnand %p6863_p3, %p8780_p0  ;;  %p6870_p9 = scmp.lt.s32.totalorder %s6868_s3, %s6862_s21 }
 0x2a0   : > { %p6865_p6 = pneg %p6864_p4  ;;  %p6871_p11 = por %p6870_p9, %p6869_p10 }
 0x2a2   : > { %p6872_p1 = pnand %p6871_p11, %p6865_p6 }
 0x2a4   : > { %6875 = shalt.err (!%p6872_p1)
}
 0x2a5   : > { %s8809_s11 = scalar_lea.sflag [#allocation34], %s7344_s0 }
 0x2a6   : > { %5884 = dma.hbm_to_vmem [thread:$0]  (%p8780_p0), %s7888_s29, 16, %s1120_s7, %s8809_s11  }
 0x2a7 PF: > { %s8810_s4 = sld [smem:[#allocation59_spill]] }
 0x2ad   : > { %p8811_p12 = scmp.ne.s32.totalorder %s8810_s4, 0 }
 0x2ae   : > { %s8812_s25 = sld [smem:[#allocation55_spill]] (!%p8811_p12) }
 0x2af   : > { %1128 = sbr.rel (%p8811_p12) target bundleno = 8344 (0x2098), region = 112 }
 0x2b4   : > { %p8813_p5 = scmp.eq.s32.totalorder (!%p8811_p12), %s8812_s25, 0 }
 0x2b6   : > { %6927 = dma.done.wait (%p8813_p5), [#allocation4], 256   ;;  %p8814_p8 = pmov %p8813_p5 }
 0x2b7   : > { %p8815_p2 = pmov %p8813_p5 }
 0x2b8   : > { %6929 = vsyncadd (%p8814_p8), [#allocation4], 4294967040 }
 0x2b9   : > { %6931 = dma.done.wait (%p8815_p2), [#allocation7], 288   ;;  %p8816_p13 = pmov %p8815_p2 }
 0x2ba   : > { %s8817_s27 = sld [smem:[#allocation53_spill]]  ;;  %s8818_s0 = sld [smem:[#allocation57_spill]] }
 0x2bb   : > { %6933 = vsyncadd (%p8816_p13), [#allocation7], 4294967008  ;;  %s7940_s29 = sand.u32 1, %s8812_s25  }
 0x2bc   : > { %s1143_s12 = scalar_lea.sflag [#allocation10], %s7940_s29 }
 0x2c0   : > { %s7943_s2 = sand.u32 1, %s8817_s27   ;;  %p8819_p0 = scmp.ne.s32.totalorder %s8818_s0, 0 }
 0x2c1   : > { %s5178_s7 = sshll.u32 %s7943_s2, 6 }
 0x2c2   : > { %s7947_s17 = scalar_lea.vmem [#allocation9], %s5178_s7 }
 0x2c3   : > { %6935 = dma.done.wait (%p8819_p0), %s1143_s12, 2048  }
 0x2c4   : > { %6937 = vsyncadd (%p8819_p0), %s1143_s12, 4294965248  ;;  %s7953_s9 = scalar_lea.vmem [#allocation11], %s5178_s7  ;;  %s1161_s28 = scalar_lea.sflag [#allocation13], %s7940_s29 }
 0x2c5   : > { %s7956_s30 = scalar_lea.vmem [#allocation12], %s5178_s7 }
 0x2c6   : > { %6939 = dma.done.wait (%p8819_p0), %s1161_s28, 2048  }
 0x2c7   : > { %6941 = vsyncadd (%p8819_p0), %s1161_s28, 4294965248  ;;  %s7962_s18 = scalar_lea.vmem [#allocation14], %s5178_s7  ;;  %s1179_s21 = scalar_lea.sflag [#allocation16], %s7940_s29 }
 0x2c8   : > { %6943 = dma.done.wait (%p8819_p0), %s1179_s21, 32  }
 0x2c9   : > { %6945 = vsyncadd (%p8819_p0), %s1179_s21, 4294967264  ;;  %s1195_s3 = scalar_lea.sflag [#allocation19], %s7940_s29  ;;  %s7972_s11 = scalar_lea.vmem [#allocation18], %s5178_s7 }
 0x2ca   : > { %6947 = dma.done.wait (%p8819_p0), %s1195_s3, 2048  }
 0x2cb   : > { %6949 = vsyncadd (%p8819_p0), %s1195_s3, 4294965248  ;;  %s7978_s4 = scalar_lea.vmem [#allocation20], %s5178_s7  ;;  %s1213_s27 = scalar_lea.sflag [#allocation22], %s7940_s29 }
 0x2cc   : > { %s7981_s12 = scalar_lea.vmem [#allocation21], %s5178_s7 }
 0x2cd   : > { %6951 = dma.done.wait (%p8819_p0), %s1213_s27, 2048  }
 0x2ce   : > { %6953 = vsyncadd (%p8819_p0), %s1213_s27, 4294965248  ;;  %s7987_s28 = scalar_lea.vmem [#allocation23], %s5178_s7  ;;  %s1231_s21 = scalar_lea.sflag [#allocation25], %s7940_s29 }
 0x2cf   : > { %6955 = dma.done.wait (%p8819_p0), %s1231_s21, 32  }
 0x2d0   : > { %6957 = vsyncadd (%p8819_p0), %s1231_s21, 4294967264  ;;  %s5186_s3 = sshll.u32 %s7943_s2, 7  ;;  %s1247_s8 = scalar_lea.sflag [#allocation28], %s7940_s29 }
 0x2d1   : > { %s7998_s27 = scalar_lea.vmem [#allocation27], %s5186_s3 }
 0x2d2   : > { %6959 = dma.done.wait (%p8819_p0), %s1247_s8, 2080  }
 0x2d3   : > { %6961 = vsyncadd (%p8819_p0), %s1247_s8, 4294965216  ;;  %s5187_s7 = sshll.u32 %s7943_s2, 1  ;;  %s1265_s21 = scalar_lea.sflag [#allocation31], %s7940_s29 }
 0x2d4   : > { %s8005_s6 = scalar_lea.vmem [#allocation29], %s5187_s7  ;;  %s8008_s10 = scalar_lea.vmem [#allocation30], %s5186_s3 }
 0x2d5   : > { %6963 = dma.done.wait (%p8819_p0), %s1265_s21, 2064  }
 0x2d6   : > { %6965 = vsyncadd (%p8819_p0), %s1265_s21, 4294965232  ;;  %s1276_s16 = scalar_lea.vmem [#allocation32], %s7943_s2  ;;  %s1282_s8 = scalar_lea.sflag [#allocation34], %s7940_s29 }
 0x2d7   : > { %s1284_s13 = scalar_lea.vmem [#allocation33], %s7943_s2 }
 0x2d8   : > { %6967 = dma.done.wait (%p8819_p0), %s1282_s8, 32  }
 0x2d9   : > { %6969 = vsyncadd (%p8819_p0), %s1282_s8, 4294967264  ;;  %s1292_s3 = scalar_lea.vmem [#allocation35], %s7943_s2  ;;  %p8820_p7 = pmov %p8815_p2 }
 0x2da   : > { %p8821_p3 = pmov %p8815_p2 }
 0x2db   : > { %6971 = dma.done.wait (%p8820_p7), [#allocation37], 32  }
 0x2dc   : > { %6973 = vsyncadd (%p8821_p3), [#allocation37], 4294967264  ;;  %s8822_s7 = sld [smem:[#allocation54_spill]] }
 0x2e2   : > { %p5191_p4 = scmp.ne.s32.totalorder %s8822_s7, 0 }
 0x2e3   : > { %v1445_v0 = vld [vmem:[#allocation3] sm:$0xff] (!%p5191_p4)  ;;  %v1446_v1 = vld [vmem:[#allocation3 + $0x8] sm:$0xff] (!%p5191_p4) }
 0x2e4   : > { %1444 = sbr.rel (%p5191_p4) target bundleno = 747 (0x2eb), region = 208  ;;  %1447 = vst [vmem:[#allocation2] sm:$0xff] (!%p5191_p4), %v1445_v0  ;;  %1448 = vst [vmem:[#allocation2 + $0x8] sm:$0xff] (!%p5191_p4), %v1446_v1 }
 0x2eb PF: > { %v1449_v2 = vld [vmem:[#allocation2] sm:$0xff]  ;;  %v1450_v3 = vld [vmem:[#allocation2 + $0x8] sm:$0xff]  ;;  %v6046_v4 = vld [vmem:[%s7947_s17] sm:$0xff]   ;;  %v7033_v7 = vmov 0.0   ;;  %vm7034_vm0 = vmmov 0   ;;  %s8823_s25 = scalar_lea.vmem [#allocation15], %s7943_s2 }
 0x2ec   : > { %1459 = vadd.xlane.f32.xlu0 %v1449_v2  ;;  %v6047_v5 = vld [vmem:[%s7953_s9] sm:$0xff]   ;;  %v6048_v6 = vld [vmem:[%s7947_s17 + $0x8] sm:$0xff]   ;;  %5505 = vmatprep.subr.bf16.mxu0 %v7033_v7  ;;  %v6050_v17 = vld [vmem:[%s7947_s17 + $0x10] sm:$0xff]   ;;  %s8824_s0 = scalar_lea.vmem [#allocation17], %s7943_s2  ;;  %vm1836_vm1 = vcmask 261120   ;;  %vm1957_vm2 = vcmask 1043456  }
 0x2ed   : > { %5525 = vmatprep.subr.bf16.mxu1 %v7033_v7  ;;  %5506 = vmatpush3.bf16.msra.mxu0 %v6046_v4  ;;  %v6049_v16 = vld [vmem:[%s7953_s9 + $0x8] sm:$0xff]   ;;  %v6051_v18 = vld [vmem:[%s7953_s9 + $0x10] sm:$0xff]   ;;  %v6052_v19 = vld [vmem:[%s7947_s17 + $0x18] sm:$0xff]   ;;  %vm1929_vm4 = vcmask 64512   ;;  %s7036_s29 = smov 96   ;;  %vm2739_vm5 = vcmask 523264  }
 0x2ee   : > { %5526 = vmatpush3.bf16.msra.mxu1 %v6047_v5  ;;  %5507 = vmatprep.subr.bf16.mxu0 %v7033_v7  ;;  %v6053_v20 = vld [vmem:[%s7953_s9 + $0x18] sm:$0xff]   ;;  %v6054_v21 = vld [vmem:[%s7947_s17 + $0x20] sm:$0xff]   ;;  %v6056_v23 = vld [vmem:[%s7947_s17 + $0x28] sm:$0xff]   ;;  %vm2742_vm6 = vcmask 785408  }
 0x2ef   : > { %5527 = vmatprep.subr.bf16.mxu1 %v7033_v7  ;;  %v6055_v22 = vld [vmem:[%s7953_s9 + $0x20] sm:$0xff]   ;;  %5521 = vmatprep.mubr.msk.bf16.mxu0 %vm7034_vm0, %v7033_v7  ;;  %v6057_v24 = vld [vmem:[%s7953_s9 + $0x28] sm:$0xff]   ;;  %v6058_v25 = vld [vmem:[%s7947_s17 + $0x30] sm:$0xff]  }
 0x2f0   : > { %1461 = vadd.xlane.f32.xlu0 %v1450_v3  ;;  %5541 = vmatprep.mubr.msk.bf16.mxu1 %vm7034_vm0, %v7033_v7  ;;  %v6059_v26 = vld [vmem:[%s7953_s9 + $0x30] sm:$0xff]   ;;  %v6060_v27 = vld [vmem:[%s7947_s17 + $0x38] sm:$0xff]   ;;  %v5192_v37 = vld [vmem:[%s8823_s25] ss:$0 sm:$0xff]  ;;  %s7037_s17 = smov 64  }
 0x2f1   : > { %5508 = vmatpush3.bf16.msra.mxu0 %v6048_v6  ;;  %v6061_v28 = vld [vmem:[%s7953_s9 + $0x38] sm:$0xff]   ;;  %v5193_v41 = vld [vmem:[%s8824_s0] ss:$0 sm:$0xff]  ;;  %v6062_v45 = vld [vmem:[%s7956_s30] sm:$0xff]   ;;  %s7038_s9 = smov 32  }
 0x2f2   : > { %5509 = vmatprep.subr.bf16.mxu0 %v7033_v7  ;;  %5528 = vmatpush3.bf16.msra.mxu1 %v6049_v16  ;;  %v6063_v47 = vld [vmem:[%s7956_s30 + $0x8] sm:$0xff]   ;;  %v6064_v48 = vld [vmem:[%s7956_s30 + $0x10] sm:$0xff]   ;;  %v6065_v49 = vld [vmem:[%s7956_s30 + $0x18] sm:$0xff]  }
 0x2f3   : > { %5529 = vmatprep.subr.bf16.mxu1 %v7033_v7  ;;  %v6066_v50 = vld [vmem:[%s7956_s30 + $0x20] sm:$0xff]   ;;  %v6067_v51 = vld [vmem:[%s7956_s30 + $0x28] sm:$0xff]   ;;  %v6068_v52 = vld [vmem:[%s7956_s30 + $0x30] sm:$0xff]  }
 0x2f4   : > { %v6069_v53 = vld [vmem:[%s7956_s30 + $0x38] sm:$0xff]   ;;  %s8825_s30 = scalar_lea.vmem [#allocation24], %s7943_s2 }
 0x2f5   : > { %5510 = vmatpush3.bf16.msra.mxu0 %v6050_v17 }
 0x2f6   : > { %5530 = vmatpush3.bf16.msra.mxu1 %v6051_v18  ;;  %5511 = vmatprep.subr.bf16.mxu0 %v7033_v7 }
 0x2f7   : > { %5531 = vmatprep.subr.bf16.mxu1 %v7033_v7 }
 0x2f9   : > { %5512 = vmatpush3.bf16.msra.mxu0 %v6052_v19 }
 0x2fa   : > { %5532 = vmatpush3.bf16.msra.mxu1 %v6053_v20  ;;  %5513 = vmatprep.subr.bf16.mxu0 %v7033_v7 }
 0x2fb   : > { %5533 = vmatprep.subr.bf16.mxu1 %v7033_v7 }
 0x2fd   : > { %5514 = vmatpush3.bf16.msra.mxu0 %v6054_v21 }
 0x2fe   : > { %5534 = vmatpush3.bf16.msra.mxu1 %v6055_v22  ;;  %5515 = vmatprep.subr.bf16.mxu0 %v7033_v7 }
 0x2ff   : > { %5535 = vmatprep.subr.bf16.mxu1 %v7033_v7 }
 0x301   : > { %5516 = vmatpush3.bf16.msra.mxu0 %v6056_v23 }
 0x302   : > { %5536 = vmatpush3.bf16.msra.mxu1 %v6057_v24  ;;  %5517 = vmatprep.subr.bf16.mxu0 %v7033_v7 }
 0x303   : > { %5537 = vmatprep.subr.bf16.mxu1 %v7033_v7 }
 0x305   : > { %5518 = vmatpush3.bf16.msra.mxu0 %v6058_v25 }
 0x306   : > { %5538 = vmatpush3.bf16.msra.mxu1 %v6059_v26  ;;  %5519 = vmatprep.subr.bf16.mxu0 %v7033_v7 }
 0x307   : > { %5539 = vmatprep.subr.bf16.mxu1 %v7033_v7 }
 0x309   : > { %5520 = vmatpush3.bf16.msra.mxu0 %v6060_v27 }
 0x30a   : > { %5540 = vmatpush3.bf16.msra.mxu1 %v6061_v28  ;;  %5545 = vmatprep.subr.bf16.mxu0 %v7033_v7 }
 0x30b   : > { %5565 = vmatprep.subr.bf16.mxu1 %v7033_v7 }
 0x379   : > { %v1460_v8 = vpop.xlane.xlu0 %1459 }
 0x37a   : > { %v1464_v9 = vmul.f32 0.0078125, %v1460_v8 }
 0x37c   : > { %v1466_v10 = vsub.f32 %v1449_v2, %v1464_v9 }
 0x37d   : > { %v1462_v11 = vpop.xlane.xlu0 %1461 }
 0x37e   : > { %v1465_v12 = vmul.f32 0.0078125, %v1462_v11  ;;  %v1468_v13 = vmul.f32 %v1466_v10, %v1466_v10  ;;  %v1451_v11 = vlaneseq }
 0x380   : > { %v1467_v14 = vsub.f32 %v1450_v3, %v1465_v12  ;;  %1470 = vadd.xlane.f32.xlu1 %v1468_v13  ;;  %v8118_v12 = vshrl.u32 %v1451_v11, 7  ;;  %v1454_v13 = vand.u32 127, %v1451_v11 }
 0x382   : > { %v1469_v15 = vmul.f32 %v1467_v14, %v1467_v14  ;;  %vm1455_vm3 = vcmp.le.s32.totalorder %v1454_v13, %v8118_v12 }
 0x384   : > { %1472 = vadd.xlane.f32.xlu1 %v1469_v15 }
 0x40d   : > { %v1471_v29 = vpop.xlane.xlu1 %1470 }
 0x40e   : > { %v1474_v30 = vmul.f32 0.0078125, %v1471_v29 }
 0x410   : > { %v1476_v31 = vadd.f32 1e-05, %v1474_v30 }
 0x411   : > { %v1473_v32 = vpop.xlane.xlu1 %1472 }
 0x412   : > { %6150 = vrsqrt.f32 %v1476_v31  ;;  %v1475_v33 = vmul.f32 0.0078125, %v1473_v32 }
 0x414   : > { %v1477_v34 = vadd.f32 1e-05, %v1475_v33 }
 0x416   : > { %6152 = vrsqrt.f32 %v1477_v34 }
 0x41c   : > { %v6151_v35 = vpop.eup %6150 }
 0x41d   : > { %v1480_v36 = vmul.f32 %v6151_v35, %v1466_v10 }
 0x41f   : > { %v1488_v40 = vmul.f32 %v5192_v37, %v1480_v36 }
 0x420   : > { %v6153_v38 = vpop.eup %6152 }
 0x421   : > { %v1481_v39 = vmul.f32 %v6153_v38, %v1467_v14  ;;  %v1496_v43 = vadd.f32 %v5193_v41, %v1488_v40  ;;  %v7035_v14 = vmov -1e+09  }
 0x422   : > { %v8121_v15 = vsel %vm1455_vm3, 0.0, %v7035_v14 }
 0x423   : > { %v1489_v42 = vmul.f32 %v5192_v37, %v1481_v39 }
 0x425   : > { %v1497_v44 = vadd.f32 %v5193_v41, %v1489_v42 }
 0x427   : > { %v1562_v46 = vpack.c.bf16 %v1497_v44, %v1496_v43 }
 0x429   : > { %5522 = vmatmul.mubr.bf16.vlgmr.msra.gmra.mrb[0].mxu0 %v1562_v46  ;;  %5542 = vmatmul.mubr.bf16.vlgmr.msra.gmra.mrb[0].mxu1 %v1562_v46 }
 0x42a   : > { %5546 = vmatpush3.bf16.msra.mxu0 %v6062_v45  ;;  %5561 = vmatprep.mubr.msk.bf16.mxu0 %vm7034_vm0, %v7033_v7 }
 0x42b   : > { %5547 = vmatprep.subr.bf16.mxu0 %v7033_v7  ;;  %5567 = vmatprep.mubr.msk.bf16.mxu1 %vm7034_vm0, %v7033_v7 }
 0x42e   : > { %5548 = vmatpush3.bf16.msra.mxu0 %v6063_v47 }
 0x42f   : > { %5549 = vmatprep.subr.bf16.mxu0 %v7033_v7 }
 0x432   : > { %5550 = vmatpush3.bf16.msra.mxu0 %v6064_v48 }
 0x433   : > { %5551 = vmatprep.subr.bf16.mxu0 %v7033_v7 }
 0x436   : > { %5552 = vmatpush3.bf16.msra.mxu0 %v6065_v49 }
 0x437   : > { %5553 = vmatprep.subr.bf16.mxu0 %v7033_v7 }
 0x43a   : > { %5554 = vmatpush3.bf16.msra.mxu0 %v6066_v50 }
 0x43b   : > { %5555 = vmatprep.subr.bf16.mxu0 %v7033_v7 }
 0x43e   : > { %5556 = vmatpush3.bf16.msra.mxu0 %v6067_v51 }
 0x43f   : > { %5557 = vmatprep.subr.bf16.mxu0 %v7033_v7 }
 0x442   : > { %5558 = vmatpush3.bf16.msra.mxu0 %v6068_v52 }
 0x443   : > { %5559 = vmatprep.subr.bf16.mxu0 %v7033_v7 }
 0x446   : > { %5560 = vmatpush3.bf16.msra.mxu0 %v6069_v53 }
 0x447   : > { %5613 = vmatprep.subr.bf16.mxu0 %v7033_v7 }
 0x449   : > { %5562 = vmatmul.mubr.bf16.vlgmr.msra.gmra.mrb[4].mxu0 %v1562_v46 }
 0x44a   : > { %5615 = vmatprep.mubr.msk.bf16.mxu0 %vm7034_vm0, %v7033_v7 }
 0x4fc   : > { %v1645_v54 = vpop.f32.mrb[0].mxu0  ;;  %v1734_v55 = vpop.f32.mrb[0].mxu1 }
 0x4fd   : > { %v8091_v56 = vpack.c.bf16 %v1734_v55, %v1734_v55  ;;  %v5523_v57 = vpop.f32.mrb[1].mxu0  ;;  %v5543_v58 = vpop.f32.mrb[1].mxu1  ;;  %v8098_v1 = vpack.c.bf16 %v1645_v54, %v1645_v54 }
 0x4fe   : > { %v1648_v59 = vpop.f32.mrb[2].mxu0  ;;  %v1737_v60 = vpop.f32.mrb[2].mxu1 }
 0x4ff   : > { %v5524_v61 = vpop.f32.mrb[3].mxu0  ;;  %v5544_v62 = vpop.f32.mrb[3].mxu1  ;;  %v1841_v63 = vsel %vm1836_vm1, %v8091_v56, 0  ;;  %v8096_v0 = vpack.c.bf16 %v1737_v60, %v1737_v60  ;;  %v8107_v3 = vpack.c.bf16 %v1648_v59, %v1648_v59 }
 0x500   : > { %5566 = vmatpush3.bf16.xpose.msra.mxu1 %v1841_v63 }
 0x501   : > { %5571 = vmatprep.subr.bf16.mxu1 %v7033_v7  ;;  %v1887_v2 = vsel %vm1836_vm1, %v8096_v0, 0 }
 0x507   : > { %5568 = vmatmul.mubr.msk.bf16.vlgmr.msra.gmra.mrb[4].mxu1 %vm1836_vm1, %v8098_v1 }
 0x508   : > { %5572 = vmatpush3.bf16.xpose.msra.mxu1 %v1887_v2  ;;  %5573 = vmatprep.mubr.msk.bf16.mxu1 %vm7034_vm0, %v7033_v7 }
 0x509   : > { %5577 = vmatprep.subr.bf16.mxu1 %v7033_v7 }
 0x50f   : > { %5574 = vmatmul.mubr.msk.bf16.vlgmr.msra.gmra.mrb[8].mxu1 %vm1836_vm1, %v8107_v3 }
 0x510   : > { %5579 = vmatprep.mubr.msk.bf16.mxu1 %vm7034_vm0, %v7033_v7 }
 0x51c   : > { %v1823_v4 = vpop.f32.mrb[4].mxu0 }
 0x51d   : > { %v8113_v5 = vpack.c.bf16 %v1823_v4, %v1823_v4  ;;  %v5563_v6 = vpop.f32.mrb[5].mxu0 }
 0x51e   : > { %v1826_v8 = vpop.f32.mrb[6].mxu0 }
 0x51f   : > { %v5564_v9 = vpop.f32.mrb[7].mxu0  ;;  %v1959_v10 = vsel %vm1957_vm2, %v8113_v5, 0  ;;  %v8137_v41 = vpack.c.bf16 %v1826_v8, %v1826_v8 }
 0x520   : > { %5578 = vmatpush3.bf16.msra.mxu1 %v1959_v10 }
 0x521   : > { %5583 = vmatprep.subr.bf16.mxu1 %v7033_v7  ;;  %v2005_v44 = vsel %vm1957_vm2, %v8137_v41, 0 }
 0x5da   : > { %v1877_v16 = vpop.f32.mrb[4].mxu1 }
 0x5db   : > { %v1878_v17 = vadd.f32 %v1877_v16, %v8121_v15  ;;  %v5569_v18 = vpop.f32.mrb[5].mxu1 }
 0x5dc   : > { %v1880_v19 = vpop.f32.mrb[6].mxu1 }
 0x5dd   : > { %v5570_v20 = vpop.f32.mrb[7].mxu1  ;;  %v1930_v21 = vsel %vm1929_vm4, %v1878_v17, -inf }
 0x5de   : > { %1931 = vmax.xlane.f32.xlu0 %v1930_v21 }
 0x5e2   : > { %v1923_v22 = vpop.f32.mrb[8].mxu1 }
 0x5e3   : > { %v1924_v23 = vadd.f32 %v1923_v22, %v8121_v15  ;;  %v5575_v24 = vpop.f32.mrb[9].mxu1 }
 0x5e4   : > { %v1926_v25 = vpop.f32.mrb[10].mxu1 }
 0x5e5   : > { %v5576_v26 = vpop.f32.mrb[11].mxu1  ;;  %v1933_v27 = vsel %vm1929_vm4, %v1924_v23, -inf }
 0x5e6   : > { %1934 = vmax.xlane.f32.xlu1 %v1933_v27 }
 0x66b   : > { %v1932_v28 = vpop.xlane.xlu0 %1931 }
 0x66c   : > { %v1936_v29 = vsub.f32 %v1878_v17, %v1932_v28 }
 0x66e   : > { %v1938_v30 = vmul.f32 1.442695, %v1936_v29 }
 0x670   : > { %6154 = vpow2.f32 %v1938_v30 }
 0x673   : > { %v1935_v31 = vpop.xlane.xlu1 %1934 }
 0x674   : > { %v1937_v32 = vsub.f32 %v1924_v23, %v1935_v31 }
 0x676   : > { %v1940_v33 = vmul.f32 1.442695, %v1937_v32 }
 0x678   : > { %6156 = vpow2.f32 %v1940_v33 }
 0x67a   : > { %v6155_v34 = vpop.eup %6154 }
 0x67b   : > { %v1942_v35 = vsel %vm1929_vm4, %v6155_v34, 0.0 }
 0x67c   : > { %1943 = vadd.xlane.f32.xlu0 %v1942_v35 }
 0x682   : > { %v6157_v36 = vpop.eup %6156 }
 0x683   : > { %v1945_v37 = vsel %vm1929_vm4, %v6157_v36, 0.0 }
 0x684   : > { %1946 = vadd.xlane.f32.xlu1 %v1945_v37 }
 0x692   : > { %2051 = vrot.lane.b32.xlu0 %v8091_v56, %s7036_s29 }
 0x695   : > { %2048 = vrot.lane.b32.xlu1 %v8098_v1, %s7036_s29 }
 0x699   : > { %2103 = vrot.lane.b32.xlu1 %v8096_v0, %s7036_s29 }
 0x69d   : > { %2100 = vrot.lane.b32.xlu1 %v8107_v3, %s7036_s29 }
 0x709   : > { %v1944_v38 = vpop.xlane.xlu0 %1943 }
 0x70a   : > { %6158 = vrcp.f32 %v1944_v38 }
 0x70d   : > { %v2052_v47 = vpop.permute.xlu0 %2051 }
 0x70e   : > { %v2057_v50 = vsel %vm1836_vm1, %v2052_v47, 0 }
 0x711   : > { %v1947_v39 = vpop.xlane.xlu1 %1946 }
 0x712   : > { %6160 = vrcp.f32 %v1947_v39 }
 0x714   : > { %v6159_v40 = vpop.eup %6158 }
 0x715   : > { %v1950_v42 = vmul.f32 %v6159_v40, %v6155_v34  ;;  %v2049_v49 = vpop.permute.xlu1 %2048 }
 0x717   : > { %v1952_v43 = vpack.c.bf16 %v1950_v42, %v1950_v42 }
 0x719   : > { %5580 = vmatmul.mubr.msk.bf16.vlgmr.msra.gmra.mrb[12].mxu1 %vm1929_vm4, %v1952_v43  ;;  %v2104_v51 = vpop.permute.xlu1 %2103 }
 0x71a   : > { %5584 = vmatpush3.bf16.msra.mxu1 %v2005_v44  ;;  %5585 = vmatprep.mubr.msk.bf16.mxu1 %vm7034_vm0, %v7033_v7  ;;  %v2109_v52 = vsel %vm1836_vm1, %v2104_v51, 0 }
 0x71b   : > { %5589 = vmatprep.subr.bf16.mxu1 %v7033_v7 }
 0x71c   : > { %v6161_v45 = vpop.eup %6160 }
 0x71d   : > { %v1951_v46 = vmul.f32 %v6161_v45, %v6157_v36  ;;  %v2101_v53 = vpop.permute.xlu1 %2100 }
 0x71f   : > { %v1953_v48 = vpack.c.bf16 %v1951_v46, %v1951_v46 }
 0x721   : > { %5586 = vmatmul.mubr.msk.bf16.vlgmr.msra.gmra.mrb[16].mxu1 %vm1929_vm4, %v1953_v48 }
 0x722   : > { %5591 = vmatprep.mubr.msk.bf16.mxu1 %vm7034_vm0, %v7033_v7 }
 0x723   : > { %5590 = vmatpush3.bf16.xpose.msra.mxu1 %v2057_v50 }
 0x724   : > { %5595 = vmatprep.subr.bf16.mxu1 %v7033_v7 }
 0x72a   : > { %5592 = vmatmul.mubr.msk.bf16.vlgmr.msra.gmra.mrb[20].mxu1 %vm1836_vm1, %v2049_v49 }
 0x72b   : > { %5596 = vmatpush3.bf16.xpose.msra.mxu1 %v2109_v52  ;;  %5597 = vmatprep.mubr.msk.bf16.mxu1 %vm7034_vm0, %v7033_v7 }
 0x72c   : > { %5601 = vmatprep.subr.bf16.mxu1 %v7033_v7 }
 0x732   : > { %5598 = vmatmul.mubr.msk.bf16.vlgmr.msra.gmra.mrb[24].mxu1 %vm1836_vm1, %v2101_v53 }
 0x733   : > { %5603 = vmatprep.mubr.msk.bf16.mxu1 %vm7034_vm0, %v7033_v7 }
 0x7ec   : > { %v8158_v54 = vpop.f32.mrb[12].mxu1 }
 0x7ed   : > { %v5581_v55 = vpop.f32.mrb[13].mxu1 }
 0x7ee   : > { %v1998_v57 = vpop.f32.mrb[14].mxu1 }
 0x7ef   : > { %v5582_v58 = vpop.f32.mrb[15].mxu1 }
 0x7f4   : > { %v8160_v59 = vpop.f32.mrb[16].mxu1 }
 0x7f5   : > { %v5587_v60 = vpop.f32.mrb[17].mxu1 }
 0x7f6   : > { %v2044_v61 = vpop.f32.mrb[18].mxu1 }
 0x7f7   : > { %v5588_v62 = vpop.f32.mrb[19].mxu1 }
 0x7fd   : > { %v2093_v63 = vpop.f32.mrb[20].mxu1 }
 0x7fe   : > { %v2094_v2 = vadd.f32 %v2093_v63, %v8121_v15  ;;  %v5593_v4 = vpop.f32.mrb[21].mxu1 }
 0x7ff   : > { %v2096_v6 = vpop.f32.mrb[22].mxu1 }
 0x800   : > { %v5594_v8 = vpop.f32.mrb[23].mxu1  ;;  %v2151_v9 = vsel %vm1929_vm4, %v2094_v2, -inf }
 0x801   : > { %2152 = vmax.xlane.f32.xlu0 %v2151_v9 }
 0x805   : > { %v2145_v10 = vpop.f32.mrb[24].mxu1 }
 0x806   : > { %v2146_v11 = vadd.f32 %v2145_v10, %v8121_v15  ;;  %v5599_v13 = vpop.f32.mrb[25].mxu1 }
 0x807   : > { %v2148_v14 = vpop.f32.mrb[26].mxu1 }
 0x808   : > { %v5600_v16 = vpop.f32.mrb[27].mxu1  ;;  %v2154_v17 = vsel %vm1929_vm4, %v2146_v11, -inf }
 0x809   : > { %2155 = vmax.xlane.f32.xlu1 %v2154_v17 }
 0x81a   : > { %2225 = vrot.lane.b32.xlu1 %v8137_v41, %s7036_s29 }
 0x81e   : > { %2275 = vrot.lane.b32.xlu1 %v8091_v56, %s7037_s17 }
 0x822   : > { %2325 = vrot.lane.b32.xlu1 %v8096_v0, %s7037_s17 }
 0x826   : > { %2323 = vrot.lane.b32.xlu1 %v8107_v3, %s7037_s17 }
 0x88e   : > { %v2153_v18 = vpop.xlane.xlu0 %2152 }
 0x88f   : > { %v2157_v19 = vsub.f32 %v2094_v2, %v2153_v18 }
 0x891   : > { %v2159_v20 = vmul.f32 1.442695, %v2157_v19 }
 0x893   : > { %6162 = vpow2.f32 %v2159_v20 }
 0x896   : > { %v2156_v21 = vpop.xlane.xlu1 %2155 }
 0x897   : > { %v2158_v22 = vsub.f32 %v2146_v11, %v2156_v21 }
 0x899   : > { %v2161_v23 = vmul.f32 1.442695, %v2158_v22 }
 0x89a   : > { %v2226_v24 = vpop.permute.xlu1 %2225 }
 0x89b   : > { %6164 = vpow2.f32 %v2161_v23  ;;  %v2231_v39 = vsel %vm1957_vm2, %v2226_v24, 0 }
 0x89d   : > { %v6163_v25 = vpop.eup %6162 }
 0x89e   : > { %v2276_v26 = vpop.permute.xlu1 %2275  ;;  %v2163_v27 = vsel %vm1929_vm4, %v6163_v25, 0.0 }
 0x89f   : > { %v2281_v28 = vsel %vm1836_vm1, %v2276_v26, 0  ;;  %2164 = vadd.xlane.f32.xlu0 %v2163_v27 }
 0x8a0   : > { %5614 = vmatpush3.bf16.xpose.msra.mxu0 %v2281_v28 }
 0x8a1   : > { %5625 = vmatprep.subr.bf16.mxu0 %v7033_v7 }
 0x8a2   : > { %v2326_v44 = vpop.permute.xlu1 %2325 }
 0x8a3   : > { %v2331_v45 = vsel %vm1836_vm1, %v2326_v44, 0 }
 0x8a5   : > { %v6165_v29 = vpop.eup %6164 }
 0x8a6   : > { %v2166_v30 = vsel %vm1929_vm4, %v6165_v29, 0.0  ;;  %v2324_v46 = vpop.permute.xlu1 %2323 }
 0x8a7   : > { %2167 = vadd.xlane.f32.xlu0 %v2166_v30 }
 0x8bd   : > { %2176 = vrot.lane.b32.xlu0 %v8113_v5, %s7036_s29 }
 0x8c1   : > { %2273 = vrot.lane.b32.xlu0 %v8098_v1, %s7037_s17 }
 0x92c   : > { %v2165_v31 = vpop.xlane.xlu0 %2164 }
 0x92d   : > { %6166 = vrcp.f32 %v2165_v31 }
 0x934   : > { %v2168_v32 = vpop.xlane.xlu0 %2167 }
 0x935   : > { %6168 = vrcp.f32 %v2168_v32 }
 0x937   : > { %v6167_v33 = vpop.eup %6166 }
 0x938   : > { %v2171_v34 = vmul.f32 %v6167_v33, %v6163_v25  ;;  %v2177_v35 = vpop.permute.xlu0 %2176 }
 0x939   : > { %v2182_v36 = vsel %vm1957_vm2, %v2177_v35, 0 }
 0x93a   : > { %5602 = vmatpush3.bf16.msra.mxu1 %v2182_v36  ;;  %v2173_v37 = vpack.c.bf16 %v2171_v34, %v2171_v34 }
 0x93b   : > { %5607 = vmatprep.subr.bf16.mxu1 %v7033_v7 }
 0x93c   : > { %v2274_v38 = vpop.permute.xlu0 %2273 }
 0x93d   : > { %5604 = vmatmul.mubr.msk.bf16.vlgmr.msra.gmra.mrb[28].mxu1 %vm1929_vm4, %v2173_v37  ;;  %5616 = vmatmul.mubr.msk.bf16.vlgmr.msra.gmra.mrb[8].mxu0 %vm1836_vm1, %v2274_v38 }
 0x93e   : > { %5608 = vmatpush3.bf16.msra.mxu1 %v2231_v39  ;;  %5609 = vmatprep.mubr.msk.bf16.mxu1 %vm7034_vm0, %v7033_v7 }
 0x93f   : > { %v6169_v40 = vpop.eup %6168  ;;  %5619 = vmatprep.subr.bf16.mxu1 %v7033_v7  ;;  %5627 = vmatprep.mubr.msk.bf16.mxu0 %vm7034_vm0, %v7033_v7 }
 0x940   : > { %v2172_v42 = vmul.f32 %v6169_v40, %v6165_v29 }
 0x942   : > { %v2174_v43 = vpack.c.bf16 %v2172_v42, %v2172_v42 }
 0x945   : > { %5610 = vmatmul.mubr.msk.bf16.vlgmr.msra.gmra.mrb[32].mxu1 %vm1929_vm4, %v2174_v43 }
 0x946   : > { %5621 = vmatprep.mubr.msk.bf16.mxu1 %vm7034_vm0, %v7033_v7 }
 0x947   : > { %5620 = vmatpush3.bf16.xpose.msra.mxu1 %v2331_v45 }
 0x948   : > { %5631 = vmatprep.subr.bf16.mxu1 %v7033_v7 }
 0x94e   : > { %5622 = vmatmul.mubr.msk.bf16.vlgmr.msra.gmra.mrb[36].mxu1 %vm1836_vm1, %v2324_v46 }
 0x94f   : > { %5633 = vmatprep.mubr.msk.bf16.mxu1 %vm7034_vm0, %v7033_v7 }
 0xa10   : > { %v8200_v47 = vpop.f32.mrb[28].mxu1  ;;  %v2317_v48 = vpop.f32.mrb[8].mxu0 }
 0xa11   : > { %v2318_v49 = vadd.f32 %v2317_v48, %v8121_v15  ;;  %v5605_v50 = vpop.f32.mrb[29].mxu1  ;;  %v5617_v51 = vpop.f32.mrb[9].mxu0 }
 0xa12   : > { %v2221_v52 = vpop.f32.mrb[30].mxu1  ;;  %v2320_v53 = vpop.f32.mrb[10].mxu0 }
 0xa13   : > { %v5606_v55 = vpop.f32.mrb[31].mxu1  ;;  %v5618_v57 = vpop.f32.mrb[11].mxu0  ;;  %v2373_v58 = vsel %vm1929_vm4, %v2318_v49, -inf }
 0xa14   : > { %2374 = vmax.xlane.f32.xlu0 %v2373_v58 }
 0xa18   : > { %v8204_v60 = vpop.f32.mrb[32].mxu1 }
 0xa19   : > { %v6016_v61 = vpack.i.bf16 %v8204_v60, %v8200_v47  ;;  %v5611_v62 = vpop.f32.mrb[33].mxu1 }
 0xa1a   : > { %v2270_v63 = vpop.f32.mrb[34].mxu1 }
 0xa1b   : > { %v5612_v2 = vpop.f32.mrb[35].mxu1 }
 0xa21   : > { %v2367_v4 = vpop.f32.mrb[36].mxu1 }
 0xa22   : > { %v2368_v6 = vadd.f32 %v2367_v4, %v8121_v15  ;;  %v5623_v8 = vpop.f32.mrb[37].mxu1 }
 0xa23   : > { %v2370_v9 = vpop.f32.mrb[38].mxu1 }
 0xa24   : > { %v5624_v10 = vpop.f32.mrb[39].mxu1  ;;  %v2376_v11 = vsel %vm1929_vm4, %v2368_v6, -inf }
 0xa25   : > { %2377 = vmax.xlane.f32.xlu1 %v2376_v11 }
 0xa36   : > { %2445 = vrot.lane.b32.xlu1 %v8137_v41, %s7037_s17 }
 0xa3a   : > { %2495 = vrot.lane.b32.xlu1 %v8091_v56, %s7038_s9 }
 0xa3e   : > { %2545 = vrot.lane.b32.xlu1 %v8096_v0, %s7038_s9 }
 0xa42   : > { %2543 = vrot.lane.b32.xlu1 %v8107_v3, %s7038_s9 }
 0xaa1   : > { %v2375_v13 = vpop.xlane.xlu0 %2374 }
 0xaa2   : > { %v2379_v14 = vsub.f32 %v2318_v49, %v2375_v13 }
 0xaa4   : > { %v2381_v16 = vmul.f32 1.442695, %v2379_v14 }
 0xaa6   : > { %6170 = vpow2.f32 %v2381_v16 }
 0xab0   : > { %v6171_v17 = vpop.eup %6170 }
 0xab1   : > { %v2385_v18 = vsel %vm1929_vm4, %v6171_v17, 0.0 }
 0xab2   : > { %v2378_v19 = vpop.xlane.xlu1 %2377  ;;  %2386 = vadd.xlane.f32.xlu0 %v2385_v18 }
 0xab3   : > { %v2380_v20 = vsub.f32 %v2368_v6, %v2378_v19 }
 0xab5   : > { %v2383_v21 = vmul.f32 1.442695, %v2380_v20 }
 0xab6   : > { %v2446_v22 = vpop.permute.xlu1 %2445 }
 0xab7   : > { %6172 = vpow2.f32 %v2383_v21  ;;  %v2451_v56 = vsel %vm1957_vm2, %v2446_v22, 0 }
 0xab8   : > { %5632 = vmatpush3.bf16.msra.mxu1 %v2451_v56 }
 0xab9   : > { %5643 = vmatprep.subr.bf16.mxu1 %v7033_v7 }
 0xaba   : > { %v2496_v29 = vpop.permute.xlu1 %2495 }
 0xabb   : > { %v2501_v33 = vsel %vm1836_vm1, %v2496_v29, 0  ;;  %v6077_v29 = vld [vmem:[%s7962_s18 + $0x38] sm:$0xff]  }
 0xabe   : > { %v2546_v32 = vpop.permute.xlu1 %2545 }
 0xabf   : > { %v2551_v35 = vsel %vm1836_vm1, %v2546_v32, 0 }
 0xac1   : > { %v6173_v0 = vpop.eup %6172 }
 0xac2   : > { %v2388_v3 = vsel %vm1929_vm4, %v6173_v0, 0.0  ;;  %v2544_v37 = vpop.permute.xlu1 %2543 }
 0xac3   : > { %2389 = vadd.xlane.f32.xlu0 %v2388_v3  ;;  %v6070_v3 = vld [vmem:[%s7962_s18] sm:$0xff]  }
 0xad9   : > { %2397 = vrot.lane.b32.xlu0 %v8113_v5, %s7037_s17 }
 0xadd   : > { %2493 = vrot.lane.b32.xlu0 %v8098_v1, %s7038_s9 }
 0xb3f   : > { %v2387_v23 = vpop.xlane.xlu0 %2386 }
 0xb40   : > { %6174 = vrcp.f32 %v2387_v23  ;;  %v6071_v23 = vld [vmem:[%s7962_s18 + $0x8] sm:$0xff]  }
 0xb4a   : > { %v6175_v24 = vpop.eup %6174 }
 0xb4b   : > { %v2393_v26 = vmul.f32 %v6175_v24, %v6171_v17  ;;  %v6072_v24 = vld [vmem:[%s7962_s18 + $0x10] sm:$0xff]  }
 0xb4d   : > { %v2395_v30 = vpack.c.bf16 %v2393_v26, %v2393_v26  ;;  %v6074_v26 = vld [vmem:[%s7962_s18 + $0x20] sm:$0xff]  }
 0xb50   : > { %v2390_v25 = vpop.xlane.xlu0 %2389 }
 0xb51   : > { %6176 = vrcp.f32 %v2390_v25  ;;  %v6073_v25 = vld [vmem:[%s7962_s18 + $0x18] sm:$0xff]  }
 0xb54   : > { %v2398_v27 = vpop.permute.xlu0 %2397 }
 0xb55   : > { %v2403_v28 = vsel %vm1957_vm2, %v2398_v27, 0  ;;  %v6075_v27 = vld [vmem:[%s7962_s18 + $0x28] sm:$0xff]  }
 0xb56   : > { %5626 = vmatpush3.bf16.msra.mxu0 %v2403_v28  ;;  %v6076_v28 = vld [vmem:[%s7962_s18 + $0x30] sm:$0xff]   ;;  %s8826_s18 = scalar_lea.vmem [#allocation26], %s7943_s2 }
 0xb57   : > { %5637 = vmatprep.subr.bf16.mxu0 %v7033_v7 }
 0xb58   : > { %v2494_v36 = vpop.permute.xlu0 %2493 }
 0xb59   : > { %5628 = vmatmul.mubr.msk.bf16.vlgmr.msra.gmra.mrb[12].mxu0 %vm1929_vm4, %v2395_v30 }
 0xb5a   : > { %5639 = vmatprep.mubr.msk.bf16.mxu0 %vm7034_vm0, %v7033_v7 }
 0xb5b   : > { %v6177_v1 = vpop.eup %6176 }
 0xb5c   : > { %v2394_v31 = vmul.f32 %v6177_v1, %v6173_v0 }
 0xb5e   : > { %v2396_v34 = vpack.c.bf16 %v2394_v31, %v2394_v31 }
 0xb5f   : > { %5638 = vmatpush3.bf16.xpose.msra.mxu0 %v2501_v33 }
 0xb60   : > { %5634 = vmatmul.mubr.msk.bf16.vlgmr.msra.gmra.mrb[40].mxu1 %vm1929_vm4, %v2396_v34  ;;  %5649 = vmatprep.subr.bf16.mxu0 %v7033_v7 }
 0xb61   : > { %5644 = vmatpush3.bf16.xpose.msra.mxu1 %v2551_v35  ;;  %5645 = vmatprep.mubr.msk.bf16.mxu1 %vm7034_vm0, %v7033_v7 }
 0xb62   : > { %5655 = vmatprep.subr.bf16.mxu1 %v7033_v7 }
 0xb66   : > { %5640 = vmatmul.mubr.msk.bf16.vlgmr.msra.gmra.mrb[16].mxu0 %vm1836_vm1, %v2494_v36 }
 0xb67   : > { %5651 = vmatprep.mubr.msk.bf16.mxu0 %vm7034_vm0, %v7033_v7 }
 0xb68   : > { %5646 = vmatmul.mubr.msk.bf16.vlgmr.msra.gmra.mrb[44].mxu1 %vm1836_vm1, %v2544_v37 }
 0xb69   : > { %5657 = vmatprep.mubr.msk.bf16.mxu1 %vm7034_vm0, %v7033_v7 }
 0xc2c   : > { %v2439_v38 = vpop.f32.mrb[12].mxu0 }
 0xc2d   : > { %v5629_v39 = vpop.f32.mrb[13].mxu0 }
 0xc2e   : > { %v2442_v40 = vpop.f32.mrb[14].mxu0 }
 0xc2f   : > { %v5630_v42 = vpop.f32.mrb[15].mxu0 }
 0xc33   : > { %v2487_v43 = vpop.f32.mrb[40].mxu1 }
 0xc34   : > { %v6021_v44 = vpack.i.bf16 %v2487_v43, %v2439_v38  ;;  %v5635_v45 = vpop.f32.mrb[41].mxu1 }
 0xc35   : > { %v2490_v46 = vpop.f32.mrb[42].mxu1 }
 0xc36   : > { %v5636_v48 = vpop.f32.mrb[43].mxu1 }
 0xc39   : > { %v2537_v49 = vpop.f32.mrb[16].mxu0 }
 0xc3a   : > { %v2538_v50 = vadd.f32 %v2537_v49, %v8121_v15  ;;  %v5641_v51 = vpop.f32.mrb[17].mxu0 }
 0xc3b   : > { %v2540_v52 = vpop.f32.mrb[18].mxu0  ;;  %v2587_v53 = vpop.f32.mrb[44].mxu1 }
 0xc3c   : > { %v2588_v55 = vadd.f32 %v2587_v53, %v8121_v15  ;;  %v5642_v57 = vpop.f32.mrb[19].mxu0  ;;  %v5647_v58 = vpop.f32.mrb[45].mxu1  ;;  %v2593_v62 = vsel %vm1929_vm4, %v2538_v50, -inf }
 0xc3d   : > { %v2590_v63 = vpop.f32.mrb[46].mxu1  ;;  %2594 = vmax.xlane.f32.xlu0 %v2593_v62 }
 0xc3e   : > { %v5648_v2 = vpop.f32.mrb[47].mxu1  ;;  %v2596_v4 = vsel %vm1929_vm4, %v2588_v55, -inf }
 0xc3f   : > { %2597 = vmax.xlane.f32.xlu1 %v2596_v4  ;;  %v6227_v2 = vld [vmem:[#allocation2 + $0x8] sm:$0xff] }
 0xc50   : > { %2665 = vrot.lane.b32.xlu1 %v8137_v41, %s7038_s9 }
 0xc54   : > { %6017 = vrot.lane.b32.xlu1 %v6016_v61, %s7038_s9 }
 0xc58   : > { %6022 = vrot.lane.b32.xlu1 %v6021_v44, %s7037_s17 }
 0xcca   : > { %v2595_v15 = vpop.xlane.xlu0 %2594 }
 0xccb   : > { %v2599_v6 = vsub.f32 %v2538_v50, %v2595_v15 }
 0xccc   : > { %v2598_v8 = vpop.xlane.xlu1 %2597 }
 0xccd   : > { %v2601_v9 = vmul.f32 1.442695, %v2599_v6  ;;  %v2600_v10 = vsub.f32 %v2588_v55, %v2598_v8  ;;  %v6078_v6 = vld [vmem:[%s7978_s4] sm:$0xff]  }
 0xcce   : > { %v6080_v8 = vld [vmem:[%s7972_s11] sm:$0xff]  }
 0xccf   : > { %6178 = vpow2.f32 %v2601_v9  ;;  %v2603_v11 = vmul.f32 1.442695, %v2600_v10  ;;  %v6079_v9 = vld [vmem:[%s7978_s4 + $0x8] sm:$0xff]   ;;  %v6081_v10 = vld [vmem:[%s7978_s4 + $0x10] sm:$0xff]  }
 0xcd0   : > { %v2666_v13 = vpop.permute.xlu1 %2665 }
 0xcd1   : > { %6180 = vpow2.f32 %v2603_v11  ;;  %v2671_v14 = vsel %vm1957_vm2, %v2666_v13, 0 }
 0xcd2   : > { %5656 = vmatpush3.bf16.msra.mxu1 %v2671_v14 }
 0xcd3   : > { %5681 = vmatprep.subr.bf16.mxu1 %v7033_v7 }
 0xcd4   : > { %v6018_v38 = vpop.permute.xlu1 %6017 }
 0xcd5   : > { %v6020_v40 = vunpack.i.h.bf16 %v6018_v38  ;;  %v6019_v42 = vunpack.i.l.bf16 %v6018_v38 }
 0xcd7   : > { %v2738_v46 = vsel %vm1836_vm1, %v8160_v59, %v6020_v40  ;;  %v2737_v48 = vsel %vm1836_vm1, %v8158_v54, %v6019_v42  ;;  %v6226_v54 = vld [vmem:[#allocation2] sm:$0xff] }
 0xcd8   : > { %v6023_v39 = vpop.permute.xlu1 %6022 }
 0xcd9   : > { %v6179_v41 = vpop.eup %6178  ;;  %v6025_v43 = vunpack.i.h.bf16 %v6023_v39  ;;  %v6024_v44 = vunpack.i.l.bf16 %v6023_v39  ;;  %v5243_v39 = vld [vmem:[%s8826_s18] ss:$0 sm:$0xff] }
 0xcda   : > { %v2605_v47 = vsel %vm1929_vm4, %v6179_v41, 0.0 }
 0xcdb   : > { %v6181_v60 = vpop.eup %6180  ;;  %2606 = vadd.xlane.f32.xlu0 %v2605_v47  ;;  %v2741_v51 = vsel %vm2739_vm5, %v2738_v46, %v6025_v43  ;;  %v2740_v52 = vsel %vm2739_vm5, %v2737_v48, %v6024_v44  ;;  %v6094_v44 = vld [vmem:[%s7981_s12] sm:$0xff]   ;;  %v6095_v46 = vld [vmem:[%s7981_s12 + $0x8] sm:$0xff]   ;;  %v6096_v48 = vld [vmem:[%s7981_s12 + $0x10] sm:$0xff]  }
 0xcdc   : > { %v2608_v61 = vsel %vm1929_vm4, %v6181_v60, 0.0 }
 0xcdf   : > { %2609 = vadd.xlane.f32.xlu0 %v2608_v61 }
 0xcf5   : > { %2617 = vrot.lane.b32.xlu0 %v8113_v5, %s7038_s9 }
 0xd68   : > { %v2607_v16 = vpop.xlane.xlu0 %2606 }
 0xd69   : > { %6182 = vrcp.f32 %v2607_v16 }
 0xd6c   : > { %v2610_v17 = vpop.xlane.xlu0 %2609 }
 0xd6d   : > { %6184 = vrcp.f32 %v2610_v17  ;;  %v6083_v17 = vld [vmem:[%s7978_s4 + $0x18] sm:$0xff]  }
 0xd70   : > { %v2618_v18 = vpop.permute.xlu0 %2617 }
 0xd71   : > { %v2623_v19 = vsel %vm1957_vm2, %v2618_v18, 0  ;;  %v6082_v18 = vld [vmem:[%s7972_s11 + $0x8] sm:$0xff]  }
 0xd72   : > { %5650 = vmatpush3.bf16.msra.mxu0 %v2623_v19  ;;  %v6085_v19 = vld [vmem:[%s7978_s4 + $0x20] sm:$0xff]  }
 0xd73   : > { %v6183_v20 = vpop.eup %6182  ;;  %5661 = vmatprep.subr.bf16.mxu0 %v7033_v7 }
 0xd74   : > { %v2613_v21 = vmul.f32 %v6183_v20, %v6179_v41  ;;  %v6084_v20 = vld [vmem:[%s7972_s11 + $0x10] sm:$0xff]  }
 0xd76   : > { %v2615_v22 = vpack.c.bf16 %v2613_v21, %v2613_v21  ;;  %v6087_v21 = vld [vmem:[%s7978_s4 + $0x28] sm:$0xff]  }
 0xd77   : > { %v6185_v56 = vpop.eup %6184 }
 0xd78   : > { %v2614_v0 = vmul.f32 %v6185_v56, %v6181_v60  ;;  %5652 = vmatmul.mubr.msk.bf16.vlgmr.msra.gmra.mrb[20].mxu0 %vm1929_vm4, %v2615_v22  ;;  %v6086_v22 = vld [vmem:[%s7972_s11 + $0x18] sm:$0xff]   ;;  %v6089_v56 = vld [vmem:[%s7978_s4 + $0x30] sm:$0xff]  }
 0xd79   : > { %5677 = vmatprep.mubr.msk.bf16.mxu0 %vm7034_vm0, %v7033_v7  ;;  %5662 = vmatpush3.bf16.msra.mxu0 %v6070_v3  ;;  %v2879_v3 = vld [vmem:[#allocation6] sm:$0xff] }
 0xd7a   : > { %v2616_v5 = vpack.c.bf16 %v2614_v0, %v2614_v0  ;;  %5663 = vmatprep.subr.bf16.mxu0 %v7033_v7  ;;  %v6088_v0 = vld [vmem:[%s7972_s11 + $0x20] sm:$0xff]  }
 0xd7c   : > { %5658 = vmatmul.mubr.msk.bf16.vlgmr.msra.gmra.mrb[48].mxu1 %vm1929_vm4, %v2616_v5  ;;  %v6091_v5 = vld [vmem:[%s7978_s4 + $0x38] sm:$0xff]  }
 0xd7d   : > { %5697 = vmatprep.mubr.msk.bf16.mxu1 %vm7034_vm0, %v7033_v7  ;;  %5664 = vmatpush3.bf16.msra.mxu0 %v6071_v23  ;;  %v2880_v23 = vld [vmem:[#allocation6 + $0x8] sm:$0xff] }
 0xd7e   : > { %5665 = vmatprep.subr.bf16.mxu0 %v7033_v7  ;;  %5682 = vmatpush3.bf16.msra.mxu1 %v6080_v8 }
 0xd7f   : > { %5683 = vmatprep.subr.bf16.mxu1 %v7033_v7 }
 0xd81   : > { %5666 = vmatpush3.bf16.msra.mxu0 %v6072_v24  ;;  %v6090_v24 = vld [vmem:[%s7972_s11 + $0x28] sm:$0xff]  }
 0xd82   : > { %5667 = vmatprep.subr.bf16.mxu0 %v7033_v7  ;;  %5684 = vmatpush3.bf16.msra.mxu1 %v6082_v18 }
 0xd83   : > { %5685 = vmatprep.subr.bf16.mxu1 %v7033_v7 }
 0xd85   : > { %5668 = vmatpush3.bf16.msra.mxu0 %v6073_v25  ;;  %v3035_v25 = vpack.c.bf16 %v2880_v23, %v2879_v3 }
 0xd86   : > { %5669 = vmatprep.subr.bf16.mxu0 %v7033_v7  ;;  %5686 = vmatpush3.bf16.msra.mxu1 %v6084_v20 }
 0xd87   : > { %5687 = vmatprep.subr.bf16.mxu1 %v7033_v7 }
 0xd89   : > { %5670 = vmatpush3.bf16.msra.mxu0 %v6074_v26  ;;  %v6092_v26 = vld [vmem:[%s7972_s11 + $0x30] sm:$0xff]  }
 0xd8a   : > { %5671 = vmatprep.subr.bf16.mxu0 %v7033_v7  ;;  %5688 = vmatpush3.bf16.msra.mxu1 %v6086_v22 }
 0xd8b   : > { %5689 = vmatprep.subr.bf16.mxu1 %v7033_v7 }
 0xd8d   : > { %5672 = vmatpush3.bf16.msra.mxu0 %v6075_v27  ;;  %v6093_v27 = vld [vmem:[%s7972_s11 + $0x38] sm:$0xff]  }
 0xd8e   : > { %5673 = vmatprep.subr.bf16.mxu0 %v7033_v7  ;;  %5690 = vmatpush3.bf16.msra.mxu1 %v6088_v0 }
 0xd8f   : > { %5691 = vmatprep.subr.bf16.mxu1 %v7033_v7 }
 0xd91   : > { %5674 = vmatpush3.bf16.msra.mxu0 %v6076_v28 }
 0xd92   : > { %5675 = vmatprep.subr.bf16.mxu0 %v7033_v7  ;;  %5692 = vmatpush3.bf16.msra.mxu1 %v6090_v24 }
 0xd93   : > { %5693 = vmatprep.subr.bf16.mxu1 %v7033_v7 }
 0xd95   : > { %5676 = vmatpush3.bf16.msra.mxu0 %v6077_v29 }
 0xd96   : > { %5701 = vmatprep.subr.bf16.mxu0 %v7033_v7  ;;  %5694 = vmatpush3.bf16.msra.mxu1 %v6092_v26 }
 0xd97   : > { %5695 = vmatprep.subr.bf16.mxu1 %v7033_v7 }
 0xd9a   : > { %5696 = vmatpush3.bf16.msra.mxu1 %v6093_v27 }
 0xd9b   : > { %5721 = vmatprep.subr.bf16.mxu1 %v7033_v7 }
 0xe4b   : > { %v2659_v30 = vpop.f32.mrb[20].mxu0 }
 0xe4c   : > { %v5653_v1 = vpop.f32.mrb[21].mxu0 }
 0xe4d   : > { %v2662_v31 = vpop.f32.mrb[22].mxu0 }
 0xe4e   : > { %v5654_v32 = vpop.f32.mrb[23].mxu0 }
 0xe4f   : > { %v2707_v33 = vpop.f32.mrb[48].mxu1 }
 0xe50   : > { %v6026_v34 = vpack.i.bf16 %v2707_v33, %v2659_v30  ;;  %v5659_v35 = vpop.f32.mrb[49].mxu1 }
 0xe51   : > { %v2710_v36 = vpop.f32.mrb[50].mxu1  ;;  %v5242_v35 = vld [vmem:[%s8825_s30] ss:$0 sm:$0xff] }
 0xe52   : > { %v5660_v37 = vpop.f32.mrb[51].mxu1  ;;  %6027 = vrot.lane.b32.xlu0 %v6026_v34, %s7036_s29 }
 0xec4   : > { %v6028_v45 = vpop.permute.xlu0 %6027 }
 0xec5   : > { %v6030_v49 = vunpack.i.h.bf16 %v6028_v45  ;;  %v6029_v50 = vunpack.i.l.bf16 %v6028_v45 }
 0xec7   : > { %v2744_v53 = vsel %vm2742_vm6, %v2741_v51, %v6030_v49  ;;  %v2743_v55 = vsel %vm2742_vm6, %v2740_v52, %v6029_v50  ;;  %v6097_v49 = vld [vmem:[%s7981_s12 + $0x18] sm:$0xff]   ;;  %v6098_v50 = vld [vmem:[%s7981_s12 + $0x20] sm:$0xff]   ;;  %v6099_v51 = vld [vmem:[%s7981_s12 + $0x28] sm:$0xff]  }
 0xec8   : > { %v2745_v57 = vpack.c.bf16 %v2744_v53, %v2743_v55  ;;  %v6100_v52 = vld [vmem:[%s7981_s12 + $0x30] sm:$0xff]   ;;  %v6101_v53 = vld [vmem:[%s7981_s12 + $0x38] sm:$0xff]  }
 0xeca   : > { %5678 = vmatmul.mubr.bf16.vlgmr.msra.gmra.mrb[24].mxu0 %v2745_v57 }
 0xecb   : > { %5717 = vmatprep.mubr.msk.bf16.mxu0 %vm7034_vm0, %v7033_v7  ;;  %5702 = vmatpush3.bf16.msra.mxu0 %v6078_v6 }
 0xecc   : > { %5703 = vmatprep.subr.bf16.mxu0 %v7033_v7 }
 0xecf   : > { %5704 = vmatpush3.bf16.msra.mxu0 %v6079_v9 }
 0xed0   : > { %5705 = vmatprep.subr.bf16.mxu0 %v7033_v7 }
 0xed3   : > { %5706 = vmatpush3.bf16.msra.mxu0 %v6081_v10 }
 0xed4   : > { %5707 = vmatprep.subr.bf16.mxu0 %v7033_v7 }
 0xed7   : > { %5708 = vmatpush3.bf16.msra.mxu0 %v6083_v17 }
 0xed8   : > { %5709 = vmatprep.subr.bf16.mxu0 %v7033_v7 }
 0xedb   : > { %5710 = vmatpush3.bf16.msra.mxu0 %v6085_v19  ;;  %v8394_v19 = vld [vmem:[#allocation8] ss:$0 sm:$0xff] }
 0xedc   : > { %5711 = vmatprep.subr.bf16.mxu0 %v7033_v7 }
 0xedf   : > { %5712 = vmatpush3.bf16.msra.mxu0 %v6087_v21  ;;  %v8396_v21 = vld [vmem:[#allocation8 + $0x1] ss:$0 sm:$0xff] }
 0xee0   : > { %5713 = vmatprep.subr.bf16.mxu0 %v7033_v7 }
 0xee3   : > { %5714 = vmatpush3.bf16.msra.mxu0 %v6089_v56 }
 0xee4   : > { %5715 = vmatprep.subr.bf16.mxu0 %v7033_v7 }
 0xee7   : > { %5716 = vmatpush3.bf16.msra.mxu0 %v6091_v5 }
 0xee8   : > { %5741 = vmatprep.subr.bf16.mxu0 %v7033_v7 }
 0xeea   : > { %5718 = vmatmul.mubr.bf16.vlgmr.msra.gmra.mrb[28].mxu0 %v3035_v25 }
 0xeeb   : > { %5743 = vmatprep.mubr.msk.bf16.mxu0 %vm7034_vm0, %v7033_v7 }
 0xf9d   : > { %v2828_v59 = vpop.f32.mrb[24].mxu0 }
 0xf9e   : > { %v8296_v58 = vadd.f32 %v6226_v54, %v2828_v59  ;;  %v5679_v62 = vpop.f32.mrb[25].mxu0 }
 0xf9f   : > { %v2831_v63 = vpop.f32.mrb[26].mxu0 }
 0xfa0   : > { %v8298_v4 = vadd.f32 %v6227_v2, %v2831_v63  ;;  %2841 = vadd.xlane.f32.xlu1 %v8296_v58  ;;  %v5680_v15 = vpop.f32.mrb[27].mxu0 }
 0xfa2   : > { %2843 = vadd.xlane.f32.xlu0 %v8298_v4 }
 0xfbd   : > { %v3118_v55 = vpop.f32.mrb[28].mxu0 }
 0xfbe   : > { %v8362_v57 = vpack.c.bf16 %v3118_v55, %v3118_v55  ;;  %v5719_v59 = vpop.f32.mrb[29].mxu0 }
 0xfbf   : > { %v3121_v54 = vpop.f32.mrb[30].mxu0 }
 0xfc0   : > { %v8364_v62 = vpack.c.bf16 %v3121_v54, %v3121_v54  ;;  %v5720_v63 = vpop.f32.mrb[31].mxu0  ;;  %v3236_v2 = vsel %vm1836_vm1, %v8362_v57, 0 }
 0xfc1   : > { %5742 = vmatpush3.bf16.xpose.msra.mxu0 %v3236_v2 }
 0xfc2   : > { %v3282_v15 = vsel %vm1836_vm1, %v8364_v62, 0  ;;  %5753 = vmatprep.subr.bf16.mxu0 %v7033_v7 }
0x102d   : > { %v2842_v11 = vpop.xlane.xlu1 %2841 }
0x102e   : > { %v2845_v13 = vmul.f32 0.0078125, %v2842_v11 }
0x102f   : > { %v2844_v14 = vpop.xlane.xlu0 %2843 }
0x1030   : > { %v2847_v41 = vsub.f32 %v8296_v58, %v2845_v13  ;;  %v2846_v47 = vmul.f32 0.0078125, %v2844_v14 }
0x1032   : > { %v2848_v60 = vsub.f32 %v8298_v4, %v2846_v47  ;;  %v2849_v61 = vmul.f32 %v2847_v41, %v2847_v41 }
0x1034   : > { %2851 = vadd.xlane.f32.xlu0 %v2849_v61  ;;  %v2850_v16 = vmul.f32 %v2848_v60, %v2848_v60 }
0x1038   : > { %2853 = vadd.xlane.f32.xlu0 %v2850_v16 }
0x10c1   : > { %v2852_v28 = vpop.xlane.xlu0 %2851 }
0x10c2   : > { %v2855_v29 = vmul.f32 0.0078125, %v2852_v28 }
0x10c4   : > { %v2857_v30 = vadd.f32 1e-05, %v2855_v29 }
0x10c5   : > { %v2854_v1 = vpop.xlane.xlu0 %2853 }
0x10c6   : > { %6186 = vrsqrt.f32 %v2857_v30  ;;  %v2856_v31 = vmul.f32 0.0078125, %v2854_v1 }
0x10c8   : > { %v2858_v32 = vadd.f32 1e-05, %v2856_v31 }
0x10ca   : > { %6188 = vrsqrt.f32 %v2858_v32 }
0x10d0   : > { %v6187_v33 = vpop.eup %6186 }
0x10d1   : > { %v2861_v34 = vmul.f32 %v6187_v33, %v2847_v41 }
0x10d3   : > { %v2869_v38 = vmul.f32 %v5242_v35, %v2861_v34 }
0x10d4   : > { %v6189_v36 = vpop.eup %6188 }
0x10d5   : > { %v2862_v37 = vmul.f32 %v6189_v36, %v2848_v60  ;;  %v2877_v42 = vadd.f32 %v5243_v39, %v2869_v38 }
0x10d7   : > { %v2870_v40 = vmul.f32 %v5242_v35, %v2862_v37 }
0x10d9   : > { %v2878_v43 = vadd.f32 %v5243_v39, %v2870_v40 }
0x10db   : > { %v2945_v45 = vpack.c.bf16 %v2878_v43, %v2877_v42 }
0x10dd   : > { %5698 = vmatmul.mubr.bf16.vlgmr.msra.gmra.mrb[52].mxu1 %v2945_v45 }
0x10de   : > { %5722 = vmatpush3.bf16.msra.mxu1 %v6094_v44  ;;  %5737 = vmatprep.mubr.msk.bf16.mxu1 %vm7034_vm0, %v7033_v7 }
0x10df   : > { %5723 = vmatprep.subr.bf16.mxu1 %v7033_v7 }
0x10e2   : > { %5724 = vmatpush3.bf16.msra.mxu1 %v6095_v46 }
0x10e3   : > { %5725 = vmatprep.subr.bf16.mxu1 %v7033_v7 }
0x10e6   : > { %5726 = vmatpush3.bf16.msra.mxu1 %v6096_v48 }
0x10e7   : > { %5727 = vmatprep.subr.bf16.mxu1 %v7033_v7 }
0x10ea   : > { %5728 = vmatpush3.bf16.msra.mxu1 %v6097_v49 }
0x10eb   : > { %5729 = vmatprep.subr.bf16.mxu1 %v7033_v7 }
0x10ee   : > { %5730 = vmatpush3.bf16.msra.mxu1 %v6098_v50 }
0x10ef   : > { %5731 = vmatprep.subr.bf16.mxu1 %v7033_v7 }
0x10f2   : > { %5732 = vmatpush3.bf16.msra.mxu1 %v6099_v51 }
0x10f3   : > { %5733 = vmatprep.subr.bf16.mxu1 %v7033_v7 }
0x10f6   : > { %5734 = vmatpush3.bf16.msra.mxu1 %v6100_v52 }
0x10f7   : > { %5735 = vmatprep.subr.bf16.mxu1 %v7033_v7 }
0x10fa   : > { %5736 = vmatpush3.bf16.msra.mxu1 %v6101_v53 }
0x10fb   : > { %5747 = vmatprep.subr.bf16.mxu1 %v7033_v7 }
0x10fd   : > { %5738 = vmatmul.mubr.bf16.vlgmr.msra.gmra.mrb[56].mxu1 %v3035_v25 }
0x10fe   : > { %5749 = vmatprep.mubr.msk.bf16.mxu1 %vm7034_vm0, %v7033_v7 }
0x1103   : > { %5748 = vmatpush3.bf16.xpose.msra.mxu1 %v3282_v15 }
0x1104   : > { %5759 = vmatprep.subr.bf16.mxu1 %v7033_v7 }
0x11b0   : > { %v3028_v6 = vpop.f32.mrb[52].mxu1 }
0x11b1   : > { %v8372_v8 = vpack.c.bf16 %v3028_v6, %v3028_v6  ;;  %v5699_v9 = vpop.f32.mrb[53].mxu1 }
0x11b2   : > { %v3031_v10 = vpop.f32.mrb[54].mxu1 }
0x11b3   : > { %v8374_v11 = vpack.c.bf16 %v3031_v10, %v3031_v10  ;;  %v5700_v13 = vpop.f32.mrb[55].mxu1  ;;  %5744 = vmatmul.mubr.msk.bf16.vlgmr.msra.gmra.mrb[32].mxu0 %vm1836_vm1, %v8372_v8 }
0x11b4   : > { %5755 = vmatprep.mubr.msk.bf16.mxu0 %vm7034_vm0, %v7033_v7 }
0x11b5   : > { %5750 = vmatmul.mubr.msk.bf16.vlgmr.msra.gmra.mrb[60].mxu1 %vm1836_vm1, %v8374_v11 }
0x11b6   : > { %5761 = vmatprep.mubr.msk.bf16.mxu1 %vm7034_vm0, %v7033_v7 }
0x11d0   : > { %v3207_v14 = vpop.f32.mrb[56].mxu1 }
0x11d1   : > { %v5739_v41 = vpop.f32.mrb[57].mxu1  ;;  %v8384_v61 = vpack.c.bf16 %v3207_v14, %v3207_v14 }
0x11d2   : > { %v3210_v47 = vpop.f32.mrb[58].mxu1 }
0x11d3   : > { %v5740_v60 = vpop.f32.mrb[59].mxu1  ;;  %v8386_v16 = vpack.c.bf16 %v3210_v47, %v3210_v47  ;;  %v3352_v17 = vsel %vm1957_vm2, %v8384_v61, 0 }
0x11d4   : > { %5754 = vmatpush3.bf16.msra.mxu0 %v3352_v17 }
0x11d5   : > { %v3398_v18 = vsel %vm1957_vm2, %v8386_v16, 0  ;;  %5765 = vmatprep.subr.bf16.mxu0 %v7033_v7 }
0x11d6   : > { %5760 = vmatpush3.bf16.msra.mxu1 %v3398_v18 }
0x11d7   : > { %5771 = vmatprep.subr.bf16.mxu1 %v7033_v7 }
0x1286   : > { %v3272_v20 = vpop.f32.mrb[32].mxu0 }
0x1287   : > { %v3273_v22 = vadd.f32 %v8394_v19, %v3272_v20  ;;  %v5745_v56 = vpop.f32.mrb[33].mxu0 }
0x1288   : > { %v3275_v0 = vpop.f32.mrb[34].mxu0  ;;  %v3318_v5 = vpop.f32.mrb[60].mxu1 }
0x1289   : > { %v3319_v3 = vadd.f32 %v8396_v21, %v3318_v5  ;;  %v5746_v23 = vpop.f32.mrb[35].mxu0  ;;  %v5751_v24 = vpop.f32.mrb[61].mxu1  ;;  %v3324_v25 = vsel %vm1929_vm4, %v3273_v22, -inf }
0x128a   : > { %v3321_v26 = vpop.f32.mrb[62].mxu1  ;;  %3325 = vmax.xlane.f32.xlu1 %v3324_v25 }
0x128b   : > { %v5752_v27 = vpop.f32.mrb[63].mxu1  ;;  %v3327_v28 = vsel %vm1929_vm4, %v3319_v3, -inf }
0x128c   : > { %3328 = vmax.xlane.f32.xlu0 %v3327_v28 }
0x129b   : > { %3444 = vrot.lane.b32.xlu1 %v8362_v57, %s7036_s29 }
0x1317   : > { %v3326_v29 = vpop.xlane.xlu1 %3325 }
0x1318   : > { %v3330_v30 = vsub.f32 %v3273_v22, %v3326_v29 }
0x1319   : > { %v3329_v1 = vpop.xlane.xlu0 %3328 }
0x131a   : > { %v3332_v31 = vmul.f32 1.442695, %v3330_v30  ;;  %v3331_v32 = vsub.f32 %v3319_v3, %v3329_v1 }
0x131b   : > { %v3445_v38 = vpop.permute.xlu1 %3444 }
0x131c   : > { %6190 = vpow2.f32 %v3332_v31  ;;  %v3334_v33 = vmul.f32 1.442695, %v3331_v32  ;;  %v3450_v49 = vsel %vm1836_vm1, %v3445_v38, 0 }
0x131e   : > { %6192 = vpow2.f32 %v3334_v33 }
0x1326   : > { %v6191_v34 = vpop.eup %6190 }
0x1327   : > { %v3336_v35 = vsel %vm1929_vm4, %v6191_v34, 0.0 }
0x1328   : > { %v6193_v36 = vpop.eup %6192  ;;  %3337 = vadd.xlane.f32.xlu1 %v3336_v35 }
0x1329   : > { %v3339_v37 = vsel %vm1929_vm4, %v6193_v36, 0.0 }
0x132a   : > { %3340 = vadd.xlane.f32.xlu0 %v3339_v37 }
0x1339   : > { %3441 = vrot.lane.b32.xlu1 %v8372_v8, %s7036_s29 }
0x133d   : > { %3493 = vrot.lane.b32.xlu1 %v8374_v11, %s7036_s29 }
0x1340   : > { %3496 = vrot.lane.b32.xlu0 %v8364_v62, %s7036_s29 }
0x13b5   : > { %v3338_v39 = vpop.xlane.xlu1 %3337 }
0x13b6   : > { %6194 = vrcp.f32 %v3338_v39 }
0x13b7   : > { %v3341_v40 = vpop.xlane.xlu0 %3340 }
0x13b8   : > { %6196 = vrcp.f32 %v3341_v40 }
0x13b9   : > { %v3442_v52 = vpop.permute.xlu1 %3441 }
0x13bb   : > { %v3497_v48 = vpop.permute.xlu0 %3496 }
0x13bc   : > { %v3502_v51 = vsel %vm1836_vm1, %v3497_v48, 0 }
0x13bd   : > { %v3494_v53 = vpop.permute.xlu1 %3493 }
0x13c0   : > { %v6195_v42 = vpop.eup %6194 }
0x13c1   : > { %v3344_v43 = vmul.f32 %v6195_v42, %v6191_v34 }
0x13c2   : > { %v6197_v44 = vpop.eup %6196 }
0x13c3   : > { %v3345_v45 = vmul.f32 %v6197_v44, %v6193_v36  ;;  %v3346_v46 = vpack.c.bf16 %v3344_v43, %v3344_v43 }
0x13c5   : > { %5756 = vmatmul.mubr.msk.bf16.vlgmr.msra.gmra.mrb[36].mxu0 %vm1929_vm4, %v3346_v46  ;;  %v3347_v50 = vpack.c.bf16 %v3345_v45, %v3345_v45 }
0x13c6   : > { %5766 = vmatpush3.bf16.xpose.msra.mxu0 %v3450_v49  ;;  %5767 = vmatprep.mubr.msk.bf16.mxu0 %vm7034_vm0, %v7033_v7 }
0x13c7   : > { %5762 = vmatmul.mubr.msk.bf16.vlgmr.msra.gmra.mrb[64].mxu1 %vm1929_vm4, %v3347_v50  ;;  %5777 = vmatprep.subr.bf16.mxu0 %v7033_v7 }
0x13c8   : > { %5772 = vmatpush3.bf16.xpose.msra.mxu1 %v3502_v51  ;;  %5773 = vmatprep.mubr.msk.bf16.mxu1 %vm7034_vm0, %v7033_v7 }
0x13c9   : > { %5783 = vmatprep.subr.bf16.mxu1 %v7033_v7 }
0x13cd   : > { %5768 = vmatmul.mubr.msk.bf16.vlgmr.msra.gmra.mrb[40].mxu0 %vm1836_vm1, %v3442_v52 }
0x13ce   : > { %5779 = vmatprep.mubr.msk.bf16.mxu0 %vm7034_vm0, %v7033_v7 }
0x13cf   : > { %5774 = vmatmul.mubr.msk.bf16.vlgmr.msra.gmra.mrb[68].mxu1 %vm1836_vm1, %v3494_v53 }
0x13d0   : > { %5785 = vmatprep.mubr.msk.bf16.mxu1 %vm7034_vm0, %v7033_v7 }
0x1498   : > { %v8428_v55 = vpop.f32.mrb[36].mxu0 }
0x1499   : > { %v5757_v59 = vpop.f32.mrb[37].mxu0 }
0x149a   : > { %v3391_v54 = vpop.f32.mrb[38].mxu0  ;;  %v8430_v63 = vpop.f32.mrb[64].mxu1 }
0x149b   : > { %v5758_v2 = vpop.f32.mrb[39].mxu0  ;;  %v5763_v15 = vpop.f32.mrb[65].mxu1 }
0x149c   : > { %v3437_v6 = vpop.f32.mrb[66].mxu1 }
0x149d   : > { %v5764_v9 = vpop.f32.mrb[67].mxu1 }
0x14a0   : > { %v3486_v10 = vpop.f32.mrb[40].mxu0 }
0x14a1   : > { %v3487_v13 = vadd.f32 %v8394_v19, %v3486_v10  ;;  %v5769_v14 = vpop.f32.mrb[41].mxu0 }
0x14a2   : > { %v3489_v41 = vpop.f32.mrb[42].mxu0  ;;  %v3538_v47 = vpop.f32.mrb[68].mxu1 }
0x14a3   : > { %v3539_v60 = vadd.f32 %v8396_v21, %v3538_v47  ;;  %v5770_v17 = vpop.f32.mrb[43].mxu0  ;;  %v5775_v18 = vpop.f32.mrb[69].mxu1  ;;  %v3544_v20 = vsel %vm1929_vm4, %v3487_v13, -inf }
0x14a4   : > { %v3541_v22 = vpop.f32.mrb[70].mxu1  ;;  %3545 = vmax.xlane.f32.xlu1 %v3544_v20 }
0x14a5   : > { %v5776_v56 = vpop.f32.mrb[71].mxu1  ;;  %v3547_v0 = vsel %vm1929_vm4, %v3539_v60, -inf }
0x14a6   : > { %3548 = vmax.xlane.f32.xlu0 %v3547_v0 }
0x14b5   : > { %3569 = vrot.lane.b32.xlu1 %v8384_v61, %s7036_s29 }
0x14b9   : > { %3668 = vrot.lane.b32.xlu1 %v8362_v57, %s7037_s17 }
0x14bd   : > { %3718 = vrot.lane.b32.xlu1 %v8364_v62, %s7037_s17 }
0x14c1   : > { %3666 = vrot.lane.b32.xlu1 %v8372_v8, %s7037_s17 }
0x1531   : > { %v3546_v5 = vpop.xlane.xlu1 %3545 }
0x1532   : > { %v3550_v3 = vsub.f32 %v3487_v13, %v3546_v5 }
0x1533   : > { %v3549_v23 = vpop.xlane.xlu0 %3548 }
0x1534   : > { %v3552_v24 = vmul.f32 1.442695, %v3550_v3  ;;  %v3551_v25 = vsub.f32 %v3539_v60, %v3549_v23 }
0x1535   : > { %v3570_v26 = vpop.permute.xlu1 %3569 }
0x1536   : > { %6198 = vpow2.f32 %v3552_v24  ;;  %v3554_v27 = vmul.f32 1.442695, %v3551_v25  ;;  %v3575_v28 = vsel %vm1957_vm2, %v3570_v26, 0 }
0x1537   : > { %5778 = vmatpush3.bf16.msra.mxu0 %v3575_v28 }
0x1538   : > { %6200 = vpow2.f32 %v3554_v27  ;;  %5789 = vmatprep.subr.bf16.mxu0 %v7033_v7 }
0x1539   : > { %v3669_v37 = vpop.permute.xlu1 %3668 }
0x153a   : > { %v3674_v42 = vsel %vm1836_vm1, %v3669_v37, 0 }
0x153d   : > { %v3719_v44 = vpop.permute.xlu1 %3718 }
0x153e   : > { %v3724_v46 = vsel %vm1836_vm1, %v3719_v44, 0 }
0x1540   : > { %v6199_v29 = vpop.eup %6198 }
0x1541   : > { %v3556_v30 = vsel %vm1929_vm4, %v6199_v29, 0.0  ;;  %v3667_v48 = vpop.permute.xlu1 %3666 }
0x1542   : > { %v6201_v1 = vpop.eup %6200  ;;  %3557 = vadd.xlane.f32.xlu0 %v3556_v30 }
0x1543   : > { %v3559_v31 = vsel %vm1929_vm4, %v6201_v1, 0.0 }
0x1546   : > { %3560 = vadd.xlane.f32.xlu0 %v3559_v31 }
0x155c   : > { %3618 = vrot.lane.b32.xlu0 %v8386_v16, %s7036_s29 }
0x1560   : > { %3716 = vrot.lane.b32.xlu0 %v8374_v11, %s7037_s17 }
0x15cf   : > { %v3558_v32 = vpop.xlane.xlu0 %3557 }
0x15d0   : > { %6202 = vrcp.f32 %v3558_v32 }
0x15d3   : > { %v3561_v33 = vpop.xlane.xlu0 %3560 }
0x15d4   : > { %6204 = vrcp.f32 %v3561_v33 }
0x15d7   : > { %v3619_v34 = vpop.permute.xlu0 %3618 }
0x15d8   : > { %v3624_v35 = vsel %vm1957_vm2, %v3619_v34, 0 }
0x15d9   : > { %5784 = vmatpush3.bf16.msra.mxu1 %v3624_v35 }
0x15da   : > { %v6203_v36 = vpop.eup %6202  ;;  %5795 = vmatprep.subr.bf16.mxu1 %v7033_v7 }
0x15db   : > { %v3564_v38 = vmul.f32 %v6203_v36, %v6199_v29  ;;  %v3717_v49 = vpop.permute.xlu0 %3716 }
0x15dd   : > { %v3566_v39 = vpack.c.bf16 %v3564_v38, %v3564_v38 }
0x15de   : > { %v6205_v40 = vpop.eup %6204 }
0x15df   : > { %v3565_v43 = vmul.f32 %v6205_v40, %v6201_v1  ;;  %5780 = vmatmul.mubr.msk.bf16.vlgmr.msra.gmra.mrb[44].mxu0 %vm1929_vm4, %v3566_v39 }
0x15e0   : > { %5790 = vmatpush3.bf16.xpose.msra.mxu0 %v3674_v42  ;;  %5791 = vmatprep.mubr.msk.bf16.mxu0 %vm7034_vm0, %v7033_v7 }
0x15e1   : > { %v3567_v45 = vpack.c.bf16 %v3565_v43, %v3565_v43  ;;  %5801 = vmatprep.subr.bf16.mxu0 %v7033_v7 }
0x15e3   : > { %5786 = vmatmul.mubr.msk.bf16.vlgmr.msra.gmra.mrb[72].mxu1 %vm1929_vm4, %v3567_v45 }
0x15e4   : > { %5796 = vmatpush3.bf16.xpose.msra.mxu1 %v3724_v46  ;;  %5797 = vmatprep.mubr.msk.bf16.mxu1 %vm7034_vm0, %v7033_v7 }
0x15e5   : > { %5807 = vmatprep.subr.bf16.mxu1 %v7033_v7 }
0x15e7   : > { %5792 = vmatmul.mubr.msk.bf16.vlgmr.msra.gmra.mrb[48].mxu0 %vm1836_vm1, %v3667_v48 }
0x15e8   : > { %5803 = vmatprep.mubr.msk.bf16.mxu0 %vm7034_vm0, %v7033_v7 }
0x15eb   : > { %5798 = vmatmul.mubr.msk.bf16.vlgmr.msra.gmra.mrb[76].mxu1 %vm1836_vm1, %v3717_v49 }
0x15ec   : > { %5809 = vmatprep.mubr.msk.bf16.mxu1 %vm7034_vm0, %v7033_v7 }
0x16b2   : > { %v8470_v50 = vpop.f32.mrb[44].mxu0 }
0x16b3   : > { %v5781_v51 = vpop.f32.mrb[45].mxu0 }
0x16b4   : > { %v3614_v52 = vpop.f32.mrb[46].mxu0 }
0x16b5   : > { %v5782_v53 = vpop.f32.mrb[47].mxu0 }
0x16b6   : > { %v8472_v59 = vpop.f32.mrb[72].mxu1 }
0x16b7   : > { %v6031_v54 = vpack.i.bf16 %v8472_v59, %v8470_v50  ;;  %v5787_v2 = vpop.f32.mrb[73].mxu1 }
0x16b8   : > { %v3663_v15 = vpop.f32.mrb[74].mxu1 }
0x16b9   : > { %v5788_v6 = vpop.f32.mrb[75].mxu1 }
0x16ba   : > { %v3710_v9 = vpop.f32.mrb[48].mxu0 }
0x16bb   : > { %v3711_v10 = vadd.f32 %v8394_v19, %v3710_v9  ;;  %v5793_v13 = vpop.f32.mrb[49].mxu0 }
0x16bc   : > { %v3713_v14 = vpop.f32.mrb[50].mxu0 }
0x16bd   : > { %v5794_v41 = vpop.f32.mrb[51].mxu0  ;;  %v3766_v47 = vsel %vm1929_vm4, %v3711_v10, -inf }
0x16be   : > { %v3760_v60 = vpop.f32.mrb[76].mxu1  ;;  %3767 = vmax.xlane.f32.xlu1 %v3766_v47 }
0x16bf   : > { %v3761_v17 = vadd.f32 %v8396_v21, %v3760_v60  ;;  %v5799_v18 = vpop.f32.mrb[77].mxu1 }
0x16c0   : > { %v3763_v20 = vpop.f32.mrb[78].mxu1 }
0x16c1   : > { %v5800_v22 = vpop.f32.mrb[79].mxu1  ;;  %v3769_v56 = vsel %vm1929_vm4, %v3761_v17, -inf }
0x16c2   : > { %3770 = vmax.xlane.f32.xlu0 %v3769_v56 }
0x16cf   : > { %3790 = vrot.lane.b32.xlu1 %v8384_v61, %s7037_s17 }
0x16d3   : > { %3888 = vrot.lane.b32.xlu1 %v8362_v57, %s7038_s9 }
0x16d7   : > { %3938 = vrot.lane.b32.xlu1 %v8364_v62, %s7038_s9 }
0x16db   : > { %3886 = vrot.lane.b32.xlu1 %v8372_v8, %s7038_s9 }
0x174b   : > { %v3768_v0 = vpop.xlane.xlu1 %3767 }
0x174c   : > { %v3772_v5 = vsub.f32 %v3711_v10, %v3768_v0 }
0x174e   : > { %v3774_v3 = vmul.f32 1.442695, %v3772_v5 }
0x174f   : > { %v3771_v23 = vpop.xlane.xlu0 %3770  ;;  %v3791_v24 = vpop.permute.xlu1 %3790 }
0x1750   : > { %6206 = vpow2.f32 %v3774_v3  ;;  %v3773_v25 = vsub.f32 %v3761_v17, %v3771_v23  ;;  %v3796_v26 = vsel %vm1957_vm2, %v3791_v24, 0 }
0x1751   : > { %5802 = vmatpush3.bf16.msra.mxu0 %v3796_v26 }
0x1752   : > { %v3776_v27 = vmul.f32 1.442695, %v3773_v25  ;;  %5813 = vmatprep.subr.bf16.mxu0 %v7033_v7 }
0x1753   : > { %v3889_v33 = vpop.permute.xlu1 %3888 }
0x1754   : > { %6208 = vpow2.f32 %v3776_v27  ;;  %v3894_v37 = vsel %vm1836_vm1, %v3889_v33, 0  ;;  %v6106_v33 = vld [vmem:[%s7987_s28 + $0x20] sm:$0xff]  }
0x175a   : > { %v6207_v57 = vpop.eup %6206 }
0x175b   : > { %v3778_v62 = vsel %vm1929_vm4, %v6207_v57, 0.0 }
0x175c   : > { %3779 = vadd.xlane.f32.xlu0 %v3778_v62 }
0x175e   : > { %v6209_v28 = vpop.eup %6208 }
0x175f   : > { %v3781_v8 = vsel %vm1929_vm4, %v6209_v28, 0.0 }
0x1760   : > { %3782 = vadd.xlane.f32.xlu0 %v3781_v8 }
0x1776   : > { %3838 = vrot.lane.b32.xlu0 %v8386_v16, %s7037_s17 }
0x177a   : > { %3936 = vrot.lane.b32.xlu0 %v8374_v11, %s7038_s9  ;;  %v3939_v11 = vpop.permute.xlu1 %3938 }
0x177b   : > { %v3944_v40 = vsel %vm1836_vm1, %v3939_v11, 0 }
0x177e   : > { %v3887_v42 = vpop.permute.xlu1 %3886 }
0x17e9   : > { %v3780_v29 = vpop.xlane.xlu0 %3779 }
0x17ea   : > { %6210 = vrcp.f32 %v3780_v29 }
0x17ed   : > { %v3783_v30 = vpop.xlane.xlu0 %3782 }
0x17ee   : > { %6212 = vrcp.f32 %v3783_v30  ;;  %v6102_v30 = vld [vmem:[%s7987_s28] sm:$0xff]  }
0x17f1   : > { %v3839_v1 = vpop.permute.xlu0 %3838 }
0x17f2   : > { %v3844_v31 = vsel %vm1957_vm2, %v3839_v1, 0  ;;  %v6103_v1 = vld [vmem:[%s7987_s28 + $0x8] sm:$0xff]  }
0x17f3   : > { %5808 = vmatpush3.bf16.msra.mxu1 %v3844_v31  ;;  %v6104_v31 = vld [vmem:[%s7987_s28 + $0x10] sm:$0xff]  }
0x17f4   : > { %v6211_v32 = vpop.eup %6210  ;;  %5819 = vmatprep.subr.bf16.mxu1 %v7033_v7 }
0x17f5   : > { %v3786_v34 = vmul.f32 %v6211_v32, %v6207_v57  ;;  %v3937_v43 = vpop.permute.xlu0 %3936  ;;  %v6105_v32 = vld [vmem:[%s7987_s28 + $0x18] sm:$0xff]  }
0x17f7   : > { %v3788_v35 = vpack.c.bf16 %v3786_v34, %v3786_v34  ;;  %v6107_v34 = vld [vmem:[%s7987_s28 + $0x28] sm:$0xff]  }
0x17f8   : > { %v6213_v36 = vpop.eup %6212 }
0x17f9   : > { %v3787_v38 = vmul.f32 %v6213_v36, %v6209_v28  ;;  %5804 = vmatmul.mubr.msk.bf16.vlgmr.msra.gmra.mrb[52].mxu0 %vm1929_vm4, %v3788_v35  ;;  %v6108_v35 = vld [vmem:[%s7987_s28 + $0x30] sm:$0xff]   ;;  %v6109_v36 = vld [vmem:[%s7987_s28 + $0x38] sm:$0xff]  }
0x17fa   : > { %5814 = vmatpush3.bf16.xpose.msra.mxu0 %v3894_v37  ;;  %5815 = vmatprep.mubr.msk.bf16.mxu0 %vm7034_vm0, %v7033_v7 }
0x17fb   : > { %v3789_v39 = vpack.c.bf16 %v3787_v38, %v3787_v38  ;;  %5825 = vmatprep.subr.bf16.mxu0 %v7033_v7 }
0x17fd   : > { %5810 = vmatmul.mubr.msk.bf16.vlgmr.msra.gmra.mrb[80].mxu1 %vm1929_vm4, %v3789_v39 }
0x17fe   : > { %5820 = vmatpush3.bf16.xpose.msra.mxu1 %v3944_v40  ;;  %5821 = vmatprep.mubr.msk.bf16.mxu1 %vm7034_vm0, %v7033_v7 }
0x17ff   : > { %5831 = vmatprep.subr.bf16.mxu1 %v7033_v7 }
0x1801   : > { %5816 = vmatmul.mubr.msk.bf16.vlgmr.msra.gmra.mrb[56].mxu0 %vm1836_vm1, %v3887_v42 }
0x1802   : > { %5827 = vmatprep.mubr.msk.bf16.mxu0 %vm7034_vm0, %v7033_v7 }
0x1805   : > { %5822 = vmatmul.mubr.msk.bf16.vlgmr.msra.gmra.mrb[84].mxu1 %vm1836_vm1, %v3937_v43 }
0x1806   : > { %5833 = vmatprep.mubr.msk.bf16.mxu1 %vm7034_vm0, %v7033_v7 }
0x18cc   : > { %v3832_v44 = vpop.f32.mrb[52].mxu0 }
0x18cd   : > { %v5805_v45 = vpop.f32.mrb[53].mxu0 }
0x18ce   : > { %v3835_v46 = vpop.f32.mrb[54].mxu0 }
0x18cf   : > { %v5806_v48 = vpop.f32.mrb[55].mxu0 }
0x18d0   : > { %v3880_v49 = vpop.f32.mrb[80].mxu1 }
0x18d1   : > { %v6036_v51 = vpack.i.bf16 %v3880_v49, %v3832_v44  ;;  %v5811_v52 = vpop.f32.mrb[81].mxu1 }
0x18d2   : > { %v3883_v53 = vpop.f32.mrb[82].mxu1 }
0x18d3   : > { %v5812_v2 = vpop.f32.mrb[83].mxu1 }
0x18d4   : > { %v3930_v15 = vpop.f32.mrb[56].mxu0 }
0x18d5   : > { %v3931_v6 = vadd.f32 %v8394_v19, %v3930_v15  ;;  %v5817_v9 = vpop.f32.mrb[57].mxu0 }
0x18d6   : > { %v3933_v10 = vpop.f32.mrb[58].mxu0 }
0x18d7   : > { %v5818_v13 = vpop.f32.mrb[59].mxu0  ;;  %v3986_v14 = vsel %vm1929_vm4, %v3931_v6, -inf }
0x18d8   : > { %v3980_v41 = vpop.f32.mrb[84].mxu1  ;;  %3987 = vmax.xlane.f32.xlu1 %v3986_v14 }
0x18d9   : > { %v3981_v47 = vadd.f32 %v8396_v21, %v3980_v41  ;;  %v5823_v60 = vpop.f32.mrb[85].mxu1 }
0x18da   : > { %v3983_v17 = vpop.f32.mrb[86].mxu1 }
0x18db   : > { %v5824_v18 = vpop.f32.mrb[87].mxu1  ;;  %v3989_v20 = vsel %vm1929_vm4, %v3981_v47, -inf }
0x18dc   : > { %3990 = vmax.xlane.f32.xlu0 %v3989_v20 }
0x18e9   : > { %4010 = vrot.lane.b32.xlu1 %v8384_v61, %s7038_s9 }
0x18ed   : > { %6032 = vrot.lane.b32.xlu1 %v6031_v54, %s7038_s9 }
0x18f1   : > { %6037 = vrot.lane.b32.xlu1 %v6036_v51, %s7037_s17 }
0x1965   : > { %v3988_v19 = vpop.xlane.xlu1 %3987 }
0x1966   : > { %v3992_v22 = vsub.f32 %v3931_v6, %v3988_v19  ;;  %v6110_v19 = vld [vmem:[%s7998_s27] ss:$8 sps:$4 sm:$0xff]  }
0x1968   : > { %v3994_v56 = vmul.f32 1.442695, %v3992_v22  ;;  %v6112_v22 = vld [vmem:[%s7998_s27 + $0x4] ss:$8 sps:$4 sm:$0xff]  }
0x1969   : > { %v3991_v21 = vpop.xlane.xlu0 %3990  ;;  %v4011_v0 = vpop.permute.xlu1 %4010 }
0x196a   : > { %6214 = vpow2.f32 %v3994_v56  ;;  %v3993_v5 = vsub.f32 %v3981_v47, %v3991_v21  ;;  %v4016_v3 = vsel %vm1957_vm2, %v4011_v0, 0  ;;  %v6115_v56 = vld [vmem:[%s7998_s27 + $0x14] ss:$8 sps:$4 sm:$0xff]   ;;  %v6113_v21 = vld [vmem:[%s7998_s27 + $0x10] ss:$8 sps:$4 sm:$0xff]  }
0x196b   : > { %5826 = vmatpush3.bf16.msra.mxu0 %v4016_v3 }
0x196c   : > { %v3996_v23 = vmul.f32 1.442695, %v3993_v5  ;;  %5837 = vmatprep.subr.bf16.mxu0 %v7033_v7 }
0x196d   : > { %v6033_v46 = vpop.permute.xlu1 %6032 }
0x196e   : > { %6216 = vpow2.f32 %v3996_v23  ;;  %v6035_v49 = vunpack.i.h.bf16 %v6033_v46  ;;  %v6034_v51 = vunpack.i.l.bf16 %v6033_v46 }
0x1970   : > { %v4131_v2 = vsel %vm1836_vm1, %v8430_v63, %v6035_v49  ;;  %v4130_v15 = vsel %vm1836_vm1, %v8428_v55, %v6034_v51  ;;  %v5294_v51 = vld [vmem:[%s1284_s13] ss:$0 sm:$0xff] }
0x1971   : > { %v6038_v48 = vpop.permute.xlu1 %6037 }
0x1972   : > { %v6040_v52 = vunpack.i.h.bf16 %v6038_v48  ;;  %v6039_v53 = vunpack.i.l.bf16 %v6038_v48 }
0x1974   : > { %v6215_v61 = vpop.eup %6214  ;;  %v4132_v10 = vsel %vm2739_vm5, %v4130_v15, %v6039_v53  ;;  %v4133_v13 = vsel %vm2739_vm5, %v4131_v2, %v6040_v52  ;;  %v5295_v2 = vld [vmem:[%s1292_s3] ss:$0 sm:$0xff] }
0x1975   : > { %v3998_v50 = vsel %vm1929_vm4, %v6215_v61, 0.0 }
0x1976   : > { %3999 = vadd.xlane.f32.xlu0 %v3998_v50 }
0x1978   : > { %v6217_v59 = vpop.eup %6216 }
0x1979   : > { %v4001_v54 = vsel %vm1929_vm4, %v6217_v59, 0.0 }
0x197a   : > { %4002 = vadd.xlane.f32.xlu0 %v4001_v54  ;;  %v6116_v54 = vld [vmem:[%s7998_s27 + $0x20] ss:$8 sps:$4 sm:$0xff]  }
0x1990   : > { %4058 = vrot.lane.b32.xlu0 %v8386_v16, %s7038_s9 }
0x1a03   : > { %v4000_v24 = vpop.xlane.xlu0 %3999 }
0x1a04   : > { %6218 = vrcp.f32 %v4000_v24  ;;  %v6121_v24 = vld [vmem:[%s7998_s27 + $0x34] ss:$8 sps:$4 sm:$0xff]  }
0x1a07   : > { %v4003_v25 = vpop.xlane.xlu0 %4002 }
0x1a08   : > { %6220 = vrcp.f32 %v4003_v25  ;;  %v6119_v25 = vld [vmem:[%s7998_s27 + $0x30] ss:$8 sps:$4 sm:$0xff]  }
0x1a0b   : > { %v4059_v26 = vpop.permute.xlu0 %4058 }
0x1a0c   : > { %v4064_v27 = vsel %vm1957_vm2, %v4059_v26, 0  ;;  %v6124_v26 = vld [vmem:[%s7998_s27 + $0x44] ss:$8 sps:$4 sm:$0xff]  }
0x1a0d   : > { %5832 = vmatpush3.bf16.msra.mxu1 %v4064_v27  ;;  %v6122_v27 = vld [vmem:[%s7998_s27 + $0x40] ss:$8 sps:$4 sm:$0xff]  }
0x1a0e   : > { %v6219_v57 = vpop.eup %6218  ;;  %4377 = vmatprep.subr.bf16.mxu1 %v6112_v22 }
0x1a0f   : > { %v4006_v62 = vmul.f32 %v6219_v57, %v6215_v61  ;;  %v6127_v57 = vld [vmem:[%s7998_s27 + $0x54] ss:$8 sps:$4 sm:$0xff]  }
0x1a11   : > { %v4008_v28 = vpack.c.bf16 %v4006_v62, %v4006_v62  ;;  %v6125_v62 = vld [vmem:[%s7998_s27 + $0x50] ss:$8 sps:$4 sm:$0xff]  }
0x1a12   : > { %v6221_v8 = vpop.eup %6220 }
0x1a13   : > { %v4007_v29 = vmul.f32 %v6221_v8, %v6217_v59  ;;  %5828 = vmatmul.mubr.msk.bf16.vlgmr.msra.gmra.mrb[60].mxu0 %vm1929_vm4, %v4008_v28  ;;  %v6118_v59 = vld [vmem:[%s7998_s27 + $0x24] ss:$8 sps:$4 sm:$0xff]   ;;  %v6128_v8 = vld [vmem:[%s7998_s27 + $0x60] ss:$8 sps:$4 sm:$0xff]  }
0x1a14   : > { %5853 = vmatprep.mubr.msk.bf16.mxu0 %vm7034_vm0, %v7033_v7  ;;  %5838 = vmatpush3.bf16.msra.mxu0 %v6102_v30  ;;  %v6130_v28 = vld [vmem:[%s7998_s27 + $0x64] ss:$8 sps:$4 sm:$0xff]   ;;  %v7039_v30 = vmov 0  }
0x1a15   : > { %v4009_v16 = vpack.c.bf16 %v4007_v29, %v4007_v29  ;;  %5839 = vmatprep.subr.bf16.mxu0 %v7033_v7  ;;  %v6133_v29 = vld [vmem:[%s7998_s27 + $0x74] ss:$8 sps:$4 sm:$0xff]  }
0x1a17   : > { %5834 = vmatmul.mubr.msk.bf16.vlgmr.msra.gmra.mrb[88].mxu1 %vm1929_vm4, %v4009_v16  ;;  %v6131_v16 = vld [vmem:[%s7998_s27 + $0x70] ss:$8 sps:$4 sm:$0xff]  }
0x1a18   : > { %5840 = vmatpush3.bf16.msra.mxu0 %v6103_v1  ;;  %4378 = vmatpush1.bf16.msra.mxu1 %v6110_v19  ;;  %v6134_v1 = vld [vmem:[%s8008_s10 + $0x40] sm:$0xff]  }
0x1a19   : > { %5841 = vmatprep.subr.bf16.mxu0 %v7033_v7  ;;  %4379 = vmatprep.subr.bf16.mxu1 %v6115_v56 }
0x1a1a   : > { %4409 = vmatprep.mubr.bf16.mxu1 %v7039_v30 }
0x1a1c   : > { %5842 = vmatpush3.bf16.msra.mxu0 %v6104_v31  ;;  %4380 = vmatpush1.bf16.msra.mxu1 %v6113_v21  ;;  %v6135_v31 = vld [vmem:[%s8008_s10] sm:$0xff]  }
0x1a1d   : > { %5843 = vmatprep.subr.bf16.mxu0 %v7033_v7  ;;  %4381 = vmatprep.subr.bf16.mxu1 %v6118_v59 }
0x1a20   : > { %5844 = vmatpush3.bf16.msra.mxu0 %v6105_v32  ;;  %4382 = vmatpush1.bf16.msra.mxu1 %v6116_v54  ;;  %v6136_v32 = vld [vmem:[%s8008_s10 + $0x48] sm:$0xff]  }
0x1a21   : > { %5845 = vmatprep.subr.bf16.mxu0 %v7033_v7  ;;  %4383 = vmatprep.subr.bf16.mxu1 %v6121_v24 }
0x1a24   : > { %5846 = vmatpush3.bf16.msra.mxu0 %v6106_v33  ;;  %4384 = vmatpush1.bf16.msra.mxu1 %v6119_v25  ;;  %v6137_v33 = vld [vmem:[%s8008_s10 + $0x8] sm:$0xff]  }
0x1a25   : > { %5847 = vmatprep.subr.bf16.mxu0 %v7033_v7  ;;  %4385 = vmatprep.subr.bf16.mxu1 %v6124_v26  ;;  %v5312_v26 = vld [vmem:[%s1276_s16] ss:$0 sm:$0xff] }
0x1a28   : > { %5848 = vmatpush3.bf16.msra.mxu0 %v6107_v34  ;;  %4386 = vmatpush1.bf16.msra.mxu1 %v6122_v27  ;;  %v6138_v34 = vld [vmem:[%s8008_s10 + $0x50] sm:$0xff]  }
0x1a29   : > { %5849 = vmatprep.subr.bf16.mxu0 %v7033_v7  ;;  %4387 = vmatprep.subr.bf16.mxu1 %v6127_v57 }
0x1a2c   : > { %5850 = vmatpush3.bf16.msra.mxu0 %v6108_v35  ;;  %4388 = vmatpush1.bf16.msra.mxu1 %v6125_v62  ;;  %v6139_v35 = vld [vmem:[%s8008_s10 + $0x10] sm:$0xff]  }
0x1a2d   : > { %5851 = vmatprep.subr.bf16.mxu0 %v7033_v7  ;;  %4389 = vmatprep.subr.bf16.mxu1 %v6130_v28 }
0x1a30   : > { %5852 = vmatpush3.bf16.msra.mxu0 %v6109_v36  ;;  %4390 = vmatpush1.bf16.msra.mxu1 %v6128_v8  ;;  %v6140_v36 = vld [vmem:[%s8008_s10 + $0x58] sm:$0xff]  }
0x1a31   : > { %4391 = vmatprep.subr.bf16.mxu1 %v6133_v29  ;;  %5483 = vmatprep.subr.bf16.mxu0 %v6134_v1 }
0x1a34   : > { %4392 = vmatpush1.bf16.msra.mxu1 %v6131_v16 }
0x1ae6   : > { %v4052_v37 = vpop.f32.mrb[60].mxu0 }
0x1ae7   : > { %v5829_v38 = vpop.f32.mrb[61].mxu0 }
0x1ae8   : > { %v4055_v11 = vpop.f32.mrb[62].mxu0  ;;  %v6142_v38 = vld [vmem:[%s8008_s10 + $0x60] sm:$0xff]  }
0x1ae9   : > { %v5830_v39 = vpop.f32.mrb[63].mxu0  ;;  %v6143_v11 = vld [vmem:[%s8008_s10 + $0x20] sm:$0xff]  }
0x1aea   : > { %v4100_v40 = vpop.f32.mrb[88].mxu1  ;;  %v6144_v39 = vld [vmem:[%s8008_s10 + $0x68] sm:$0xff]  }
0x1aeb   : > { %v6041_v42 = vpack.i.bf16 %v4100_v40, %v4052_v37  ;;  %v5835_v43 = vpop.f32.mrb[89].mxu1  ;;  %v6141_v37 = vld [vmem:[%s8008_s10 + $0x18] sm:$0xff]  }
0x1aec   : > { %v4103_v44 = vpop.f32.mrb[90].mxu1 }
0x1aed   : > { %v5836_v45 = vpop.f32.mrb[91].mxu1  ;;  %6042 = vrot.lane.b32.xlu1 %v6041_v42, %s7036_s29 }
0x1b5f   : > { %v6043_v7 = vpop.permute.xlu1 %6042 }
0x1b60   : > { %v6045_v6 = vunpack.i.h.bf16 %v6043_v7  ;;  %v6044_v9 = vunpack.i.l.bf16 %v6043_v7 }
0x1b62   : > { %v4135_v14 = vsel %vm2742_vm6, %v4133_v13, %v6045_v6  ;;  %v4134_v41 = vsel %vm2742_vm6, %v4132_v10, %v6044_v9  ;;  %v6145_v13 = vld [vmem:[%s8008_s10 + $0x28] sm:$0xff]  }
0x1b63   : > { %v4136_v47 = vpack.c.bf16 %v4135_v14, %v4134_v41  ;;  %v6146_v14 = vld [vmem:[%s8008_s10 + $0x70] sm:$0xff]  }
0x1b64   : > { %v6147_v41 = vld [vmem:[%s8008_s10 + $0x30] sm:$0xff]  }
0x1b65   : > { %5854 = vmatmul.mubr.bf16.vlgmr.msra.gmra.mrb[64].mxu0 %v4136_v47  ;;  %v6148_v47 = vld [vmem:[%s8008_s10 + $0x78] sm:$0xff]  }
0x1b66   : > { %5484 = vmatpush3.bf16.msra.mxu0 %v6135_v31 }
0x1b67   : > { %5485 = vmatprep.subr.bf16.mxu0 %v6136_v32 }
0x1b6a   : > { %5486 = vmatpush3.bf16.msra.mxu0 %v6137_v33 }
0x1b6b   : > { %5487 = vmatprep.subr.bf16.mxu0 %v6138_v34 }
0x1b6e   : > { %5488 = vmatpush3.bf16.msra.mxu0 %v6139_v35 }
0x1b6f   : > { %5489 = vmatprep.subr.bf16.mxu0 %v6140_v36 }
0x1b72   : > { %5490 = vmatpush3.bf16.msra.mxu0 %v6141_v37 }
0x1b73   : > { %5491 = vmatprep.subr.bf16.mxu0 %v6142_v38 }
0x1b76   : > { %5492 = vmatpush3.bf16.msra.mxu0 %v6143_v11 }
0x1b77   : > { %5493 = vmatprep.subr.bf16.mxu0 %v6144_v39 }
0x1b7a   : > { %5494 = vmatpush3.bf16.msra.mxu0 %v6145_v13 }
0x1b7b   : > { %5495 = vmatprep.subr.bf16.mxu0 %v6146_v14 }
0x1b7e   : > { %5496 = vmatpush3.bf16.msra.mxu0 %v6147_v41 }
0x1b7f   : > { %5497 = vmatprep.subr.bf16.mxu0 %v6148_v47 }
0x1c38   : > { %v4219_v63 = vpop.f32.mrb[64].mxu0 }
0x1c39   : > { %v8561_v60 = vadd.f32 %v4219_v63, %v8296_v58  ;;  %v5855_v55 = vpop.f32.mrb[65].mxu0  ;;  %v6149_v63 = vld [vmem:[%s8008_s10 + $0x38] sm:$0xff]   ;;  %s8827_s10 = sld [smem:[#allocation54_spill]] }
0x1c3a   : > { %v4222_v17 = vpop.f32.mrb[66].mxu0  ;;  %5498 = vmatpush3.bf16.msra.mxu0 %v6149_v63  ;;  %v4289_v55 = vsub.s32 0, %v8118_v12 }
0x1c3b   : > { %v8564_v18 = vadd.f32 %v4222_v17, %v8298_v4  ;;  %4230 = vadd.xlane.f32.xlu0 %v8561_v60  ;;  %v5856_v20 = vpop.f32.mrb[67].mxu0  ;;  %v4285_v17 = vld [vmem:[%s8005_s6] sm:$0x3] }
0x1c3c   : > { %v4293_v20 = vsub.s32 1, %v8118_v12  ;;  %v4290_v19 = vrot.slane %v4285_v17, %v4289_v55 }
0x1c3d   : > { %4232 = vadd.xlane.f32.xlu1 %v8564_v18 }
0x1c3e   : > { %v4294_v22 = vrot.slane %v4285_v17, %v4293_v20 }
0x1c3f   : > { %p5329_p6 = scmp.ne.s32.totalorder %s8827_s10, 1 }
0x1cc8   : > { %v4231_v58 = vpop.xlane.xlu0 %4230 }
0x1cc9   : > { %v4234_v4 = vmul.f32 0.0078125, %v4231_v58 }
0x1cca   : > { %v4233_v0 = vpop.xlane.xlu1 %4232 }
0x1ccb   : > { %v8573_v5 = vsub.f32 %v8561_v60, %v4234_v4  ;;  %v4235_v3 = vmul.f32 0.0078125, %v4233_v0 }
0x1ccd   : > { %v8576_v23 = vsub.f32 %v8564_v18, %v4235_v3  ;;  %v4238_v61 = vmul.f32 %v8573_v5, %v8573_v5 }
0x1ccf   : > { %4240 = vadd.xlane.f32.xlu0 %v4238_v61  ;;  %v4239_v50 = vmul.f32 %v8576_v23, %v8576_v23 }
0x1cd3   : > { %4242 = vadd.xlane.f32.xlu0 %v4239_v50 }
0x1d5c   : > { %v4241_v40 = vpop.xlane.xlu0 %4240 }
0x1d5d   : > { %v4244_v42 = vmul.f32 0.0078125, %v4241_v40 }
0x1d5f   : > { %v4246_v43 = vadd.f32 1e-05, %v4244_v42 }
0x1d60   : > { %v4243_v44 = vpop.xlane.xlu0 %4242 }
0x1d61   : > { %6222 = vrsqrt.f32 %v4246_v43  ;;  %v4245_v45 = vmul.f32 0.0078125, %v4243_v44 }
0x1d63   : > { %v4247_v46 = vadd.f32 1e-05, %v4245_v45 }
0x1d65   : > { %6224 = vrsqrt.f32 %v4247_v46  ;;  %v5330_v46 = vld [vmem:[#allocation36] ss:$0 sm:$0xff] (!%p5329_p6) }
0x1d6b   : > { %v6223_v48 = vpop.eup %6222 }
0x1d6c   : > { %v4250_v49 = vmul.f32 %v6223_v48, %v8573_v5 }
0x1d6e   : > { %v4258_v7 = vmul.f32 %v5294_v51, %v4250_v49  ;;  %v5331_v49 = vld [vmem:[#allocation38] ss:$0 sm:$0xff] (!%p5329_p6) }
0x1d6f   : > { %v6225_v52 = vpop.eup %6224 }
0x1d70   : > { %v4251_v53 = vmul.f32 %v6225_v52, %v8576_v23  ;;  %v4266_v6 = vadd.f32 %v5295_v2, %v4258_v7 }
0x1d72   : > { %v4259_v15 = vmul.f32 %v5294_v51, %v4251_v53 }
0x1d74   : > { %v4267_v9 = vadd.f32 %v5295_v2, %v4259_v15 }
0x1d76   : > { %v4268_v10 = vpack.c.bf16 %v4267_v9, %v4266_v6 }
0x1d78   : > { %4410 = vmatmul.mubr.bf16.vlgmr.msra.gmra.mrb[92].mxu1 %v4268_v10 }
0x1e4b   : > { %v4411_v56 = vpop.f32.mrb[92].mxu1 }
0x1e4c   : > { %v4412_v21 = vadd.f32 %v4411_v56, %v4290_v19  ;;  %v4413_v58 = vpop.f32.mrb[93].mxu1 }
0x1e4d   : > { %v4414_v4 = vadd.f32 %v4413_v58, %v4294_v22  ;;  %v4415_v0 = vpop.f32.mrb[94].mxu1 }
0x1e4e   : > { %v4416_v5 = vadd.f32 %v4415_v0, %v4290_v19  ;;  %v4417_v3 = vpop.f32.mrb[95].mxu1  ;;  %v4420_v61 = vmax.f32 %v4412_v21, 0.0 }
0x1e4f   : > { %v4418_v23 = vadd.f32 %v4417_v3, %v4294_v22  ;;  %v4421_v59 = vmax.f32 %v4414_v4, 0.0 }
0x1e50   : > { %v4422_v50 = vmax.f32 %v4416_v5, 0.0 }
0x1e51   : > { %v4423_v54 = vmax.f32 %v4418_v23, 0.0 }
0x1e52   : > { %v4424_v24 = vpack.c.bf16 %v4422_v50, %v4420_v61 }
0x1e53   : > { %v4425_v25 = vpack.c.bf16 %v4423_v54, %v4421_v59 }
0x1e55   : > { %4593 = vmatprep.mubr.bf16.mxu0 %v4425_v25 }
0x1e56   : > { %4594 = vmatmul.mubr.bf16.vlgmr.msra.gmra.mrb[68].mxu0 %v4424_v24 }
0x1f29   : > { %v5499_v12 = vpop.f32.mrb[68].mxu0 }
0x1f2a   : > { %v5500_v27 = vpop.f32.mrb[69].mxu0 }
0x1f2b   : > { %v5501_v57 = vadd.f32 %v5500_v27, %v5499_v12  ;;  %v5502_v62 = vpop.f32.mrb[70].mxu0 }
0x1f2c   : > { %v5503_v28 = vpop.f32.mrb[71].mxu0 }
0x1f2d   : > { %v4596_v8 = vadd.f32 %v5501_v57, %v5312_v26  ;;  %v5504_v29 = vadd.f32 %v5503_v28, %v5502_v62  ;;  %4609 = sbr.rel (%p5329_p6) target bundleno = 8309 (0x2075), region = 212 }
0x1f2f   : > { %v4602_v16 = vadd.f32 %v4596_v8, %v8561_v60  ;;  %v4599_v30 = vadd.f32 %v5504_v29, %v5312_v26 }
0x1f31   : > { %4604 = vst [vmem:[#allocation2] sm:$0xff] %v4602_v16  ;;  %v4603_v1 = vadd.f32 %v4599_v30, %v8564_v18 }
0x1f33   : > { %4605 = vst [vmem:[#allocation2 + $0x8] sm:$0xff] %v4603_v1 }
0x1f38   : > { %v4610_v31 = vld [vmem:[#allocation2] sm:$0xff] }
0x1f39   : > { %4614 = vadd.xlane.f32.xlu0 %v4610_v31 }
0x1f3a   : > { %v4611_v32 = vld [vmem:[#allocation2 + $0x8] sm:$0xff] }
0x1f3d   : > { %4616 = vadd.xlane.f32.xlu0 %v4611_v32 }
0x1fc6   : > { %v4615_v33 = vpop.xlane.xlu0 %4614 }
0x1fc7   : > { %v4618_v34 = vmul.f32 0.0078125, %v4615_v33 }
0x1fc9   : > { %v4620_v35 = vsub.f32 %v4610_v31, %v4618_v34 }
0x1fca   : > { %v4617_v36 = vpop.xlane.xlu0 %4616 }
0x1fcb   : > { %v4619_v37 = vmul.f32 0.0078125, %v4617_v36  ;;  %v4622_v38 = vmul.f32 %v4620_v35, %v4620_v35 }
0x1fcd   : > { %v4621_v11 = vsub.f32 %v4611_v32, %v4619_v37  ;;  %4624 = vadd.xlane.f32.xlu1 %v4622_v38 }
0x1fcf   : > { %v4623_v60 = vmul.f32 %v4621_v11, %v4621_v11 }
0x1fd1   : > { %4626 = vadd.xlane.f32.xlu1 %v4623_v60 }
0x205a   : > { %v4625_v39 = vpop.xlane.xlu1 %4624 }
0x205b   : > { %v4628_v18 = vmul.f32 0.0078125, %v4625_v39 }
0x205d   : > { %v4630_v40 = vadd.f32 1e-05, %v4628_v18 }
0x205e   : > { %v4627_v42 = vpop.xlane.xlu1 %4626 }
0x205f   : > { %6228 = vrsqrt.f32 %v4630_v40  ;;  %v4629_v43 = vmul.f32 0.0078125, %v4627_v42 }
0x2061   : > { %v4631_v44 = vadd.f32 1e-05, %v4629_v43 }
0x2063   : > { %6230 = vrsqrt.f32 %v4631_v44 }
0x2069   : > { %v6229_v45 = vpop.eup %6228 }
0x206a   : > { %v4634_v48 = vmul.f32 %v6229_v45, %v4620_v35 }
0x206c   : > { %v4642_v51 = vmul.f32 %v5330_v46, %v4634_v48 }
0x206d   : > { %v6231_v52 = vpop.eup %6230 }
0x206e   : > { %v4650_v53 = vadd.f32 %v5331_v49, %v4642_v51  ;;  %v4635_v7 = vmul.f32 %v6231_v52, %v4621_v11 }
0x2070   : > { %4652 = vst [vmem:[#allocation39] sm:$0xff] %v4650_v53  ;;  %v4643_v2 = vmul.f32 %v5330_v46, %v4635_v7 }
0x2072   : > { %v4651_v15 = vadd.f32 %v5331_v49, %v4643_v2 }
0x2074   : > { %4653 = vst [vmem:[#allocation39 + $0x8] sm:$0xff] %v4651_v15 }
0x2075 PF: > { %s8828_s13 = sld [smem:[#allocation55_spill]]  ;;  %s7040_s2 = smov [#allocation39]  }
0x2076   : > { %s4663_s16 = sshll.u32 %s7040_s2, 4  ;;  %s4664_s16 = int_to_ptr.vmem [resolvable:$true] %s4663_s16 }
0x2077   : > { %s6876_s6 = scalar_lea.vmem %s4664_s16, 256  ;;  %p6883_p12 = scmp.lt.s32.totalorder %s4664_s16, %s4664_s16 }
0x2078   : > { %p6877_p9 = scmp.ne.s32.totalorder %s4664_s16, %s6876_s6  ;;  %p6884_p5 = scmp.lt.s32.totalorder %s6876_s6, %s6876_s6 }
0x207a   : > { %p6885_p8 = por %p6884_p5, %p6883_p12 }
0x207b   : > { %p5943_p10 = scmp.eq.s32.totalorder %s8828_s13, 1 }
0x207d   : > { %p6878_p11 = pnand %p6877_p9, %p5943_p10 }
0x207f   : > { %p6879_p1 = pneg %p6878_p11 }
0x2081   : > { %p6886_p2 = pnand %p6885_p8, %p6879_p1 }
0x2083   : > { %6889 = shalt.err (!%p6886_p2)
}
0x2084   : > { %s8829_s12 = sld [smem:[#allocation81_spill]] }
0x208a   : > { %s6890_s28 = scalar_lea.hbm %s8829_s12, 256 }
0x208b   : > { %p6891_p13 = scmp.ne.s32.totalorder %s8829_s12, %s6890_s28  ;;  %p6896_p3 = scmp.lt.u32.totalorder %s6890_s28, %s8829_s12 }
0x208d   : > { %p6892_p0 = pnand %p6891_p13, %p5943_p10 }
0x208f   : > { %p6893_p7 = pneg %p6892_p0 }
0x2091   : > { %p6898_p4 = pnand %p6896_p3, %p6893_p7 }
0x2093   : > { %6901 = shalt.err (!%p6898_p4)
}
0x2094   : > { %s7041_s7 = smov 128   ;;  %s7042_s25 = smov 8  }
0x2095   : > { %5914 = dma.vmem_to_hbm [thread:$0]  (%p5943_p10), %s4664_s16, 256, %s8829_s12, [#allocation5], %s7041_s7, %s7041_s7, %s7042_s25  }
0x2096   : > { %6975 = dma.done.wait (%p5943_p10), [#allocation5], 256  }
0x2097   : > { %6977 = vsyncadd (%p5943_p10), [#allocation5], 4294967040 }
0x2098 PF: > { %s64_s1 = sadd.s32 1, %s7000_s1   ;;  %s8830_s4 = sld [smem:[#allocation53_spill]] }
0x2099   : > { %p61_p6 = scmp.ge.s32.totalorder %s64_s1, 4   ;;  %s8831_s17 = sld [smem:[#allocation58_spill]] }
0x209a   : > { %s8832_s9 = sld [smem:[#allocation56_spill]]  ;;  %s8833_s30 = smov %s6988_s24 }
0x209b   : > { %s8835_s25 = smov %s6996_s5  ;;  %63 = sbr.rel (!%p61_p6) target bundleno = 47 (0x2f), region = 385 }
0x209f   : > { %s8834_s24 = smov %s8831_s17 }
0x20a0   : > { %s8836_s5 = smov %s8832_s9 }
0x20a2   :  { %4679 = vsyncpa [#allocation4], 1 }
0x20a3   :  { %4681 = vsyncpa [#allocation4 + $0x1], 1 }
0x20a4   :  { %4682 = vsyncpa [#allocation7], 1 }
0x20a5   :  { %4683 = vsyncpa [#allocation10], 1 }
0x20a6   :  { %4685 = vsyncpa [#allocation10 + $0x1], 1 }
0x20a7   :  { %4686 = vsyncpa [#allocation13], 1 }
0x20a8   :  { %4688 = vsyncpa [#allocation13 + $0x1], 1 }
0x20a9   :  { %4689 = vsyncpa [#allocation16], 1 }
0x20aa   :  { %4691 = vsyncpa [#allocation16 + $0x1], 1 }
0x20ab   :  { %4692 = vsyncpa [#allocation19], 1 }
0x20ac   :  { %4694 = vsyncpa [#allocation19 + $0x1], 1 }
0x20ad   :  { %4695 = vsyncpa [#allocation22], 1 }
0x20ae   :  { %4697 = vsyncpa [#allocation22 + $0x1], 1 }
0x20af   :  { %4698 = vsyncpa [#allocation25], 1 }
0x20b0   :  { %4700 = vsyncpa [#allocation25 + $0x1], 1 }
0x20b1   :  { %4701 = vsyncpa [#allocation28], 1 }
0x20b2   :  { %4703 = vsyncpa [#allocation28 + $0x1], 1 }
0x20b3   :  { %4704 = vsyncpa [#allocation31], 1 }
0x20b4   :  { %4706 = vsyncpa [#allocation31 + $0x1], 1 }
0x20b5   :  { %4707 = vsyncpa [#allocation34], 1 }
0x20b6   :  { %4709 = vsyncpa [#allocation34 + $0x1], 1 }
0x20b7   :  { %4710 = vsyncpa [#allocation37], 1 }
0x20b8   :  { %4711 = vsyncpa [#allocation5], 1 }
0x20b9   :  { %4713 = vsyncpa [#allocation5 + $0x1], 1 }

</bundles_post_ra>
